<compile_context>
chip_gen: v7x
topology: tpu7x:2x2x1
jax: 0.10.0
libtpu: 0.0.40
codegen_flags: <defaults>
</compile_context>

<pallas_src>
import functools

import jax
import jax.numpy as jnp
from jax.experimental import pallas as pl
from jax.experimental.pallas import tpu as pltpu

K = 7        # depthwise kernel size
PAD = 3      # 'same' padding
BN_EPS = 1e-5
LANE = 128   # channel-block size (lane width)


# ------------------ pass A: depthwise1 + ReLU + lin1 reduction -----------------
def _conv1_lin1_kernel(x_ref, w1_ref, b1_ref, wl_ref, s_ref):
    # x_ref : (Hp, Wp, Cb) zero-padded input slab for one (batch, channel-block)
    # w1_ref: (49, Cb) depthwise taps        b1_ref: (1, Cb)
    # wl_ref: (H, W)   lin1 spatial weights
    # s_ref : (1, Cb)  sum_{h,w} relu(conv1)[h,w,c] * wl[h,w]
    H, W = wl_ref.shape
    Cb = x_ref.shape[-1]
    w1 = w1_ref[...]                                    # (49, Cb), stays resident
    b1 = b1_ref[...]                                    # (1, Cb)

    def row_body(h, s_acc):
        # Output-stationary: the (W, Cb) accumulator for one output row lives in
        # vregs for all 49 taps.
        acc = jnp.zeros((W, Cb), jnp.float32)
        for dy in range(K):
            row = x_ref[h + dy]                         # (Wp, Cb) aligned load
            for dx in range(K):
                tap = w1[dy * K + dx:dy * K + dx + 1, :]            # (1, Cb)
                acc = acc + row[dx:dx + W, :] * tap
        x1 = jnp.maximum(acc + b1, 0.0)                 # (W, Cb)
        # lin1 spatial reduction on the MXU (free filler while VPU is busy).
        wl_row = wl_ref[pl.ds(h, 1), :]                 # (1, W)
        return s_acc + jnp.dot(wl_row, x1, preferred_element_type=jnp.float32)

    s_acc = jax.lax.fori_loop(0, H, row_body, jnp.zeros((1, Cb), jnp.float32))
    s_ref[...] = s_acc


# ------ pass B: (scale folded into taps) conv2 + residual + BN partials --------
def _scale_conv2_kernel(x_ref, s_ref, w2_ref, b2_ref, y_ref, ysum_ref, yss_ref):
    # x_ref : (Hp, Wp, Cb) padded input slab         s_ref: (1, Cb) channel scale
    # y_ref : (H, W, Cb)   pre-BN residual output
    # ysum_ref / yss_ref: (1, Cb) per-(batch, channel-block) BN partials
    H, W, Cb = y_ref.shape
    # Fold the channel scale into the taps: relu(x*s) == s*relu(x) because s>=0,
    # so the rescaled activation slab is never materialized.
    w2_eff = w2_ref[...] * s_ref[...]                   # (49, Cb)
    b2 = b2_ref[...]                                    # (1, Cb)
    ones_row = jnp.ones((1, W), jnp.float32)

    def row_body(h, sum_y):
        acc = jnp.zeros((W, Cb), jnp.float32)
        for dy in range(K):
            row = jnp.maximum(x_ref[h + dy], 0.0)       # relu(x), lazily per row
            for dx in range(K):
                tap = w2_eff[dy * K + dx:dy * K + dx + 1, :]
                acc = acc + row[dx:dx + W, :] * tap
        x3 = jnp.maximum(acc + b2, 0.0)                 # (W, Cb)
        y_row = x_ref[h + PAD][PAD:PAD + W, :] + x3     # residual add
        y_ref[h] = y_row
        # per-row channel sums on the MXU
        return sum_y + jnp.dot(ones_row, y_row, preferred_element_type=jnp.float32)

    sum_y = jax.lax.fori_loop(0, H, row_body, jnp.zeros((1, Cb), jnp.float32))

    # Second moment centered at the LOCAL mean (merged across the batch with the
    # parallel-variance formula in the wrapper) — avoids E[y^2]-E[y]^2 cancellation.
    mean_local = sum_y * (1.0 / (H * W))

    def ss_body(h, ss):
        d = y_ref[h] - mean_local
        return ss + jnp.dot(ones_row, d * d, preferred_element_type=jnp.float32)

    ss = jax.lax.fori_loop(0, H, ss_body, jnp.zeros((1, Cb), jnp.float32))

    ysum_ref[...] = sum_y
    yss_ref[...] = ss


# -------------------- pass C: BN normalize (folded) + ReLU ---------------------
def _bn_relu_kernel(y_ref, scale_ref, shift_ref, out_ref):
    Cb = out_ref.shape[-1]
    out_ref[...] = jnp.maximum(
        y_ref[...] * scale_ref[...].reshape(1, 1, Cb)
        + shift_ref[...].reshape(1, 1, Cb), 0.0)


@functools.partial(jax.jit, static_argnames=("cb",))
def clfe_block(x_nchw, w1, b1, wl, bl, w2, b2, gamma, beta, *, cb=LANE):
    """CLFE_block forward. x_nchw: (B, C, H, W) float32. Returns (B, C, H, W)."""
    B, C, H, W = x_nchw.shape
    Cb = min(cb, C)
    assert C % Cb == 0 and (Cb % LANE == 0 or Cb == C)
    nC = C // Cb
    Hp = H + 2 * PAD
    Wp = ((W + 2 * PAD + 7) // 8) * 8            # sublane-aligned padded width

    # Single padded channels-last copy.  Conv halos are resolved from the
    # VMEM-resident block inside the kernels -> no x_halo duplication in HBM and
    # no in-kernel zero fill.  Channel blocks are sliced directly by BlockSpec.
    x = jnp.transpose(x_nchw, (0, 2, 3, 1)).astype(jnp.float32)       # NHWC
    xp = jnp.pad(x, ((0, 0), (PAD, PAD), (PAD, Wp - W - PAD), (0, 0)))

    conv_flops = 2 * K * K * B * H * W * C
    conv_params = pltpu.CompilerParams(
        dimension_semantics=("parallel", "parallel"),
        vmem_limit_bytes=64 * 1024 * 1024)

    # ---- pass A: depthwise1 + ReLU fused with lin1 spatial reduction -> s ----
    s_raw = pl.pallas_call(
        _conv1_lin1_kernel,
        out_shape=jax.ShapeDtypeStruct((B, 1, C), jnp.float32),
        grid=(B, nC),
        in_specs=[
            pl.BlockSpec((pl.Squeezed(), Hp, Wp, Cb), lambda b, c: (b, 0, 0, c)),
            pl.BlockSpec((K * K, Cb), lambda b, c: (0, c)),
            pl.BlockSpec((1, Cb), lambda b, c: (0, c)),
            pl.BlockSpec((H, W), lambda b, c: (0, 0)),
        ],
        out_specs=pl.BlockSpec((pl.Squeezed(), 1, Cb), lambda b, c: (b, 0, c)),
        compiler_params=conv_params,
        cost_estimate=pl.CostEstimate(
            flops=conv_flops + 2 * B * H * W * C, transcendentals=0,
            bytes_accessed=4 * (B * Hp * Wp * C + K * K * C + H * W + B * C)),
    )(xp, w1, b1, wl)

    s = jnp.maximum(s_raw + bl.reshape(1, 1, 1), 0.0)                 # (B, 1, C)

    # ---- pass B: rescale (folded) + conv2 + ReLU + residual + BN partials ----
    y, ysum, yss = pl.pallas_call(
        _scale_conv2_kernel,
        out_shape=(jax.ShapeDtypeStruct((B, H, W, C), jnp.float32),
                   jax.ShapeDtypeStruct((B, 1, C), jnp.float32),
                   jax.ShapeDtypeStruct((B, 1, C), jnp.float32)),
        grid=(B, nC),
        in_specs=[
            pl.BlockSpec((pl.Squeezed(), Hp, Wp, Cb), lambda b, c: (b, 0, 0, c)),
            pl.BlockSpec((pl.Squeezed(), 1, Cb), lambda b, c: (b, 0, c)),
            pl.BlockSpec((K * K, Cb), lambda b, c: (0, c)),
            pl.BlockSpec((1, Cb), lambda b, c: (0, c)),
        ],
        out_specs=(
            pl.BlockSpec((pl.Squeezed(), H, W, Cb), lambda b, c: (b, 0, 0, c)),
            pl.BlockSpec((pl.Squeezed(), 1, Cb), lambda b, c: (b, 0, c)),
            pl.BlockSpec((pl.Squeezed(), 1, Cb), lambda b, c: (b, 0, c)),
        ),
        compiler_params=conv_params,
        cost_estimate=pl.CostEstimate(
            flops=conv_flops + 8 * B * H * W * C, transcendentals=0,
            bytes_accessed=4 * (B * Hp * Wp * C + 2 * B * H * W * C)),
    )(xp, s, w2, b2)

    # ---- BN batch stats: exact parallel-variance (Chan) merge across batch ----
    n_local = H * W
    total = B * n_local
    sum_b = ysum[:, 0, :]                                 # (B, C)
    ss_b = yss[:, 0, :]                                   # (B, C)
    mean = jnp.sum(sum_b, axis=0) / total                 # (C,)
    mean_b = sum_b / n_local
    var = (jnp.sum(ss_b, axis=0)
           + n_local * jnp.sum((mean_b - mean[None, :]) ** 2, axis=0)) / total
    inv = jax.lax.rsqrt(var + BN_EPS)
    g = gamma.reshape(C)
    scale = (g * inv).reshape(1, C)
    shift = (beta.reshape(C) - g * inv * mean).reshape(1, C)

    # ---- pass C: normalize + ReLU (tiled elementwise) -------------------------
    THc = next(d for d in (32, 16, 8, 4, 2, 1) if H % d == 0)
    nR = H // THc
    out_nhwc = pl.pallas_call(
        _bn_relu_kernel,
        out_shape=jax.ShapeDtypeStruct((B, H, W, C), jnp.float32),
        grid=(B, nC, nR),
        in_specs=[
            pl.BlockSpec((pl.Squeezed(), THc, W, Cb), lambda b, c, r: (b, r, 0, c)),
            pl.BlockSpec((1, Cb), lambda b, c, r: (0, c)),
            pl.BlockSpec((1, Cb), lambda b, c, r: (0, c)),
        ],
        out_specs=pl.BlockSpec((pl.Squeezed(), THc, W, Cb),
                               lambda b, c, r: (b, r, 0, c)),
        compiler_params=pltpu.CompilerParams(
            dimension_semantics=("parallel", "parallel", "parallel")),
        cost_estimate=pl.CostEstimate(
            flops=3 * B * H * W * C, transcendentals=0,
            bytes_accessed=8 * B * H * W * C),
    )(y, scale, shift)

    # TODO(synk): the final NHWC->NCHW transpose stays in XLA (one extra output
    # read+write); fusing it into pass C would need an in-kernel (W,Cb)->(Cb,W)
    # transpose whose Mosaic lowering is shape-sensitive, so it is left out.
    return jnp.transpose(out_nhwc, (0, 3, 1, 2))


# ---------------- pure-JAX reference (for correctness check) -------------------
def _dw_conv_ref(x, w49, b):
    C = x.shape[-1]
    k = w49.reshape(K, K, 1, C)
    y = jax.lax.conv_general_dilated(
        x, k, window_strides=(1, 1), padding=((PAD, PAD), (PAD, PAD)),
        dimension_numbers=("NHWC", "HWIO", "NHWC"), feature_group_count=C)
    return y + b.reshape(1, 1, 1, C)


def _reference_nchw(x_nchw, w1, b1, wl, bl, w2, b2, gamma, beta):
    x = jnp.transpose(x_nchw, (0, 2, 3, 1))
    B, H, W, C = x.shape
    orig = x
    t = jax.nn.relu(_dw_conv_ref(x, w1, b1))
    s = jax.nn.relu(jnp.einsum("bhwc,hw->bc", t, wl) + bl[0, 0])
    t = jax.nn.relu(orig * s[:, None, None, :])
    t = jax.nn.relu(_dw_conv_ref(t, w2, b2))
    y = orig + t
    mean = jnp.mean(y, axis=(0, 1, 2))
    var = jnp.mean((y - mean) ** 2, axis=(0, 1, 2))
    yhat = (y - mean) * jax.lax.rsqrt(var + BN_EPS)
    out = jax.nn.relu(yhat * gamma.reshape(1, 1, 1, C) + beta.reshape(1, 1, 1, C))
    return jnp.transpose(out, (0, 3, 1, 2))


if __name__ == "__main__":
    B, C, H, W = 2, 128, 16, 16   # small test shapes (module uses C=512, 224x224)

    key = jax.random.PRNGKey(0)
    ks = jax.random.split(key, 10)
    x = jax.random.normal(ks[0], (B, C, H, W), jnp.float32)

    # depthwise weights: PyTorch (C,1,7,7) stored taps-major as (49, C)
    w1 = 0.05 * jax.random.normal(ks[1], (K * K, C), jnp.float32)
    b1 = 0.05 * jax.random.normal(ks[2], (1, C), jnp.float32)
    # lin1: Linear(H*W, 1): weight (1, H*W) -> (H, W); bias scalar -> (1, 1)
    wl = 0.02 * jax.random.normal(ks[3], (H, W), jnp.float32)
    bl = 0.02 * jax.random.normal(ks[4], (1, 1), jnp.float32)
    w2 = 0.05 * jax.random.normal(ks[5], (K * K, C), jnp.float32)
    b2 = 0.05 * jax.random.normal(ks[6], (1, C), jnp.float32)
    gamma = 1.0 + 0.1 * jax.random.normal(ks[7], (1, C), jnp.float32)
    beta = 0.1 * jax.random.normal(ks[8], (1, C), jnp.float32)

    out = clfe_block(x, w1, b1, wl, bl, w2, b2, gamma, beta)
    out = jax.block_until_ready(out)

    ref = _reference_nchw(x, w1, b1, wl, bl, w2, b2, gamma, beta)
    ref = jax.block_until_ready(ref)

    assert out.shape == (B, C, H, W)
    assert bool(jnp.allclose(out, ref, atol=2e-3, rtol=2e-3)), "mismatch vs reference"
    print("KERNEL_OK")
</pallas_src>

<mosaic_0001>
module attributes {stable_mosaic.version = 11 : i64} {
  func.func @_scale_conv2_kernel(%arg0: i32, %arg1: i32, %arg2: memref<1x22x24x128xf32, #tpu.memory_space<vmem>>, %arg3: memref<1x1x128xf32, #tpu.memory_space<vmem>>, %arg4: memref<49x128xf32, #tpu.memory_space<vmem>>, %arg5: memref<1x128xf32, #tpu.memory_space<vmem>>, %arg6: memref<1x16x16x128xf32, #tpu.memory_space<vmem>>, %arg7: memref<1x1x128xf32, #tpu.memory_space<vmem>>, %arg8: memref<1x1x128xf32, #tpu.memory_space<vmem>>) attributes {dimension_semantics = [#tpu.dimension_semantics<parallel>, #tpu.dimension_semantics<parallel>], iteration_bounds = array<i64: 2, 1>, scalar_prefetch = 0 : i64, scratch_operands = 0 : i64, tpu.core_type = #tpu.core_type<tc>, window_params = [{transform_indices = @transform_0, window_bounds = array<i64: 1, 22, 24, 128>}, {transform_indices = @transform_1, window_bounds = array<i64: 1, 1, 128>}, {transform_indices = @transform_2, window_bounds = array<i64: 49, 128>}, {transform_indices = @transform_3, window_bounds = array<i64: 1, 128>}, {transform_indices = @transform_4, window_bounds = array<i64: 1, 16, 16, 128>}, {transform_indices = @transform_5, window_bounds = array<i64: 1, 1, 128>}, {transform_indices = @transform_6, window_bounds = array<i64: 1, 1, 128>}]} {
    %c0 = arith.constant 0 : index
    %c0_0 = arith.constant 0 : index
    %0 = vector.load %arg4[%c0, %c0_0] : memref<49x128xf32, #tpu.memory_space<vmem>>, vector<49x128xf32>
    %c0_1 = arith.constant 0 : index
    %c0_2 = arith.constant 0 : index
    %c0_3 = arith.constant 0 : index
    %1 = vector.load %arg3[%c0_1, %c0_2, %c0_3] : memref<1x1x128xf32, #tpu.memory_space<vmem>>, vector<1x1x128xf32>
    %2 = vector.shape_cast %1 : vector<1x1x128xf32> to vector<1x128xf32>
    %3 = vector.broadcast %2 : vector<1x128xf32> to vector<49x128xf32>
    %4 = arith.mulf %0, %3 : vector<49x128xf32>
    %c0_4 = arith.constant 0 : index
    %c0_5 = arith.constant 0 : index
    %5 = vector.load %arg5[%c0_4, %c0_5] : memref<1x128xf32, #tpu.memory_space<vmem>>, vector<1x128xf32>
    %cst = arith.constant 1.000000e+00 : f32
    %6 = vector.broadcast %cst : f32 to vector<1x16xf32>
    %cst_6 = arith.constant 0.000000e+00 : f32
    %7 = vector.broadcast %cst_6 : f32 to vector<1x128xf32>
    %c0_i32 = arith.constant 0 : i32
    %c16_i32 = arith.constant 16 : i32
    %8 = arith.addi %c0_i32, %c16_i32 : i32
    %c1_i32 = arith.constant 1 : i32
    %9 = scf.for %arg9 = %c0_i32 to %8 step %c1_i32 iter_args(%arg10 = %7) -> (vector<1x128xf32>)  : i32 {
      %cst_20 = arith.constant 0.000000e+00 : f32
      %21 = vector.broadcast %cst_20 : f32 to vector<16x128xf32>
      %c0_i32_21 = arith.constant 0 : i32
      %22 = arith.addi %arg9, %c0_i32_21 : i32
      %c0_22 = arith.constant 0 : index
      %23 = arith.index_cast %22 : i32 to index
      %c0_23 = arith.constant 0 : index
      %c0_24 = arith.constant 0 : index
      %24 = vector.load %arg2[%c0_22, %23, %c0_23, %c0_24] : memref<1x22x24x128xf32, #tpu.memory_space<vmem>>, vector<1x1x24x128xf32>
      %25 = vector.shape_cast %24 : vector<1x1x24x128xf32> to vector<24x128xf32>
      %cst_25 = arith.constant 0.000000e+00 : f32
      %26 = vector.broadcast %cst_25 : f32 to vector<24x128xf32>
      %27 = arith.maximumf %25, %26 : vector<24x128xf32>
      %28 = vector.extract_strided_slice %4 {offsets = [0, 0], sizes = [1, 128], strides = [1, 1]} : vector<49x128xf32> to vector<1x128xf32>
      %29 = vector.extract_strided_slice %27 {offsets = [0, 0], sizes = [16, 128], strides = [1, 1]} : vector<24x128xf32> to vector<16x128xf32>
      %30 = vector.broadcast %28 : vector<1x128xf32> to vector<16x128xf32>
      %31 = arith.mulf %29, %30 : vector<16x128xf32>
      %32 = arith.addf %21, %31 : vector<16x128xf32>
      %33 = vector.extract_strided_slice %4 {offsets = [1, 0], sizes = [1, 128], strides = [1, 1]} : vector<49x128xf32> to vector<1x128xf32>
      %34 = vector.extract_strided_slice %27 {offsets = [1, 0], sizes = [16, 128], strides = [1, 1]} : vector<24x128xf32> to vector<16x128xf32>
      %35 = vector.broadcast %33 : vector<1x128xf32> to vector<16x128xf32>
      %36 = arith.mulf %34, %35 : vector<16x128xf32>
      %37 = arith.addf %32, %36 : vector<16x128xf32>
      %38 = vector.extract_strided_slice %4 {offsets = [2, 0], sizes = [1, 128], strides = [1, 1]} : vector<49x128xf32> to vector<1x128xf32>
      %39 = vector.extract_strided_slice %27 {offsets = [2, 0], sizes = [16, 128], strides = [1, 1]} : vector<24x128xf32> to vector<16x128xf32>
      %40 = vector.broadcast %38 : vector<1x128xf32> to vector<16x128xf32>
      %41 = arith.mulf %39, %40 : vector<16x128xf32>
      %42 = arith.addf %37, %41 : vector<16x128xf32>
      %43 = vector.extract_strided_slice %4 {offsets = [3, 0], sizes = [1, 128], strides = [1, 1]} : vector<49x128xf32> to vector<1x128xf32>
      %44 = vector.extract_strided_slice %27 {offsets = [3, 0], sizes = [16, 128], strides = [1, 1]} : vector<24x128xf32> to vector<16x128xf32>
      %45 = vector.broadcast %43 : vector<1x128xf32> to vector<16x128xf32>
      %46 = arith.mulf %44, %45 : vector<16x128xf32>
      %47 = arith.addf %42, %46 : vector<16x128xf32>
      %48 = vector.extract_strided_slice %4 {offsets = [4, 0], sizes = [1, 128], strides = [1, 1]} : vector<49x128xf32> to vector<1x128xf32>
      %49 = vector.extract_strided_slice %27 {offsets = [4, 0], sizes = [16, 128], strides = [1, 1]} : vector<24x128xf32> to vector<16x128xf32>
      %50 = vector.broadcast %48 : vector<1x128xf32> to vector<16x128xf32>
      %51 = arith.mulf %49, %50 : vector<16x128xf32>
      %52 = arith.addf %47, %51 : vector<16x128xf32>
      %53 = vector.extract_strided_slice %4 {offsets = [5, 0], sizes = [1, 128], strides = [1, 1]} : vector<49x128xf32> to vector<1x128xf32>
      %54 = vector.extract_strided_slice %27 {offsets = [5, 0], sizes = [16, 128], strides = [1, 1]} : vector<24x128xf32> to vector<16x128xf32>
      %55 = vector.broadcast %53 : vector<1x128xf32> to vector<16x128xf32>
      %56 = arith.mulf %54, %55 : vector<16x128xf32>
      %57 = arith.addf %52, %56 : vector<16x128xf32>
      %58 = vector.extract_strided_slice %4 {offsets = [6, 0], sizes = [1, 128], strides = [1, 1]} : vector<49x128xf32> to vector<1x128xf32>
      %59 = vector.extract_strided_slice %27 {offsets = [6, 0], sizes = [16, 128], strides = [1, 1]} : vector<24x128xf32> to vector<16x128xf32>
      %60 = vector.broadcast %58 : vector<1x128xf32> to vector<16x128xf32>
      %61 = arith.mulf %59, %60 : vector<16x128xf32>
      %62 = arith.addf %57, %61 : vector<16x128xf32>
      %c1_i32_26 = arith.constant 1 : i32
      %63 = arith.addi %arg9, %c1_i32_26 : i32
      %c0_27 = arith.constant 0 : index
      %64 = arith.index_cast %63 : i32 to index
      %c0_28 = arith.constant 0 : index
      %c0_29 = arith.constant 0 : index
      %65 = vector.load %arg2[%c0_27, %64, %c0_28, %c0_29] : memref<1x22x24x128xf32, #tpu.memory_space<vmem>>, vector<1x1x24x128xf32>
      %66 = vector.shape_cast %65 : vector<1x1x24x128xf32> to vector<24x128xf32>
      %cst_30 = arith.constant 0.000000e+00 : f32
      %67 = vector.broadcast %cst_30 : f32 to vector<24x128xf32>
      %68 = arith.maximumf %66, %67 : vector<24x128xf32>
      %69 = vector.extract_strided_slice %4 {offsets = [7, 0], sizes = [1, 128], strides = [1, 1]} : vector<49x128xf32> to vector<1x128xf32>
      %70 = vector.extract_strided_slice %68 {offsets = [0, 0], sizes = [16, 128], strides = [1, 1]} : vector<24x128xf32> to vector<16x128xf32>
      %71 = vector.broadcast %69 : vector<1x128xf32> to vector<16x128xf32>
      %72 = arith.mulf %70, %71 : vector<16x128xf32>
      %73 = arith.addf %62, %72 : vector<16x128xf32>
      %74 = vector.extract_strided_slice %4 {offsets = [8, 0], sizes = [1, 128], strides = [1, 1]} : vector<49x128xf32> to vector<1x128xf32>
      %75 = vector.extract_strided_slice %68 {offsets = [1, 0], sizes = [16, 128], strides = [1, 1]} : vector<24x128xf32> to vector<16x128xf32>
      %76 = vector.broadcast %74 : vector<1x128xf32> to vector<16x128xf32>
      %77 = arith.mulf %75, %76 : vector<16x128xf32>
      %78 = arith.addf %73, %77 : vector<16x128xf32>
      %79 = vector.extract_strided_slice %4 {offsets = [9, 0], sizes = [1, 128], strides = [1, 1]} : vector<49x128xf32> to vector<1x128xf32>
      %80 = vector.extract_strided_slice %68 {offsets = [2, 0], sizes = [16, 128], strides = [1, 1]} : vector<24x128xf32> to vector<16x128xf32>
      %81 = vector.broadcast %79 : vector<1x128xf32> to vector<16x128xf32>
      %82 = arith.mulf %80, %81 : vector<16x128xf32>
      %83 = arith.addf %78, %82 : vector<16x128xf32>
      %84 = vector.extract_strided_slice %4 {offsets = [10, 0], sizes = [1, 128], strides = [1, 1]} : vector<49x128xf32> to vector<1x128xf32>
      %85 = vector.extract_strided_slice %68 {offsets = [3, 0], sizes = [16, 128], strides = [1, 1]} : vector<24x128xf32> to vector<16x128xf32>
      %86 = vector.broadcast %84 : vector<1x128xf32> to vector<16x128xf32>
      %87 = arith.mulf %85, %86 : vector<16x128xf32>
      %88 = arith.addf %83, %87 : vector<16x128xf32>
      %89 = vector.extract_strided_slice %4 {offsets = [11, 0], sizes = [1, 128], strides = [1, 1]} : vector<49x128xf32> to vector<1x128xf32>
      %90 = vector.extract_strided_slice %68 {offsets = [4, 0], sizes = [16, 128], strides = [1, 1]} : vector<24x128xf32> to vector<16x128xf32>
      %91 = vector.broadcast %89 : vector<1x128xf32> to vector<16x128xf32>
      %92 = arith.mulf %90, %91 : vector<16x128xf32>
      %93 = arith.addf %88, %92 : vector<16x128xf32>
      %94 = vector.extract_strided_slice %4 {offsets = [12, 0], sizes = [1, 128], strides = [1, 1]} : vector<49x128xf32> to vector<1x128xf32>
      %95 = vector.extract_strided_slice %68 {offsets = [5, 0], sizes = [16, 128], strides = [1, 1]} : vector<24x128xf32> to vector<16x128xf32>
      %96 = vector.broadcast %94 : vector<1x128xf32> to vector<16x128xf32>
      %97 = arith.mulf %95, %96 : vector<16x128xf32>
      %98 = arith.addf %93, %97 : vector<16x128xf32>
      %99 = vector.extract_strided_slice %4 {offsets = [13, 0], sizes = [1, 128], strides = [1, 1]} : vector<49x128xf32> to vector<1x128xf32>
      %100 = vector.extract_strided_slice %68 {offsets = [6, 0], sizes = [16, 128], strides = [1, 1]} : vector<24x128xf32> to vector<16x128xf32>
      %101 = vector.broadcast %99 : vector<1x128xf32> to vector<16x128xf32>
      %102 = arith.mulf %100, %101 : vector<16x128xf32>
      %103 = arith.addf %98, %102 : vector<16x128xf32>
      %c2_i32 = arith.constant 2 : i32
      %104 = arith.addi %arg9, %c2_i32 : i32
      %c0_31 = arith.constant 0 : index
      %105 = arith.index_cast %104 : i32 to index
      %c0_32 = arith.constant 0 : index
      %c0_33 = arith.constant 0 : index
      %106 = vector.load %arg2[%c0_31, %105, %c0_32, %c0_33] : memref<1x22x24x128xf32, #tpu.memory_space<vmem>>, vector<1x1x24x128xf32>
      %107 = vector.shape_cast %106 : vector<1x1x24x128xf32> to vector<24x128xf32>
      %cst_34 = arith.constant 0.000000e+00 : f32
      %108 = vector.broadcast %cst_34 : f32 to vector<24x128xf32>
      %109 = arith.maximumf %107, %108 : vector<24x128xf32>
      %110 = vector.extract_strided_slice %4 {offsets = [14, 0], sizes = [1, 128], strides = [1, 1]} : vector<49x128xf32> to vector<1x128xf32>
      %111 = vector.extract_strided_slice %109 {offsets = [0, 0], sizes = [16, 128], strides = [1, 1]} : vector<24x128xf32> to vector<16x128xf32>
      %112 = vector.broadcast %110 : vector<1x128xf32> to vector<16x128xf32>
      %113 = arith.mulf %111, %112 : vector<16x128xf32>
      %114 = arith.addf %103, %113 : vector<16x128xf32>
      %115 = vector.extract_strided_slice %4 {offsets = [15, 0], sizes = [1, 128], strides = [1, 1]} : vector<49x128xf32> to vector<1x128xf32>
      %116 = vector.extract_strided_slice %109 {offsets = [1, 0], sizes = [16, 128], strides = [1, 1]} : vector<24x128xf32> to vector<16x128xf32>
      %117 = vector.broadcast %115 : vector<1x128xf32> to vector<16x128xf32>
      %118 = arith.mulf %116, %117 : vector<16x128xf32>
      %119 = arith.addf %114, %118 : vector<16x128xf32>
      %120 = vector.extract_strided_slice %4 {offsets = [16, 0], sizes = [1, 128], strides = [1, 1]} : vector<49x128xf32> to vector<1x128xf32>
      %121 = vector.extract_strided_slice %109 {offsets = [2, 0], sizes = [16, 128], strides = [1, 1]} : vector<24x128xf32> to vector<16x128xf32>
      %122 = vector.broadcast %120 : vector<1x128xf32> to vector<16x128xf32>
      %123 = arith.mulf %121, %122 : vector<16x128xf32>
      %124 = arith.addf %119, %123 : vector<16x128xf32>
      %125 = vector.extract_strided_slice %4 {offsets = [17, 0], sizes = [1, 128], strides = [1, 1]} : vector<49x128xf32> to vector<1x128xf32>
      %126 = vector.extract_strided_slice %109 {offsets = [3, 0], sizes = [16, 128], strides = [1, 1]} : vector<24x128xf32> to vector<16x128xf32>
      %127 = vector.broadcast %125 : vector<1x128xf32> to vector<16x128xf32>
      %128 = arith.mulf %126, %127 : vector<16x128xf32>
      %129 = arith.addf %124, %128 : vector<16x128xf32>
      %130 = vector.extract_strided_slice %4 {offsets = [18, 0], sizes = [1, 128], strides = [1, 1]} : vector<49x128xf32> to vector<1x128xf32>
      %131 = vector.extract_strided_slice %109 {offsets = [4, 0], sizes = [16, 128], strides = [1, 1]} : vector<24x128xf32> to vector<16x128xf32>
      %132 = vector.broadcast %130 : vector<1x128xf32> to vector<16x128xf32>
      %133 = arith.mulf %131, %132 : vector<16x128xf32>
      %134 = arith.addf %129, %133 : vector<16x128xf32>
      %135 = vector.extract_strided_slice %4 {offsets = [19, 0], sizes = [1, 128], strides = [1, 1]} : vector<49x128xf32> to vector<1x128xf32>
      %136 = vector.extract_strided_slice %109 {offsets = [5, 0], sizes = [16, 128], strides = [1, 1]} : vector<24x128xf32> to vector<16x128xf32>
      %137 = vector.broadcast %135 : vector<1x128xf32> to vector<16x128xf32>
      %138 = arith.mulf %136, %137 : vector<16x128xf32>
      %139 = arith.addf %134, %138 : vector<16x128xf32>
      %140 = vector.extract_strided_slice %4 {offsets = [20, 0], sizes = [1, 128], strides = [1, 1]} : vector<49x128xf32> to vector<1x128xf32>
      %141 = vector.extract_strided_slice %109 {offsets = [6, 0], sizes = [16, 128], strides = [1, 1]} : vector<24x128xf32> to vector<16x128xf32>
      %142 = vector.broadcast %140 : vector<1x128xf32> to vector<16x128xf32>
      %143 = arith.mulf %141, %142 : vector<16x128xf32>
      %144 = arith.addf %139, %143 : vector<16x128xf32>
      %c3_i32 = arith.constant 3 : i32
      %145 = arith.addi %arg9, %c3_i32 : i32
      %c0_35 = arith.constant 0 : index
      %146 = arith.index_cast %145 : i32 to index
      %c0_36 = arith.constant 0 : index
      %c0_37 = arith.constant 0 : index
      %147 = vector.load %arg2[%c0_35, %146, %c0_36, %c0_37] : memref<1x22x24x128xf32, #tpu.memory_space<vmem>>, vector<1x1x24x128xf32>
      %148 = vector.shape_cast %147 : vector<1x1x24x128xf32> to vector<24x128xf32>
      %cst_38 = arith.constant 0.000000e+00 : f32
      %149 = vector.broadcast %cst_38 : f32 to vector<24x128xf32>
      %150 = arith.maximumf %148, %149 : vector<24x128xf32>
      %151 = vector.extract_strided_slice %4 {offsets = [21, 0], sizes = [1, 128], strides = [1, 1]} : vector<49x128xf32> to vector<1x128xf32>
      %152 = vector.extract_strided_slice %150 {offsets = [0, 0], sizes = [16, 128], strides = [1, 1]} : vector<24x128xf32> to vector<16x128xf32>
      %153 = vector.broadcast %151 : vector<1x128xf32> to vector<16x128xf32>
      %154 = arith.mulf %152, %153 : vector<16x128xf32>
      %155 = arith.addf %144, %154 : vector<16x128xf32>
      %156 = vector.extract_strided_slice %4 {offsets = [22, 0], sizes = [1, 128], strides = [1, 1]} : vector<49x128xf32> to vector<1x128xf32>
      %157 = vector.extract_strided_slice %150 {offsets = [1, 0], sizes = [16, 128], strides = [1, 1]} : vector<24x128xf32> to vector<16x128xf32>
      %158 = vector.broadcast %156 : vector<1x128xf32> to vector<16x128xf32>
      %159 = arith.mulf %157, %158 : vector<16x128xf32>
      %160 = arith.addf %155, %159 : vector<16x128xf32>
      %161 = vector.extract_strided_slice %4 {offsets = [23, 0], sizes = [1, 128], strides = [1, 1]} : vector<49x128xf32> to vector<1x128xf32>
      %162 = vector.extract_strided_slice %150 {offsets = [2, 0], sizes = [16, 128], strides = [1, 1]} : vector<24x128xf32> to vector<16x128xf32>
      %163 = vector.broadcast %161 : vector<1x128xf32> to vector<16x128xf32>
      %164 = arith.mulf %162, %163 : vector<16x128xf32>
      %165 = arith.addf %160, %164 : vector<16x128xf32>
      %166 = vector.extract_strided_slice %4 {offsets = [24, 0], sizes = [1, 128], strides = [1, 1]} : vector<49x128xf32> to vector<1x128xf32>
      %167 = vector.extract_strided_slice %150 {offsets = [3, 0], sizes = [16, 128], strides = [1, 1]} : vector<24x128xf32> to vector<16x128xf32>
      %168 = vector.broadcast %166 : vector<1x128xf32> to vector<16x128xf32>
      %169 = arith.mulf %167, %168 : vector<16x128xf32>
      %170 = arith.addf %165, %169 : vector<16x128xf32>
      %171 = vector.extract_strided_slice %4 {offsets = [25, 0], sizes = [1, 128], strides = [1, 1]} : vector<49x128xf32> to vector<1x128xf32>
      %172 = vector.extract_strided_slice %150 {offsets = [4, 0], sizes = [16, 128], strides = [1, 1]} : vector<24x128xf32> to vector<16x128xf32>
      %173 = vector.broadcast %171 : vector<1x128xf32> to vector<16x128xf32>
      %174 = arith.mulf %172, %173 : vector<16x128xf32>
      %175 = arith.addf %170, %174 : vector<16x128xf32>
      %176 = vector.extract_strided_slice %4 {offsets = [26, 0], sizes = [1, 128], strides = [1, 1]} : vector<49x128xf32> to vector<1x128xf32>
      %177 = vector.extract_strided_slice %150 {offsets = [5, 0], sizes = [16, 128], strides = [1, 1]} : vector<24x128xf32> to vector<16x128xf32>
      %178 = vector.broadcast %176 : vector<1x128xf32> to vector<16x128xf32>
      %179 = arith.mulf %177, %178 : vector<16x128xf32>
      %180 = arith.addf %175, %179 : vector<16x128xf32>
      %181 = vector.extract_strided_slice %4 {offsets = [27, 0], sizes = [1, 128], strides = [1, 1]} : vector<49x128xf32> to vector<1x128xf32>
      %182 = vector.extract_strided_slice %150 {offsets = [6, 0], sizes = [16, 128], strides = [1, 1]} : vector<24x128xf32> to vector<16x128xf32>
      %183 = vector.broadcast %181 : vector<1x128xf32> to vector<16x128xf32>
      %184 = arith.mulf %182, %183 : vector<16x128xf32>
      %185 = arith.addf %180, %184 : vector<16x128xf32>
      %c4_i32 = arith.constant 4 : i32
      %186 = arith.addi %arg9, %c4_i32 : i32
      %c0_39 = arith.constant 0 : index
      %187 = arith.index_cast %186 : i32 to index
      %c0_40 = arith.constant 0 : index
      %c0_41 = arith.constant 0 : index
      %188 = vector.load %arg2[%c0_39, %187, %c0_40, %c0_41] : memref<1x22x24x128xf32, #tpu.memory_space<vmem>>, vector<1x1x24x128xf32>
      %189 = vector.shape_cast %188 : vector<1x1x24x128xf32> to vector<24x128xf32>
      %cst_42 = arith.constant 0.000000e+00 : f32
      %190 = vector.broadcast %cst_42 : f32 to vector<24x128xf32>
      %191 = arith.maximumf %189, %190 : vector<24x128xf32>
      %192 = vector.extract_strided_slice %4 {offsets = [28, 0], sizes = [1, 128], strides = [1, 1]} : vector<49x128xf32> to vector<1x128xf32>
      %193 = vector.extract_strided_slice %191 {offsets = [0, 0], sizes = [16, 128], strides = [1, 1]} : vector<24x128xf32> to vector<16x128xf32>
      %194 = vector.broadcast %192 : vector<1x128xf32> to vector<16x128xf32>
      %195 = arith.mulf %193, %194 : vector<16x128xf32>
      %196 = arith.addf %185, %195 : vector<16x128xf32>
      %197 = vector.extract_strided_slice %4 {offsets = [29, 0], sizes = [1, 128], strides = [1, 1]} : vector<49x128xf32> to vector<1x128xf32>
      %198 = vector.extract_strided_slice %191 {offsets = [1, 0], sizes = [16, 128], strides = [1, 1]} : vector<24x128xf32> to vector<16x128xf32>
      %199 = vector.broadcast %197 : vector<1x128xf32> to vector<16x128xf32>
      %200 = arith.mulf %198, %199 : vector<16x128xf32>
      %201 = arith.addf %196, %200 : vector<16x128xf32>
      %202 = vector.extract_strided_slice %4 {offsets = [30, 0], sizes = [1, 128], strides = [1, 1]} : vector<49x128xf32> to vector<1x128xf32>
      %203 = vector.extract_strided_slice %191 {offsets = [2, 0], sizes = [16, 128], strides = [1, 1]} : vector<24x128xf32> to vector<16x128xf32>
      %204 = vector.broadcast %202 : vector<1x128xf32> to vector<16x128xf32>
      %205 = arith.mulf %203, %204 : vector<16x128xf32>
      %206 = arith.addf %201, %205 : vector<16x128xf32>
      %207 = vector.extract_strided_slice %4 {offsets = [31, 0], sizes = [1, 128], strides = [1, 1]} : vector<49x128xf32> to vector<1x128xf32>
      %208 = vector.extract_strided_slice %191 {offsets = [3, 0], sizes = [16, 128], strides = [1, 1]} : vector<24x128xf32> to vector<16x128xf32>
      %209 = vector.broadcast %207 : vector<1x128xf32> to vector<16x128xf32>
      %210 = arith.mulf %208, %209 : vector<16x128xf32>
      %211 = arith.addf %206, %210 : vector<16x128xf32>
      %212 = vector.extract_strided_slice %4 {offsets = [32, 0], sizes = [1, 128], strides = [1, 1]} : vector<49x128xf32> to vector<1x128xf32>
      %213 = vector.extract_strided_slice %191 {offsets = [4, 0], sizes = [16, 128], strides = [1, 1]} : vector<24x128xf32> to vector<16x128xf32>
      %214 = vector.broadcast %212 : vector<1x128xf32> to vector<16x128xf32>
      %215 = arith.mulf %213, %214 : vector<16x128xf32>
      %216 = arith.addf %211, %215 : vector<16x128xf32>
      %217 = vector.extract_strided_slice %4 {offsets = [33, 0], sizes = [1, 128], strides = [1, 1]} : vector<49x128xf32> to vector<1x128xf32>
      %218 = vector.extract_strided_slice %191 {offsets = [5, 0], sizes = [16, 128], strides = [1, 1]} : vector<24x128xf32> to vector<16x128xf32>
      %219 = vector.broadcast %217 : vector<1x128xf32> to vector<16x128xf32>
      %220 = arith.mulf %218, %219 : vector<16x128xf32>
      %221 = arith.addf %216, %220 : vector<16x128xf32>
      %222 = vector.extract_strided_slice %4 {offsets = [34, 0], sizes = [1, 128], strides = [1, 1]} : vector<49x128xf32> to vector<1x128xf32>
      %223 = vector.extract_strided_slice %191 {offsets = [6, 0], sizes = [16, 128], strides = [1, 1]} : vector<24x128xf32> to vector<16x128xf32>
      %224 = vector.broadcast %222 : vector<1x128xf32> to vector<16x128xf32>
      %225 = arith.mulf %223, %224 : vector<16x128xf32>
      %226 = arith.addf %221, %225 : vector<16x128xf32>
      %c5_i32 = arith.constant 5 : i32
      %227 = arith.addi %arg9, %c5_i32 : i32
      %c0_43 = arith.constant 0 : index
      %228 = arith.index_cast %227 : i32 to index
      %c0_44 = arith.constant 0 : index
      %c0_45 = arith.constant 0 : index
      %229 = vector.load %arg2[%c0_43, %228, %c0_44, %c0_45] : memref<1x22x24x128xf32, #tpu.memory_space<vmem>>, vector<1x1x24x128xf32>
      %230 = vector.shape_cast %229 : vector<1x1x24x128xf32> to vector<24x128xf32>
      %cst_46 = arith.constant 0.000000e+00 : f32
      %231 = vector.broadcast %cst_46 : f32 to vector<24x128xf32>
      %232 = arith.maximumf %230, %231 : vector<24x128xf32>
      %233 = vector.extract_strided_slice %4 {offsets = [35, 0], sizes = [1, 128], strides = [1, 1]} : vector<49x128xf32> to vector<1x128xf32>
      %234 = vector.extract_strided_slice %232 {offsets = [0, 0], sizes = [16, 128], strides = [1, 1]} : vector<24x128xf32> to vector<16x128xf32>
      %235 = vector.broadcast %233 : vector<1x128xf32> to vector<16x128xf32>
      %236 = arith.mulf %234, %235 : vector<16x128xf32>
      %237 = arith.addf %226, %236 : vector<16x128xf32>
      %238 = vector.extract_strided_slice %4 {offsets = [36, 0], sizes = [1, 128], strides = [1, 1]} : vector<49x128xf32> to vector<1x128xf32>
      %239 = vector.extract_strided_slice %232 {offsets = [1, 0], sizes = [16, 128], strides = [1, 1]} : vector<24x128xf32> to vector<16x128xf32>
      %240 = vector.broadcast %238 : vector<1x128xf32> to vector<16x128xf32>
      %241 = arith.mulf %239, %240 : vector<16x128xf32>
      %242 = arith.addf %237, %241 : vector<16x128xf32>
      %243 = vector.extract_strided_slice %4 {offsets = [37, 0], sizes = [1, 128], strides = [1, 1]} : vector<49x128xf32> to vector<1x128xf32>
      %244 = vector.extract_strided_slice %232 {offsets = [2, 0], sizes = [16, 128], strides = [1, 1]} : vector<24x128xf32> to vector<16x128xf32>
      %245 = vector.broadcast %243 : vector<1x128xf32> to vector<16x128xf32>
      %246 = arith.mulf %244, %245 : vector<16x128xf32>
      %247 = arith.addf %242, %246 : vector<16x128xf32>
      %248 = vector.extract_strided_slice %4 {offsets = [38, 0], sizes = [1, 128], strides = [1, 1]} : vector<49x128xf32> to vector<1x128xf32>
      %249 = vector.extract_strided_slice %232 {offsets = [3, 0], sizes = [16, 128], strides = [1, 1]} : vector<24x128xf32> to vector<16x128xf32>
      %250 = vector.broadcast %248 : vector<1x128xf32> to vector<16x128xf32>
      %251 = arith.mulf %249, %250 : vector<16x128xf32>
      %252 = arith.addf %247, %251 : vector<16x128xf32>
      %253 = vector.extract_strided_slice %4 {offsets = [39, 0], sizes = [1, 128], strides = [1, 1]} : vector<49x128xf32> to vector<1x128xf32>
      %254 = vector.extract_strided_slice %232 {offsets = [4, 0], sizes = [16, 128], strides = [1, 1]} : vector<24x128xf32> to vector<16x128xf32>
      %255 = vector.broadcast %253 : vector<1x128xf32> to vector<16x128xf32>
      %256 = arith.mulf %254, %255 : vector<16x128xf32>
      %257 = arith.addf %252, %256 : vector<16x128xf32>
      %258 = vector.extract_strided_slice %4 {offsets = [40, 0], sizes = [1, 128], strides = [1, 1]} : vector<49x128xf32> to vector<1x128xf32>
      %259 = vector.extract_strided_slice %232 {offsets = [5, 0], sizes = [16, 128], strides = [1, 1]} : vector<24x128xf32> to vector<16x128xf32>
      %260 = vector.broadcast %258 : vector<1x128xf32> to vector<16x128xf32>
      %261 = arith.mulf %259, %260 : vector<16x128xf32>
      %262 = arith.addf %257, %261 : vector<16x128xf32>
      %263 = vector.extract_strided_slice %4 {offsets = [41, 0], sizes = [1, 128], strides = [1, 1]} : vector<49x128xf32> to vector<1x128xf32>
      %264 = vector.extract_strided_slice %232 {offsets = [6, 0], sizes = [16, 128], strides = [1, 1]} : vector<24x128xf32> to vector<16x128xf32>
      %265 = vector.broadcast %263 : vector<1x128xf32> to vector<16x128xf32>
      %266 = arith.mulf %264, %265 : vector<16x128xf32>
      %267 = arith.addf %262, %266 : vector<16x128xf32>
      %c6_i32 = arith.constant 6 : i32
      %268 = arith.addi %arg9, %c6_i32 : i32
      %c0_47 = arith.constant 0 : index
      %269 = arith.index_cast %268 : i32 to index
      %c0_48 = arith.constant 0 : index
      %c0_49 = arith.constant 0 : index
      %270 = vector.load %arg2[%c0_47, %269, %c0_48, %c0_49] : memref<1x22x24x128xf32, #tpu.memory_space<vmem>>, vector<1x1x24x128xf32>
      %271 = vector.shape_cast %270 : vector<1x1x24x128xf32> to vector<24x128xf32>
      %cst_50 = arith.constant 0.000000e+00 : f32
      %272 = vector.broadcast %cst_50 : f32 to vector<24x128xf32>
      %273 = arith.maximumf %271, %272 : vector<24x128xf32>
      %274 = vector.extract_strided_slice %4 {offsets = [42, 0], sizes = [1, 128], strides = [1, 1]} : vector<49x128xf32> to vector<1x128xf32>
      %275 = vector.extract_strided_slice %273 {offsets = [0, 0], sizes = [16, 128], strides = [1, 1]} : vector<24x128xf32> to vector<16x128xf32>
      %276 = vector.broadcast %274 : vector<1x128xf32> to vector<16x128xf32>
      %277 = arith.mulf %275, %276 : vector<16x128xf32>
      %278 = arith.addf %267, %277 : vector<16x128xf32>
      %279 = vector.extract_strided_slice %4 {offsets = [43, 0], sizes = [1, 128], strides = [1, 1]} : vector<49x128xf32> to vector<1x128xf32>
      %280 = vector.extract_strided_slice %273 {offsets = [1, 0], sizes = [16, 128], strides = [1, 1]} : vector<24x128xf32> to vector<16x128xf32>
      %281 = vector.broadcast %279 : vector<1x128xf32> to vector<16x128xf32>
      %282 = arith.mulf %280, %281 : vector<16x128xf32>
      %283 = arith.addf %278, %282 : vector<16x128xf32>
      %284 = vector.extract_strided_slice %4 {offsets = [44, 0], sizes = [1, 128], strides = [1, 1]} : vector<49x128xf32> to vector<1x128xf32>
      %285 = vector.extract_strided_slice %273 {offsets = [2, 0], sizes = [16, 128], strides = [1, 1]} : vector<24x128xf32> to vector<16x128xf32>
      %286 = vector.broadcast %284 : vector<1x128xf32> to vector<16x128xf32>
      %287 = arith.mulf %285, %286 : vector<16x128xf32>
      %288 = arith.addf %283, %287 : vector<16x128xf32>
      %289 = vector.extract_strided_slice %4 {offsets = [45, 0], sizes = [1, 128], strides = [1, 1]} : vector<49x128xf32> to vector<1x128xf32>
      %290 = vector.extract_strided_slice %273 {offsets = [3, 0], sizes = [16, 128], strides = [1, 1]} : vector<24x128xf32> to vector<16x128xf32>
      %291 = vector.broadcast %289 : vector<1x128xf32> to vector<16x128xf32>
      %292 = arith.mulf %290, %291 : vector<16x128xf32>
      %293 = arith.addf %288, %292 : vector<16x128xf32>
      %294 = vector.extract_strided_slice %4 {offsets = [46, 0], sizes = [1, 128], strides = [1, 1]} : vector<49x128xf32> to vector<1x128xf32>
      %295 = vector.extract_strided_slice %273 {offsets = [4, 0], sizes = [16, 128], strides = [1, 1]} : vector<24x128xf32> to vector<16x128xf32>
      %296 = vector.broadcast %294 : vector<1x128xf32> to vector<16x128xf32>
      %297 = arith.mulf %295, %296 : vector<16x128xf32>
      %298 = arith.addf %293, %297 : vector<16x128xf32>
      %299 = vector.extract_strided_slice %4 {offsets = [47, 0], sizes = [1, 128], strides = [1, 1]} : vector<49x128xf32> to vector<1x128xf32>
      %300 = vector.extract_strided_slice %273 {offsets = [5, 0], sizes = [16, 128], strides = [1, 1]} : vector<24x128xf32> to vector<16x128xf32>
      %301 = vector.broadcast %299 : vector<1x128xf32> to vector<16x128xf32>
      %302 = arith.mulf %300, %301 : vector<16x128xf32>
      %303 = arith.addf %298, %302 : vector<16x128xf32>
      %304 = vector.extract_strided_slice %4 {offsets = [48, 0], sizes = [1, 128], strides = [1, 1]} : vector<49x128xf32> to vector<1x128xf32>
      %305 = vector.extract_strided_slice %273 {offsets = [6, 0], sizes = [16, 128], strides = [1, 1]} : vector<24x128xf32> to vector<16x128xf32>
      %306 = vector.broadcast %304 : vector<1x128xf32> to vector<16x128xf32>
      %307 = arith.mulf %305, %306 : vector<16x128xf32>
      %308 = arith.addf %303, %307 : vector<16x128xf32>
      %309 = vector.broadcast %5 : vector<1x128xf32> to vector<16x128xf32>
      %310 = arith.addf %308, %309 : vector<16x128xf32>
      %cst_51 = arith.constant 0.000000e+00 : f32
      %311 = vector.broadcast %cst_51 : f32 to vector<16x128xf32>
      %312 = arith.maximumf %310, %311 : vector<16x128xf32>
      %c3_i32_52 = arith.constant 3 : i32
      %313 = arith.addi %arg9, %c3_i32_52 : i32
      %c0_53 = arith.constant 0 : index
      %314 = arith.index_cast %313 : i32 to index
      %c0_54 = arith.constant 0 : index
      %c0_55 = arith.constant 0 : index
      %315 = vector.load %arg2[%c0_53, %314, %c0_54, %c0_55] : memref<1x22x24x128xf32, #tpu.memory_space<vmem>>, vector<1x1x24x128xf32>
      %316 = vector.shape_cast %315 : vector<1x1x24x128xf32> to vector<24x128xf32>
      %317 = vector.extract_strided_slice %316 {offsets = [3, 0], sizes = [16, 128], strides = [1, 1]} : vector<24x128xf32> to vector<16x128xf32>
      %318 = arith.addf %317, %312 : vector<16x128xf32>
      %c0_56 = arith.constant 0 : index
      %319 = arith.index_cast %arg9 : i32 to index
      %c0_57 = arith.constant 0 : index
      %c0_58 = arith.constant 0 : index
      %320 = vector.load %arg6[%c0_56, %319, %c0_57, %c0_58] : memref<1x16x16x128xf32, #tpu.memory_space<vmem>>, vector<1x1x16x128xf32>
      %321 = vector.shape_cast %320 : vector<1x1x16x128xf32> to vector<16x128xf32>
      %322 = vector.shape_cast %318 : vector<16x128xf32> to vector<1x1x16x128xf32>
      tpu.vector_store %arg6[%c0_56, %319, %c0_57, %c0_58], %322 {strides = array<i32>} : memref<1x16x16x128xf32, #tpu.memory_space<vmem>>, vector<1x1x16x128xf32>,
      %cst_59 = arith.constant dense<0.000000e+00> : vector<1x128xf32>
      %323 = tpu.matmul %6, %318, %cst_59 {dimension_numbers = #tpu.dot_dimension_numbers<[1], [0], [0], [1], [0, 0, 1, 1], [], []>} : vector<1x16xf32>, vector<16x128xf32>, vector<1x128xf32> -> vector<1x128xf32>
      %324 = arith.addf %arg10, %323 : vector<1x128xf32>
      scf.yield %324 : vector<1x128xf32>
    }
    %c16_i32_7 = arith.constant 16 : i32
    %cst_8 = arith.constant 3.906250e-03 : f32
    %10 = vector.broadcast %cst_8 : f32 to vector<1x128xf32>
    %11 = arith.mulf %9, %10 : vector<1x128xf32>
    %cst_9 = arith.constant 0.000000e+00 : f32
    %12 = vector.broadcast %cst_9 : f32 to vector<1x128xf32>
    %c0_i32_10 = arith.constant 0 : i32
    %c16_i32_11 = arith.constant 16 : i32
    %13 = arith.addi %c0_i32_10, %c16_i32_11 : i32
    %c1_i32_12 = arith.constant 1 : i32
    %14 = scf.for %arg9 = %c0_i32_10 to %13 step %c1_i32_12 iter_args(%arg10 = %12) -> (vector<1x128xf32>)  : i32 {
      %c0_20 = arith.constant 0 : index
      %21 = arith.index_cast %arg9 : i32 to index
      %c0_21 = arith.constant 0 : index
      %c0_22 = arith.constant 0 : index
      %22 = vector.load %arg6[%c0_20, %21, %c0_21, %c0_22] : memref<1x16x16x128xf32, #tpu.memory_space<vmem>>, vector<1x1x16x128xf32>
      %23 = vector.shape_cast %22 : vector<1x1x16x128xf32> to vector<16x128xf32>
      %24 = vector.broadcast %11 : vector<1x128xf32> to vector<16x128xf32>
      %25 = arith.subf %23, %24 : vector<16x128xf32>
      %26 = arith.mulf %25, %25 : vector<16x128xf32>
      %cst_23 = arith.constant dense<0.000000e+00> : vector<1x128xf32>
      %27 = tpu.matmul %6, %26, %cst_23 {dimension_numbers = #tpu.dot_dimension_numbers<[1], [0], [0], [1], [0, 0, 1, 1], [], []>} : vector<1x16xf32>, vector<16x128xf32>, vector<1x128xf32> -> vector<1x128xf32>
      %28 = arith.addf %arg10, %27 : vector<1x128xf32>
      scf.yield %28 : vector<1x128xf32>
    }
    %c16_i32_13 = arith.constant 16 : i32
    %c0_14 = arith.constant 0 : index
    %c0_15 = arith.constant 0 : index
    %c0_16 = arith.constant 0 : index
    %15 = vector.load %arg7[%c0_14, %c0_15, %c0_16] : memref<1x1x128xf32, #tpu.memory_space<vmem>>, vector<1x1x128xf32>
    %16 = vector.shape_cast %15 : vector<1x1x128xf32> to vector<1x128xf32>
    %17 = vector.shape_cast %9 : vector<1x128xf32> to vector<1x1x128xf32>
    tpu.vector_store %arg7[%c0_14, %c0_15, %c0_16], %17 {strides = array<i32>} : memref<1x1x128xf32, #tpu.memory_space<vmem>>, vector<1x1x128xf32>,
    %c0_17 = arith.constant 0 : index
    %c0_18 = arith.constant 0 : index
    %c0_19 = arith.constant 0 : index
    %18 = vector.load %arg8[%c0_17, %c0_18, %c0_19] : memref<1x1x128xf32, #tpu.memory_space<vmem>>, vector<1x1x128xf32>
    %19 = vector.shape_cast %18 : vector<1x1x128xf32> to vector<1x128xf32>
    %20 = vector.shape_cast %14 : vector<1x128xf32> to vector<1x1x128xf32>
    tpu.vector_store %arg8[%c0_17, %c0_18, %c0_19], %20 {strides = array<i32>} : memref<1x1x128xf32, #tpu.memory_space<vmem>>, vector<1x1x128xf32>,
    return
  }
  func.func @transform_0(%arg0: i32, %arg1: i32) -> (i32, i32, i32, i32) {
    %c0_i32 = arith.constant 0 : i32
    %c0_i32_0 = arith.constant 0 : i32
    %c0_i32_1 = arith.constant 0 : i32
    return %arg0, %c0_i32, %c0_i32_0, %arg1 : i32, i32, i32, i32
  }
  func.func @transform_1(%arg0: i32, %arg1: i32) -> (i32, i32, i32) {
    %c0_i32 = arith.constant 0 : i32
    %c0_i32_0 = arith.constant 0 : i32
    return %arg0, %c0_i32, %arg1 : i32, i32, i32
  }
  func.func @transform_2(%arg0: i32, %arg1: i32) -> (i32, i32) {
    %c0_i32 = arith.constant 0 : i32
    %c0_i32_0 = arith.constant 0 : i32
    return %c0_i32, %arg1 : i32, i32
  }
  func.func @transform_3(%arg0: i32, %arg1: i32) -> (i32, i32) {
    %c0_i32 = arith.constant 0 : i32
    %c0_i32_0 = arith.constant 0 : i32
    return %c0_i32, %arg1 : i32, i32
  }
  func.func @transform_4(%arg0: i32, %arg1: i32) -> (i32, i32, i32, i32) {
    %c0_i32 = arith.constant 0 : i32
    %c0_i32_0 = arith.constant 0 : i32
    %c0_i32_1 = arith.constant 0 : i32
    return %arg0, %c0_i32, %c0_i32_0, %arg1 : i32, i32, i32, i32
  }
  func.func @transform_5(%arg0: i32, %arg1: i32) -> (i32, i32, i32) {
    %c0_i32 = arith.constant 0 : i32
    %c0_i32_0 = arith.constant 0 : i32
    return %arg0, %c0_i32, %arg1 : i32, i32, i32
  }
  func.func @transform_6(%arg0: i32, %arg1: i32) -> (i32, i32, i32) {
    %c0_i32 = arith.constant 0 : i32
    %c0_i32_0 = arith.constant 0 : i32
    return %arg0, %c0_i32, %arg1 : i32, i32, i32
  }
}

module attributes {stable_mosaic.version = 11 : i64} {
  func.func @_conv1_lin1_kernel(%arg0: i32, %arg1: i32, %arg2: memref<1x22x24x128xf32, #tpu.memory_space<vmem>>, %arg3: memref<49x128xf32, #tpu.memory_space<vmem>>, %arg4: memref<1x128xf32, #tpu.memory_space<vmem>>, %arg5: memref<16x16xf32, #tpu.memory_space<vmem>>, %arg6: memref<1x1x128xf32, #tpu.memory_space<vmem>>) attributes {dimension_semantics = [#tpu.dimension_semantics<parallel>, #tpu.dimension_semantics<parallel>], iteration_bounds = array<i64: 2, 1>, scalar_prefetch = 0 : i64, scratch_operands = 0 : i64, tpu.core_type = #tpu.core_type<tc>, window_params = [{transform_indices = @transform_0, window_bounds = array<i64: 1, 22, 24, 128>}, {transform_indices = @transform_1, window_bounds = array<i64: 49, 128>}, {transform_indices = @transform_2, window_bounds = array<i64: 1, 128>}, {pipeline_mode = #tpu.pipeline_mode<synchronous>, transform_indices = @transform_3, window_bounds = array<i64: 16, 16>}, {transform_indices = @transform_4, window_bounds = array<i64: 1, 1, 128>}]} {
    %c0 = arith.constant 0 : index
    %c0_0 = arith.constant 0 : index
    %0 = vector.load %arg3[%c0, %c0_0] : memref<49x128xf32, #tpu.memory_space<vmem>>, vector<49x128xf32>
    %c0_1 = arith.constant 0 : index
    %c0_2 = arith.constant 0 : index
    %1 = vector.load %arg4[%c0_1, %c0_2] : memref<1x128xf32, #tpu.memory_space<vmem>>, vector<1x128xf32>
    %cst = arith.constant 0.000000e+00 : f32
    %2 = vector.broadcast %cst : f32 to vector<1x128xf32>
    %c0_i32 = arith.constant 0 : i32
    %c16_i32 = arith.constant 16 : i32
    %3 = arith.addi %c0_i32, %c16_i32 : i32
    %c1_i32 = arith.constant 1 : i32
    %4 = scf.for %arg7 = %c0_i32 to %3 step %c1_i32 iter_args(%arg8 = %2) -> (vector<1x128xf32>)  : i32 {
      %cst_7 = arith.constant 0.000000e+00 : f32
      %8 = vector.broadcast %cst_7 : f32 to vector<16x128xf32>
      %c0_i32_8 = arith.constant 0 : i32
      %9 = arith.addi %arg7, %c0_i32_8 : i32
      %c0_9 = arith.constant 0 : index
      %10 = arith.index_cast %9 : i32 to index
      %c0_10 = arith.constant 0 : index
      %c0_11 = arith.constant 0 : index
      %11 = vector.load %arg2[%c0_9, %10, %c0_10, %c0_11] : memref<1x22x24x128xf32, #tpu.memory_space<vmem>>, vector<1x1x24x128xf32>
      %12 = vector.shape_cast %11 : vector<1x1x24x128xf32> to vector<24x128xf32>
      %13 = vector.extract_strided_slice %0 {offsets = [0, 0], sizes = [1, 128], strides = [1, 1]} : vector<49x128xf32> to vector<1x128xf32>
      %14 = vector.extract_strided_slice %12 {offsets = [0, 0], sizes = [16, 128], strides = [1, 1]} : vector<24x128xf32> to vector<16x128xf32>
      %15 = vector.broadcast %13 : vector<1x128xf32> to vector<16x128xf32>
      %16 = arith.mulf %14, %15 : vector<16x128xf32>
      %17 = arith.addf %8, %16 : vector<16x128xf32>
      %18 = vector.extract_strided_slice %0 {offsets = [1, 0], sizes = [1, 128], strides = [1, 1]} : vector<49x128xf32> to vector<1x128xf32>
      %19 = vector.extract_strided_slice %12 {offsets = [1, 0], sizes = [16, 128], strides = [1, 1]} : vector<24x128xf32> to vector<16x128xf32>
      %20 = vector.broadcast %18 : vector<1x128xf32> to vector<16x128xf32>
      %21 = arith.mulf %19, %20 : vector<16x128xf32>
      %22 = arith.addf %17, %21 : vector<16x128xf32>
      %23 = vector.extract_strided_slice %0 {offsets = [2, 0], sizes = [1, 128], strides = [1, 1]} : vector<49x128xf32> to vector<1x128xf32>
      %24 = vector.extract_strided_slice %12 {offsets = [2, 0], sizes = [16, 128], strides = [1, 1]} : vector<24x128xf32> to vector<16x128xf32>
      %25 = vector.broadcast %23 : vector<1x128xf32> to vector<16x128xf32>
      %26 = arith.mulf %24, %25 : vector<16x128xf32>
      %27 = arith.addf %22, %26 : vector<16x128xf32>
      %28 = vector.extract_strided_slice %0 {offsets = [3, 0], sizes = [1, 128], strides = [1, 1]} : vector<49x128xf32> to vector<1x128xf32>
      %29 = vector.extract_strided_slice %12 {offsets = [3, 0], sizes = [16, 128], strides = [1, 1]} : vector<24x128xf32> to vector<16x128xf32>
      %30 = vector.broadcast %28 : vector<1x128xf32> to vector<16x128xf32>
      %31 = arith.mulf %29, %30 : vector<16x128xf32>
      %32 = arith.addf %27, %31 : vector<16x128xf32>
      %33 = vector.extract_strided_slice %0 {offsets = [4, 0], sizes = [1, 128], strides = [1, 1]} : vector<49x128xf32> to vector<1x128xf32>
      %34 = vector.extract_strided_slice %12 {offsets = [4, 0], sizes = [16, 128], strides = [1, 1]} : vector<24x128xf32> to vector<16x128xf32>
      %35 = vector.broadcast %33 : vector<1x128xf32> to vector<16x128xf32>
      %36 = arith.mulf %34, %35 : vector<16x128xf32>
      %37 = arith.addf %32, %36 : vector<16x128xf32>
      %38 = vector.extract_strided_slice %0 {offsets = [5, 0], sizes = [1, 128], strides = [1, 1]} : vector<49x128xf32> to vector<1x128xf32>
      %39 = vector.extract_strided_slice %12 {offsets = [5, 0], sizes = [16, 128], strides = [1, 1]} : vector<24x128xf32> to vector<16x128xf32>
      %40 = vector.broadcast %38 : vector<1x128xf32> to vector<16x128xf32>
      %41 = arith.mulf %39, %40 : vector<16x128xf32>
      %42 = arith.addf %37, %41 : vector<16x128xf32>
      %43 = vector.extract_strided_slice %0 {offsets = [6, 0], sizes = [1, 128], strides = [1, 1]} : vector<49x128xf32> to vector<1x128xf32>
      %44 = vector.extract_strided_slice %12 {offsets = [6, 0], sizes = [16, 128], strides = [1, 1]} : vector<24x128xf32> to vector<16x128xf32>
      %45 = vector.broadcast %43 : vector<1x128xf32> to vector<16x128xf32>
      %46 = arith.mulf %44, %45 : vector<16x128xf32>
      %47 = arith.addf %42, %46 : vector<16x128xf32>
      %c1_i32_12 = arith.constant 1 : i32
      %48 = arith.addi %arg7, %c1_i32_12 : i32
      %c0_13 = arith.constant 0 : index
      %49 = arith.index_cast %48 : i32 to index
      %c0_14 = arith.constant 0 : index
      %c0_15 = arith.constant 0 : index
      %50 = vector.load %arg2[%c0_13, %49, %c0_14, %c0_15] : memref<1x22x24x128xf32, #tpu.memory_space<vmem>>, vector<1x1x24x128xf32>
      %51 = vector.shape_cast %50 : vector<1x1x24x128xf32> to vector<24x128xf32>
      %52 = vector.extract_strided_slice %0 {offsets = [7, 0], sizes = [1, 128], strides = [1, 1]} : vector<49x128xf32> to vector<1x128xf32>
      %53 = vector.extract_strided_slice %51 {offsets = [0, 0], sizes = [16, 128], strides = [1, 1]} : vector<24x128xf32> to vector<16x128xf32>
      %54 = vector.broadcast %52 : vector<1x128xf32> to vector<16x128xf32>
      %55 = arith.mulf %53, %54 : vector<16x128xf32>
      %56 = arith.addf %47, %55 : vector<16x128xf32>
      %57 = vector.extract_strided_slice %0 {offsets = [8, 0], sizes = [1, 128], strides = [1, 1]} : vector<49x128xf32> to vector<1x128xf32>
      %58 = vector.extract_strided_slice %51 {offsets = [1, 0], sizes = [16, 128], strides = [1, 1]} : vector<24x128xf32> to vector<16x128xf32>
      %59 = vector.broadcast %57 : vector<1x128xf32> to vector<16x128xf32>
      %60 = arith.mulf %58, %59 : vector<16x128xf32>
      %61 = arith.addf %56, %60 : vector<16x128xf32>
      %62 = vector.extract_strided_slice %0 {offsets = [9, 0], sizes = [1, 128], strides = [1, 1]} : vector<49x128xf32> to vector<1x128xf32>
      %63 = vector.extract_strided_slice %51 {offsets = [2, 0], sizes = [16, 128], strides = [1, 1]} : vector<24x128xf32> to vector<16x128xf32>
      %64 = vector.broadcast %62 : vector<1x128xf32> to vector<16x128xf32>
      %65 = arith.mulf %63, %64 : vector<16x128xf32>
      %66 = arith.addf %61, %65 : vector<16x128xf32>
      %67 = vector.extract_strided_slice %0 {offsets = [10, 0], sizes = [1, 128], strides = [1, 1]} : vector<49x128xf32> to vector<1x128xf32>
      %68 = vector.extract_strided_slice %51 {offsets = [3, 0], sizes = [16, 128], strides = [1, 1]} : vector<24x128xf32> to vector<16x128xf32>
      %69 = vector.broadcast %67 : vector<1x128xf32> to vector<16x128xf32>
      %70 = arith.mulf %68, %69 : vector<16x128xf32>
      %71 = arith.addf %66, %70 : vector<16x128xf32>
      %72 = vector.extract_strided_slice %0 {offsets = [11, 0], sizes = [1, 128], strides = [1, 1]} : vector<49x128xf32> to vector<1x128xf32>
      %73 = vector.extract_strided_slice %51 {offsets = [4, 0], sizes = [16, 128], strides = [1, 1]} : vector<24x128xf32> to vector<16x128xf32>
      %74 = vector.broadcast %72 : vector<1x128xf32> to vector<16x128xf32>
      %75 = arith.mulf %73, %74 : vector<16x128xf32>
      %76 = arith.addf %71, %75 : vector<16x128xf32>
      %77 = vector.extract_strided_slice %0 {offsets = [12, 0], sizes = [1, 128], strides = [1, 1]} : vector<49x128xf32> to vector<1x128xf32>
      %78 = vector.extract_strided_slice %51 {offsets = [5, 0], sizes = [16, 128], strides = [1, 1]} : vector<24x128xf32> to vector<16x128xf32>
      %79 = vector.broadcast %77 : vector<1x128xf32> to vector<16x128xf32>
      %80 = arith.mulf %78, %79 : vector<16x128xf32>
      %81 = arith.addf %76, %80 : vector<16x128xf32>
      %82 = vector.extract_strided_slice %0 {offsets = [13, 0], sizes = [1, 128], strides = [1, 1]} : vector<49x128xf32> to vector<1x128xf32>
      %83 = vector.extract_strided_slice %51 {offsets = [6, 0], sizes = [16, 128], strides = [1, 1]} : vector<24x128xf32> to vector<16x128xf32>
      %84 = vector.broadcast %82 : vector<1x128xf32> to vector<16x128xf32>
      %85 = arith.mulf %83, %84 : vector<16x128xf32>
      %86 = arith.addf %81, %85 : vector<16x128xf32>
      %c2_i32 = arith.constant 2 : i32
      %87 = arith.addi %arg7, %c2_i32 : i32
      %c0_16 = arith.constant 0 : index
      %88 = arith.index_cast %87 : i32 to index
      %c0_17 = arith.constant 0 : index
      %c0_18 = arith.constant 0 : index
      %89 = vector.load %arg2[%c0_16, %88, %c0_17, %c0_18] : memref<1x22x24x128xf32, #tpu.memory_space<vmem>>, vector<1x1x24x128xf32>
      %90 = vector.shape_cast %89 : vector<1x1x24x128xf32> to vector<24x128xf32>
      %91 = vector.extract_strided_slice %0 {offsets = [14, 0], sizes = [1, 128], strides = [1, 1]} : vector<49x128xf32> to vector<1x128xf32>
      %92 = vector.extract_strided_slice %90 {offsets = [0, 0], sizes = [16, 128], strides = [1, 1]} : vector<24x128xf32> to vector<16x128xf32>
      %93 = vector.broadcast %91 : vector<1x128xf32> to vector<16x128xf32>
      %94 = arith.mulf %92, %93 : vector<16x128xf32>
      %95 = arith.addf %86, %94 : vector<16x128xf32>
      %96 = vector.extract_strided_slice %0 {offsets = [15, 0], sizes = [1, 128], strides = [1, 1]} : vector<49x128xf32> to vector<1x128xf32>
      %97 = vector.extract_strided_slice %90 {offsets = [1, 0], sizes = [16, 128], strides = [1, 1]} : vector<24x128xf32> to vector<16x128xf32>
      %98 = vector.broadcast %96 : vector<1x128xf32> to vector<16x128xf32>
      %99 = arith.mulf %97, %98 : vector<16x128xf32>
      %100 = arith.addf %95, %99 : vector<16x128xf32>
      %101 = vector.extract_strided_slice %0 {offsets = [16, 0], sizes = [1, 128], strides = [1, 1]} : vector<49x128xf32> to vector<1x128xf32>
      %102 = vector.extract_strided_slice %90 {offsets = [2, 0], sizes = [16, 128], strides = [1, 1]} : vector<24x128xf32> to vector<16x128xf32>
      %103 = vector.broadcast %101 : vector<1x128xf32> to vector<16x128xf32>
      %104 = arith.mulf %102, %103 : vector<16x128xf32>
      %105 = arith.addf %100, %104 : vector<16x128xf32>
      %106 = vector.extract_strided_slice %0 {offsets = [17, 0], sizes = [1, 128], strides = [1, 1]} : vector<49x128xf32> to vector<1x128xf32>
      %107 = vector.extract_strided_slice %90 {offsets = [3, 0], sizes = [16, 128], strides = [1, 1]} : vector<24x128xf32> to vector<16x128xf32>
      %108 = vector.broadcast %106 : vector<1x128xf32> to vector<16x128xf32>
      %109 = arith.mulf %107, %108 : vector<16x128xf32>
      %110 = arith.addf %105, %109 : vector<16x128xf32>
      %111 = vector.extract_strided_slice %0 {offsets = [18, 0], sizes = [1, 128], strides = [1, 1]} : vector<49x128xf32> to vector<1x128xf32>
      %112 = vector.extract_strided_slice %90 {offsets = [4, 0], sizes = [16, 128], strides = [1, 1]} : vector<24x128xf32> to vector<16x128xf32>
      %113 = vector.broadcast %111 : vector<1x128xf32> to vector<16x128xf32>
      %114 = arith.mulf %112, %113 : vector<16x128xf32>
      %115 = arith.addf %110, %114 : vector<16x128xf32>
      %116 = vector.extract_strided_slice %0 {offsets = [19, 0], sizes = [1, 128], strides = [1, 1]} : vector<49x128xf32> to vector<1x128xf32>
      %117 = vector.extract_strided_slice %90 {offsets = [5, 0], sizes = [16, 128], strides = [1, 1]} : vector<24x128xf32> to vector<16x128xf32>
      %118 = vector.broadcast %116 : vector<1x128xf32> to vector<16x128xf32>
      %119 = arith.mulf %117, %118 : vector<16x128xf32>
      %120 = arith.addf %115, %119 : vector<16x128xf32>
      %121 = vector.extract_strided_slice %0 {offsets = [20, 0], sizes = [1, 128], strides = [1, 1]} : vector<49x128xf32> to vector<1x128xf32>
      %122 = vector.extract_strided_slice %90 {offsets = [6, 0], sizes = [16, 128], strides = [1, 1]} : vector<24x128xf32> to vector<16x128xf32>
      %123 = vector.broadcast %121 : vector<1x128xf32> to vector<16x128xf32>
      %124 = arith.mulf %122, %123 : vector<16x128xf32>
      %125 = arith.addf %120, %124 : vector<16x128xf32>
      %c3_i32 = arith.constant 3 : i32
      %126 = arith.addi %arg7, %c3_i32 : i32
      %c0_19 = arith.constant 0 : index
      %127 = arith.index_cast %126 : i32 to index
      %c0_20 = arith.constant 0 : index
      %c0_21 = arith.constant 0 : index
      %128 = vector.load %arg2[%c0_19, %127, %c0_20, %c0_21] : memref<1x22x24x128xf32, #tpu.memory_space<vmem>>, vector<1x1x24x128xf32>
      %129 = vector.shape_cast %128 : vector<1x1x24x128xf32> to vector<24x128xf32>
      %130 = vector.extract_strided_slice %0 {offsets = [21, 0], sizes = [1, 128], strides = [1, 1]} : vector<49x128xf32> to vector<1x128xf32>
      %131 = vector.extract_strided_slice %129 {offsets = [0, 0], sizes = [16, 128], strides = [1, 1]} : vector<24x128xf32> to vector<16x128xf32>
      %132 = vector.broadcast %130 : vector<1x128xf32> to vector<16x128xf32>
      %133 = arith.mulf %131, %132 : vector<16x128xf32>
      %134 = arith.addf %125, %133 : vector<16x128xf32>
      %135 = vector.extract_strided_slice %0 {offsets = [22, 0], sizes = [1, 128], strides = [1, 1]} : vector<49x128xf32> to vector<1x128xf32>
      %136 = vector.extract_strided_slice %129 {offsets = [1, 0], sizes = [16, 128], strides = [1, 1]} : vector<24x128xf32> to vector<16x128xf32>
      %137 = vector.broadcast %135 : vector<1x128xf32> to vector<16x128xf32>
      %138 = arith.mulf %136, %137 : vector<16x128xf32>
      %139 = arith.addf %134, %138 : vector<16x128xf32>
      %140 = vector.extract_strided_slice %0 {offsets = [23, 0], sizes = [1, 128], strides = [1, 1]} : vector<49x128xf32> to vector<1x128xf32>
      %141 = vector.extract_strided_slice %129 {offsets = [2, 0], sizes = [16, 128], strides = [1, 1]} : vector<24x128xf32> to vector<16x128xf32>
      %142 = vector.broadcast %140 : vector<1x128xf32> to vector<16x128xf32>
      %143 = arith.mulf %141, %142 : vector<16x128xf32>
      %144 = arith.addf %139, %143 : vector<16x128xf32>
      %145 = vector.extract_strided_slice %0 {offsets = [24, 0], sizes = [1, 128], strides = [1, 1]} : vector<49x128xf32> to vector<1x128xf32>
      %146 = vector.extract_strided_slice %129 {offsets = [3, 0], sizes = [16, 128], strides = [1, 1]} : vector<24x128xf32> to vector<16x128xf32>
      %147 = vector.broadcast %145 : vector<1x128xf32> to vector<16x128xf32>
      %148 = arith.mulf %146, %147 : vector<16x128xf32>
      %149 = arith.addf %144, %148 : vector<16x128xf32>
      %150 = vector.extract_strided_slice %0 {offsets = [25, 0], sizes = [1, 128], strides = [1, 1]} : vector<49x128xf32> to vector<1x128xf32>
      %151 = vector.extract_strided_slice %129 {offsets = [4, 0], sizes = [16, 128], strides = [1, 1]} : vector<24x128xf32> to vector<16x128xf32>
      %152 = vector.broadcast %150 : vector<1x128xf32> to vector<16x128xf32>
      %153 = arith.mulf %151, %152 : vector<16x128xf32>
      %154 = arith.addf %149, %153 : vector<16x128xf32>
      %155 = vector.extract_strided_slice %0 {offsets = [26, 0], sizes = [1, 128], strides = [1, 1]} : vector<49x128xf32> to vector<1x128xf32>
      %156 = vector.extract_strided_slice %129 {offsets = [5, 0], sizes = [16, 128], strides = [1, 1]} : vector<24x128xf32> to vector<16x128xf32>
      %157 = vector.broadcast %155 : vector<1x128xf32> to vector<16x128xf32>
      %158 = arith.mulf %156, %157 : vector<16x128xf32>
      %159 = arith.addf %154, %158 : vector<16x128xf32>
      %160 = vector.extract_strided_slice %0 {offsets = [27, 0], sizes = [1, 128], strides = [1, 1]} : vector<49x128xf32> to vector<1x128xf32>
      %161 = vector.extract_strided_slice %129 {offsets = [6, 0], sizes = [16, 128], strides = [1, 1]} : vector<24x128xf32> to vector<16x128xf32>
      %162 = vector.broadcast %160 : vector<1x128xf32> to vector<16x128xf32>
      %163 = arith.mulf %161, %162 : vector<16x128xf32>
      %164 = arith.addf %159, %163 : vector<16x128xf32>
      %c4_i32 = arith.constant 4 : i32
      %165 = arith.addi %arg7, %c4_i32 : i32
      %c0_22 = arith.constant 0 : index
      %166 = arith.index_cast %165 : i32 to index
      %c0_23 = arith.constant 0 : index
      %c0_24 = arith.constant 0 : index
      %167 = vector.load %arg2[%c0_22, %166, %c0_23, %c0_24] : memref<1x22x24x128xf32, #tpu.memory_space<vmem>>, vector<1x1x24x128xf32>
      %168 = vector.shape_cast %167 : vector<1x1x24x128xf32> to vector<24x128xf32>
      %169 = vector.extract_strided_slice %0 {offsets = [28, 0], sizes = [1, 128], strides = [1, 1]} : vector<49x128xf32> to vector<1x128xf32>
      %170 = vector.extract_strided_slice %168 {offsets = [0, 0], sizes = [16, 128], strides = [1, 1]} : vector<24x128xf32> to vector<16x128xf32>
      %171 = vector.broadcast %169 : vector<1x128xf32> to vector<16x128xf32>
      %172 = arith.mulf %170, %171 : vector<16x128xf32>
      %173 = arith.addf %164, %172 : vector<16x128xf32>
      %174 = vector.extract_strided_slice %0 {offsets = [29, 0], sizes = [1, 128], strides = [1, 1]} : vector<49x128xf32> to vector<1x128xf32>
      %175 = vector.extract_strided_slice %168 {offsets = [1, 0], sizes = [16, 128], strides = [1, 1]} : vector<24x128xf32> to vector<16x128xf32>
      %176 = vector.broadcast %174 : vector<1x128xf32> to vector<16x128xf32>
      %177 = arith.mulf %175, %176 : vector<16x128xf32>
      %178 = arith.addf %173, %177 : vector<16x128xf32>
      %179 = vector.extract_strided_slice %0 {offsets = [30, 0], sizes = [1, 128], strides = [1, 1]} : vector<49x128xf32> to vector<1x128xf32>
      %180 = vector.extract_strided_slice %168 {offsets = [2, 0], sizes = [16, 128], strides = [1, 1]} : vector<24x128xf32> to vector<16x128xf32>
      %181 = vector.broadcast %179 : vector<1x128xf32> to vector<16x128xf32>
      %182 = arith.mulf %180, %181 : vector<16x128xf32>
      %183 = arith.addf %178, %182 : vector<16x128xf32>
      %184 = vector.extract_strided_slice %0 {offsets = [31, 0], sizes = [1, 128], strides = [1, 1]} : vector<49x128xf32> to vector<1x128xf32>
      %185 = vector.extract_strided_slice %168 {offsets = [3, 0], sizes = [16, 128], strides = [1, 1]} : vector<24x128xf32> to vector<16x128xf32>
      %186 = vector.broadcast %184 : vector<1x128xf32> to vector<16x128xf32>
      %187 = arith.mulf %185, %186 : vector<16x128xf32>
      %188 = arith.addf %183, %187 : vector<16x128xf32>
      %189 = vector.extract_strided_slice %0 {offsets = [32, 0], sizes = [1, 128], strides = [1, 1]} : vector<49x128xf32> to vector<1x128xf32>
      %190 = vector.extract_strided_slice %168 {offsets = [4, 0], sizes = [16, 128], strides = [1, 1]} : vector<24x128xf32> to vector<16x128xf32>
      %191 = vector.broadcast %189 : vector<1x128xf32> to vector<16x128xf32>
      %192 = arith.mulf %190, %191 : vector<16x128xf32>
      %193 = arith.addf %188, %192 : vector<16x128xf32>
      %194 = vector.extract_strided_slice %0 {offsets = [33, 0], sizes = [1, 128], strides = [1, 1]} : vector<49x128xf32> to vector<1x128xf32>
      %195 = vector.extract_strided_slice %168 {offsets = [5, 0], sizes = [16, 128], strides = [1, 1]} : vector<24x128xf32> to vector<16x128xf32>
      %196 = vector.broadcast %194 : vector<1x128xf32> to vector<16x128xf32>
      %197 = arith.mulf %195, %196 : vector<16x128xf32>
      %198 = arith.addf %193, %197 : vector<16x128xf32>
      %199 = vector.extract_strided_slice %0 {offsets = [34, 0], sizes = [1, 128], strides = [1, 1]} : vector<49x128xf32> to vector<1x128xf32>
      %200 = vector.extract_strided_slice %168 {offsets = [6, 0], sizes = [16, 128], strides = [1, 1]} : vector<24x128xf32> to vector<16x128xf32>
      %201 = vector.broadcast %199 : vector<1x128xf32> to vector<16x128xf32>
      %202 = arith.mulf %200, %201 : vector<16x128xf32>
      %203 = arith.addf %198, %202 : vector<16x128xf32>
      %c5_i32 = arith.constant 5 : i32
      %204 = arith.addi %arg7, %c5_i32 : i32
      %c0_25 = arith.constant 0 : index
      %205 = arith.index_cast %204 : i32 to index
      %c0_26 = arith.constant 0 : index
      %c0_27 = arith.constant 0 : index
      %206 = vector.load %arg2[%c0_25, %205, %c0_26, %c0_27] : memref<1x22x24x128xf32, #tpu.memory_space<vmem>>, vector<1x1x24x128xf32>
      %207 = vector.shape_cast %206 : vector<1x1x24x128xf32> to vector<24x128xf32>
      %208 = vector.extract_strided_slice %0 {offsets = [35, 0], sizes = [1, 128], strides = [1, 1]} : vector<49x128xf32> to vector<1x128xf32>
      %209 = vector.extract_strided_slice %207 {offsets = [0, 0], sizes = [16, 128], strides = [1, 1]} : vector<24x128xf32> to vector<16x128xf32>
      %210 = vector.broadcast %208 : vector<1x128xf32> to vector<16x128xf32>
      %211 = arith.mulf %209, %210 : vector<16x128xf32>
      %212 = arith.addf %203, %211 : vector<16x128xf32>
      %213 = vector.extract_strided_slice %0 {offsets = [36, 0], sizes = [1, 128], strides = [1, 1]} : vector<49x128xf32> to vector<1x128xf32>
      %214 = vector.extract_strided_slice %207 {offsets = [1, 0], sizes = [16, 128], strides = [1, 1]} : vector<24x128xf32> to vector<16x128xf32>
      %215 = vector.broadcast %213 : vector<1x128xf32> to vector<16x128xf32>
      %216 = arith.mulf %214, %215 : vector<16x128xf32>
      %217 = arith.addf %212, %216 : vector<16x128xf32>
      %218 = vector.extract_strided_slice %0 {offsets = [37, 0], sizes = [1, 128], strides = [1, 1]} : vector<49x128xf32> to vector<1x128xf32>
      %219 = vector.extract_strided_slice %207 {offsets = [2, 0], sizes = [16, 128], strides = [1, 1]} : vector<24x128xf32> to vector<16x128xf32>
      %220 = vector.broadcast %218 : vector<1x128xf32> to vector<16x128xf32>
      %221 = arith.mulf %219, %220 : vector<16x128xf32>
      %222 = arith.addf %217, %221 : vector<16x128xf32>
      %223 = vector.extract_strided_slice %0 {offsets = [38, 0], sizes = [1, 128], strides = [1, 1]} : vector<49x128xf32> to vector<1x128xf32>
      %224 = vector.extract_strided_slice %207 {offsets = [3, 0], sizes = [16, 128], strides = [1, 1]} : vector<24x128xf32> to vector<16x128xf32>
      %225 = vector.broadcast %223 : vector<1x128xf32> to vector<16x128xf32>
      %226 = arith.mulf %224, %225 : vector<16x128xf32>
      %227 = arith.addf %222, %226 : vector<16x128xf32>
      %228 = vector.extract_strided_slice %0 {offsets = [39, 0], sizes = [1, 128], strides = [1, 1]} : vector<49x128xf32> to vector<1x128xf32>
      %229 = vector.extract_strided_slice %207 {offsets = [4, 0], sizes = [16, 128], strides = [1, 1]} : vector<24x128xf32> to vector<16x128xf32>
      %230 = vector.broadcast %228 : vector<1x128xf32> to vector<16x128xf32>
      %231 = arith.mulf %229, %230 : vector<16x128xf32>
      %232 = arith.addf %227, %231 : vector<16x128xf32>
      %233 = vector.extract_strided_slice %0 {offsets = [40, 0], sizes = [1, 128], strides = [1, 1]} : vector<49x128xf32> to vector<1x128xf32>
      %234 = vector.extract_strided_slice %207 {offsets = [5, 0], sizes = [16, 128], strides = [1, 1]} : vector<24x128xf32> to vector<16x128xf32>
      %235 = vector.broadcast %233 : vector<1x128xf32> to vector<16x128xf32>
      %236 = arith.mulf %234, %235 : vector<16x128xf32>
      %237 = arith.addf %232, %236 : vector<16x128xf32>
      %238 = vector.extract_strided_slice %0 {offsets = [41, 0], sizes = [1, 128], strides = [1, 1]} : vector<49x128xf32> to vector<1x128xf32>
      %239 = vector.extract_strided_slice %207 {offsets = [6, 0], sizes = [16, 128], strides = [1, 1]} : vector<24x128xf32> to vector<16x128xf32>
      %240 = vector.broadcast %238 : vector<1x128xf32> to vector<16x128xf32>
      %241 = arith.mulf %239, %240 : vector<16x128xf32>
      %242 = arith.addf %237, %241 : vector<16x128xf32>
      %c6_i32 = arith.constant 6 : i32
      %243 = arith.addi %arg7, %c6_i32 : i32
      %c0_28 = arith.constant 0 : index
      %244 = arith.index_cast %243 : i32 to index
      %c0_29 = arith.constant 0 : index
      %c0_30 = arith.constant 0 : index
      %245 = vector.load %arg2[%c0_28, %244, %c0_29, %c0_30] : memref<1x22x24x128xf32, #tpu.memory_space<vmem>>, vector<1x1x24x128xf32>
      %246 = vector.shape_cast %245 : vector<1x1x24x128xf32> to vector<24x128xf32>
      %247 = vector.extract_strided_slice %0 {offsets = [42, 0], sizes = [1, 128], strides = [1, 1]} : vector<49x128xf32> to vector<1x128xf32>
      %248 = vector.extract_strided_slice %246 {offsets = [0, 0], sizes = [16, 128], strides = [1, 1]} : vector<24x128xf32> to vector<16x128xf32>
      %249 = vector.broadcast %247 : vector<1x128xf32> to vector<16x128xf32>
      %250 = arith.mulf %248, %249 : vector<16x128xf32>
      %251 = arith.addf %242, %250 : vector<16x128xf32>
      %252 = vector.extract_strided_slice %0 {offsets = [43, 0], sizes = [1, 128], strides = [1, 1]} : vector<49x128xf32> to vector<1x128xf32>
      %253 = vector.extract_strided_slice %246 {offsets = [1, 0], sizes = [16, 128], strides = [1, 1]} : vector<24x128xf32> to vector<16x128xf32>
      %254 = vector.broadcast %252 : vector<1x128xf32> to vector<16x128xf32>
      %255 = arith.mulf %253, %254 : vector<16x128xf32>
      %256 = arith.addf %251, %255 : vector<16x128xf32>
      %257 = vector.extract_strided_slice %0 {offsets = [44, 0], sizes = [1, 128], strides = [1, 1]} : vector<49x128xf32> to vector<1x128xf32>
      %258 = vector.extract_strided_slice %246 {offsets = [2, 0], sizes = [16, 128], strides = [1, 1]} : vector<24x128xf32> to vector<16x128xf32>
      %259 = vector.broadcast %257 : vector<1x128xf32> to vector<16x128xf32>
      %260 = arith.mulf %258, %259 : vector<16x128xf32>
      %261 = arith.addf %256, %260 : vector<16x128xf32>
      %262 = vector.extract_strided_slice %0 {offsets = [45, 0], sizes = [1, 128], strides = [1, 1]} : vector<49x128xf32> to vector<1x128xf32>
      %263 = vector.extract_strided_slice %246 {offsets = [3, 0], sizes = [16, 128], strides = [1, 1]} : vector<24x128xf32> to vector<16x128xf32>
      %264 = vector.broadcast %262 : vector<1x128xf32> to vector<16x128xf32>
      %265 = arith.mulf %263, %264 : vector<16x128xf32>
      %266 = arith.addf %261, %265 : vector<16x128xf32>
      %267 = vector.extract_strided_slice %0 {offsets = [46, 0], sizes = [1, 128], strides = [1, 1]} : vector<49x128xf32> to vector<1x128xf32>
      %268 = vector.extract_strided_slice %246 {offsets = [4, 0], sizes = [16, 128], strides = [1, 1]} : vector<24x128xf32> to vector<16x128xf32>
      %269 = vector.broadcast %267 : vector<1x128xf32> to vector<16x128xf32>
      %270 = arith.mulf %268, %269 : vector<16x128xf32>
      %271 = arith.addf %266, %270 : vector<16x128xf32>
      %272 = vector.extract_strided_slice %0 {offsets = [47, 0], sizes = [1, 128], strides = [1, 1]} : vector<49x128xf32> to vector<1x128xf32>
      %273 = vector.extract_strided_slice %246 {offsets = [5, 0], sizes = [16, 128], strides = [1, 1]} : vector<24x128xf32> to vector<16x128xf32>
      %274 = vector.broadcast %272 : vector<1x128xf32> to vector<16x128xf32>
      %275 = arith.mulf %273, %274 : vector<16x128xf32>
      %276 = arith.addf %271, %275 : vector<16x128xf32>
      %277 = vector.extract_strided_slice %0 {offsets = [48, 0], sizes = [1, 128], strides = [1, 1]} : vector<49x128xf32> to vector<1x128xf32>
      %278 = vector.extract_strided_slice %246 {offsets = [6, 0], sizes = [16, 128], strides = [1, 1]} : vector<24x128xf32> to vector<16x128xf32>
      %279 = vector.broadcast %277 : vector<1x128xf32> to vector<16x128xf32>
      %280 = arith.mulf %278, %279 : vector<16x128xf32>
      %281 = arith.addf %276, %280 : vector<16x128xf32>
      %282 = vector.broadcast %1 : vector<1x128xf32> to vector<16x128xf32>
      %283 = arith.addf %281, %282 : vector<16x128xf32>
      %cst_31 = arith.constant 0.000000e+00 : f32
      %284 = vector.broadcast %cst_31 : f32 to vector<16x128xf32>
      %285 = arith.maximumf %283, %284 : vector<16x128xf32>
      %286 = arith.index_cast %arg7 : i32 to index
      %c0_32 = arith.constant 0 : index
      %287 = vector.load %arg5[%286, %c0_32] : memref<16x16xf32, #tpu.memory_space<vmem>>, vector<1x16xf32>
      %cst_33 = arith.constant dense<0.000000e+00> : vector<1x128xf32>
      %288 = tpu.matmul %287, %285, %cst_33 {dimension_numbers = #tpu.dot_dimension_numbers<[1], [0], [0], [1], [0, 0, 1, 1], [], []>} : vector<1x16xf32>, vector<16x128xf32>, vector<1x128xf32> -> vector<1x128xf32>
      %289 = arith.addf %arg8, %288 : vector<1x128xf32>
      scf.yield %289 : vector<1x128xf32>
    }
    %c16_i32_3 = arith.constant 16 : i32
    %c0_4 = arith.constant 0 : index
    %c0_5 = arith.constant 0 : index
    %c0_6 = arith.constant 0 : index
    %5 = vector.load %arg6[%c0_4, %c0_5, %c0_6] : memref<1x1x128xf32, #tpu.memory_space<vmem>>, vector<1x1x128xf32>
    %6 = vector.shape_cast %5 : vector<1x1x128xf32> to vector<1x128xf32>
    %7 = vector.shape_cast %4 : vector<1x128xf32> to vector<1x1x128xf32>
    tpu.vector_store %arg6[%c0_4, %c0_5, %c0_6], %7 {strides = array<i32>} : memref<1x1x128xf32, #tpu.memory_space<vmem>>, vector<1x1x128xf32>,
    return
  }
  func.func @transform_0(%arg0: i32, %arg1: i32) -> (i32, i32, i32, i32) {
    %c0_i32 = arith.constant 0 : i32
    %c0_i32_0 = arith.constant 0 : i32
    %c0_i32_1 = arith.constant 0 : i32
    return %arg0, %c0_i32, %c0_i32_0, %arg1 : i32, i32, i32, i32
  }
  func.func @transform_1(%arg0: i32, %arg1: i32) -> (i32, i32) {
    %c0_i32 = arith.constant 0 : i32
    %c0_i32_0 = arith.constant 0 : i32
    return %c0_i32, %arg1 : i32, i32
  }
  func.func @transform_2(%arg0: i32, %arg1: i32) -> (i32, i32) {
    %c0_i32 = arith.constant 0 : i32
    %c0_i32_0 = arith.constant 0 : i32
    return %c0_i32, %arg1 : i32, i32
  }
  func.func @transform_3(%arg0: i32, %arg1: i32) -> (i32, i32) {
    %c0_i32 = arith.constant 0 : i32
    %c0_i32_0 = arith.constant 0 : i32
    %c0_i32_1 = arith.constant 0 : i32
    return %c0_i32, %c0_i32_0 : i32, i32
  }
  func.func @transform_4(%arg0: i32, %arg1: i32) -> (i32, i32, i32) {
    %c0_i32 = arith.constant 0 : i32
    %c0_i32_0 = arith.constant 0 : i32
    return %arg0, %c0_i32, %arg1 : i32, i32, i32
  }
}

module attributes {stable_mosaic.version = 11 : i64} {
  func.func @_bn_relu_kernel(%arg0: i32, %arg1: i32, %arg2: i32, %arg3: memref<1x16x16x128xf32, #tpu.memory_space<vmem>>, %arg4: memref<1x128xf32, #tpu.memory_space<vmem>>, %arg5: memref<1x128xf32, #tpu.memory_space<vmem>>, %arg6: memref<1x16x16x128xf32, #tpu.memory_space<vmem>>) attributes {dimension_semantics = [#tpu.dimension_semantics<parallel>, #tpu.dimension_semantics<parallel>, #tpu.dimension_semantics<parallel>], iteration_bounds = array<i64: 2, 1, 1>, scalar_prefetch = 0 : i64, scratch_operands = 0 : i64, tpu.core_type = #tpu.core_type<tc>, window_params = [{transform_indices = @transform_0, window_bounds = array<i64: 1, 16, 16, 128>}, {transform_indices = @transform_1, window_bounds = array<i64: 1, 128>}, {transform_indices = @transform_2, window_bounds = array<i64: 1, 128>}, {transform_indices = @transform_3, window_bounds = array<i64: 1, 16, 16, 128>}]} {
    %c0 = arith.constant 0 : index
    %c0_0 = arith.constant 0 : index
    %c0_1 = arith.constant 0 : index
    %c0_2 = arith.constant 0 : index
    %0 = vector.load %arg3[%c0, %c0_0, %c0_1, %c0_2] : memref<1x16x16x128xf32, #tpu.memory_space<vmem>>, vector<1x16x16x128xf32>
    %1 = vector.shape_cast %0 : vector<1x16x16x128xf32> to vector<16x16x128xf32>
    %c0_3 = arith.constant 0 : index
    %c0_4 = arith.constant 0 : index
    %2 = vector.load %arg4[%c0_3, %c0_4] : memref<1x128xf32, #tpu.memory_space<vmem>>, vector<1x128xf32>
    %3 = vector.shape_cast %2 : vector<1x128xf32> to vector<1x1x128xf32>
    %4 = vector.broadcast %3 : vector<1x1x128xf32> to vector<16x16x128xf32>
    %5 = arith.mulf %1, %4 : vector<16x16x128xf32>
    %c0_5 = arith.constant 0 : index
    %c0_6 = arith.constant 0 : index
    %6 = vector.load %arg5[%c0_5, %c0_6] : memref<1x128xf32, #tpu.memory_space<vmem>>, vector<1x128xf32>
    %7 = vector.shape_cast %6 : vector<1x128xf32> to vector<1x1x128xf32>
    %8 = vector.broadcast %7 : vector<1x1x128xf32> to vector<16x16x128xf32>
    %9 = arith.addf %5, %8 : vector<16x16x128xf32>
    %cst = arith.constant 0.000000e+00 : f32
    %10 = vector.broadcast %cst : f32 to vector<16x16x128xf32>
    %11 = arith.maximumf %9, %10 : vector<16x16x128xf32>
    %c0_7 = arith.constant 0 : index
    %c0_8 = arith.constant 0 : index
    %c0_9 = arith.constant 0 : index
    %c0_10 = arith.constant 0 : index
    %12 = vector.load %arg6[%c0_7, %c0_8, %c0_9, %c0_10] : memref<1x16x16x128xf32, #tpu.memory_space<vmem>>, vector<1x16x16x128xf32>
    %13 = vector.shape_cast %12 : vector<1x16x16x128xf32> to vector<16x16x128xf32>
    %14 = vector.shape_cast %11 : vector<16x16x128xf32> to vector<1x16x16x128xf32>
    tpu.vector_store %arg6[%c0_7, %c0_8, %c0_9, %c0_10], %14 {strides = array<i32>} : memref<1x16x16x128xf32, #tpu.memory_space<vmem>>, vector<1x16x16x128xf32>,
    return
  }
  func.func @transform_0(%arg0: i32, %arg1: i32, %arg2: i32) -> (i32, i32, i32, i32) {
    %c0_i32 = arith.constant 0 : i32
    %c0_i32_0 = arith.constant 0 : i32
    return %arg0, %arg2, %c0_i32, %arg1 : i32, i32, i32, i32
  }
  func.func @transform_1(%arg0: i32, %arg1: i32, %arg2: i32) -> (i32, i32) {
    %c0_i32 = arith.constant 0 : i32
    %c0_i32_0 = arith.constant 0 : i32
    return %c0_i32, %arg1 : i32, i32
  }
  func.func @transform_2(%arg0: i32, %arg1: i32, %arg2: i32) -> (i32, i32) {
    %c0_i32 = arith.constant 0 : i32
    %c0_i32_0 = arith.constant 0 : i32
    return %c0_i32, %arg1 : i32, i32
  }
  func.func @transform_3(%arg0: i32, %arg1: i32, %arg2: i32) -> (i32, i32, i32, i32) {
    %c0_i32 = arith.constant 0 : i32
    %c0_i32_0 = arith.constant 0 : i32
    return %arg0, %arg2, %c0_i32, %arg1 : i32, i32, i32, i32
  }
}

</mosaic_0001>

<bundles_post_ra>
// kernel: clfe_block.5
= control target key start
LH: loop header
LB: loop body
LE: loop exit
PB: predicated region body
PF: predicated region fallthrough
CT: control target
= control target key end

     0   :  { %8 = vsyncpa [#allocation3], 0  ;;  %s1107_s0 = inlined_call_operand.hbm [shape: f32[2,16,16,128], index: 0, kind: input, shape index: {}]   ;;  %s1108_s1 = inlined_call_operand.vmem [shape: f32[1,128], index: 1, kind: input, shape index: {}]   ;;  %s1109_s2 = inlined_call_operand.vmem [shape: f32[1,128], index: 2, kind: input, shape index: {}]   ;;  %s1110_s3 = inlined_call_operand.hbm [shape: f32[2,16,16,128], index: 3, kind: output, shape index: {}]  }
   0x1   :  { %10 = vsyncpa [#allocation3 + $0x1], 0 }
   0x2   :  { %11 = vsyncpa [#allocation4], 0 }
   0x3   :  { %13 = vsyncpa [#allocation4 + $0x1], 0  ;;  %s785_s12 = smov 0   ;;  %s787_s13 = smov 0  }
   0x4   :  { %s789_s14 = smov 0   ;;  %s791_s15 = smov 0  }
   0x5   :  { %s793_s16 = smov 0   ;;  %s795_s17 = smov 0  }
   0x6 LB: > { %s558_s18 = sadd.s32 4294967295, %s757_s17   ;;  %s559_s19 = sadd.s32 4294967294, %s757_s17   ;;  %s757_s17 = sphi %s795_s17, %s19_s17   ;;  %s753_s16 = sphi %s793_s16, %s1125_s16   ;;  %s749_s15 = sphi %s791_s15, %s1124_s15   ;;  %s745_s14 = sphi %s789_s14, %s1123_s14   ;;  %s741_s13 = sphi %s787_s13, %s1122_s13   ;;  %s737_s12 = sphi %s785_s12, %s1121_s12  }
   0x7   : > { %s38_s20 = sadd.s32 1, %s753_s16  ;;  %s49_s21 = sadd.s32 1, %s745_s14 }
   0x8   : > { %p40_p0 = scmp.ge.s32.totalorder %s38_s20, 2  ;;  %p56_p1 = scmp.ne.s32.totalorder %s745_s14, %s741_s13 }
   0x9   : > { %p57_p2 = scmp.eq.s32.totalorder %s757_s17, 0  ;;  %p62_p3 = scmp.ne.s32.totalorder %s741_s13, %s737_s12 }
   0xa   : > { %s1127_s20 = smov (%p40_p0, %s38_s20), 0  ;;  %p63_p5 = scmp.eq.s32.totalorder %s558_s18, 0 }
   0xb   : > { %p826_p4 = por %p57_p2, %p56_p1  ;;  %s42_s23 = ssub.s32 %s753_s16, %s1127_s20 }
   0xc   : > { %p142_p6 = scmp.eq.s32.totalorder %s558_s18, 1  ;;  %p47_p7 = scmp.eq.s32.totalorder %s42_s23, 0 }
   0xd   : > { %p832_p8 = por %p63_p5, %p62_p3  ;;  %p148_p10 = scmp.eq.s32.totalorder %s559_s19, 1 }
   0xe   : > { %p836_p9 = por %p142_p6, %p56_p1  ;;  %p591_p13 = scmp.lt.s32.totalorder %s757_s17, 2 }
   0xf   : > { %s841_s26 = scalar_select %p47_p7, %s745_s14, %s49_s21  }
  0x10   : > { %s1114_s25 = scalar_select %p836_p9, 1, 0 }
  0x11   : > { %p843_p11 = por %p148_p10, %p62_p3  ;;  %s180_s28 = sand.u32 1, %s745_s14  }
  0x12   : > { %s564_s29 = sshll.u32 %s180_s28, 8  ;;  %s577_s30 = sshll.u32 %s753_s16, 12 }
  0x13   : > { %s1115_s27 = scalar_select %p843_p11, 1, 0 }
  0x14   : > { %s854_s6 = scalar_lea.hbm %s1107_s0, %s577_s30  ;;  %s184_s7 = scalar_lea.vmem [#allocation2], %s564_s29 }
  0x15   : > { %s195_s8 = sshll.u32 %s184_s7, 4  ;;  %p860_p0 = pnand %p591_p13, %p826_p4  ;;  %s856_s8 = int_to_ptr.vmem [resolvable:$true] %s195_s8 }
  0x16   : > { %s865_s10 = scalar_lea.sflag [#allocation3], %s180_s28  ;;  %s645_s11 = scalar_lea.hbm %s854_s6, 4096 }
  0x17   : > { %p646_p2 = scmp.ne.s32.totalorder %s854_s6, %s645_s11  ;;  %p647_p3 = pneg %p860_p0 }
  0x18   : > { %s650_s21 = scalar_lea.hbm %s1107_s0, 8192  ;;  %p651_p4 = scmp.lt.u32.totalorder %s854_s6, %s1107_s0 }
  0x19   : > { %p648_p5 = pnand %p647_p3, %p646_p2  ;;  %p652_p7 = scmp.lt.u32.totalorder %s650_s21, %s645_s11 }
  0x1a   : > { %p654_p13 = scmp.lt.u32.totalorder %s645_s11, %s854_s6 }
  0x1b   : > { %p649_p6 = pneg %p648_p5  ;;  %p653_p10 = por %p652_p7, %p651_p4 }
  0x1d   : > { %p655_p12 = por %p654_p13, %p653_p10 }
  0x1f   : > { %p656_p1 = pnand %p655_p12, %p649_p6 }
  0x21   : > { %659 = shalt.err (!%p656_p1)
}
  0x22   : > { %s660_s28 = scalar_lea.vmem %s856_s8, 4096  ;;  %s759_s29 = smov [#allocation2]  }
  0x23   : > { %p661_p2 = scmp.ne.s32.totalorder %s856_s8, %s660_s28  ;;  %s665_s30 = sshll.u32 %s759_s29, 4  ;;  %s666_s30 = int_to_ptr.vmem [resolvable:$false] %s665_s30 }
  0x24   : > { %s667_s4 = scalar_lea.vmem %s666_s30, 8192  ;;  %p668_p9 = scmp.lt.s32.totalorder %s856_s8, %s666_s30 }
  0x25   : > { %p663_p5 = pnand %p661_p2, %p647_p3  ;;  %p669_p4 = scmp.lt.s32.totalorder %s667_s4, %s660_s28 }
  0x27   : > { %p664_p11 = pneg %p663_p5  ;;  %p670_p7 = por %p669_p4, %p668_p9 }
  0x29   : > { %p671_p10 = pnand %p670_p7, %p664_p11 }
  0x2b   : > { %674 = shalt.err (!%p671_p10)
}
  0x2c   : > { %s760_s5 = smov 128   ;;  %s761_s7 = smov 8  }
  0x2d   : > { %586 = dma.hbm_to_vmem [thread:$0]  (!%p860_p0), %s854_s6, 4096, %s856_s8, %s865_s10, %s760_s5, %s760_s5, %s761_s7  }
  0x2e   : > { %p203_p12 = scmp.lt.s32.totalorder %s757_s17, 3  ;;  %p1117_p1 = scmp.ge.s32.totalorder %s757_s17, 1 }
  0x30   : > { %p204_p3 = pnand %p1117_p1, %p203_p12 }
  0x31   : > { %s897_s11 = sand.u32 (!%p204_p3), 1, %s741_s13  }
  0x32   : > { %207 = sbr.rel (%p204_p3) target bundleno = 103 (0x67), region = 32  ;;  %s568_s18 = sshll.u32 (!%p204_p3), %s897_s11, 8 }
  0x33   : > { %s210_s19 = scalar_lea.sflag (!%p204_p3), [#allocation3], %s897_s11  ;;  %s903_s21 = scalar_lea.vmem (!%p204_p3), [#allocation2], %s568_s18 }
  0x39   : > { %728 = dma.done.wait (%p832_p8), %s210_s19, 4096  }
  0x3a   : > { %730 = vsyncadd (%p832_p8), %s210_s19, 4294963200  ;;  %v250_v0 = vld [vmem:[%s903_s21] sm:$0xff]  ;;  %v251_v4 = vld [vmem:[%s903_s21 + $0x8] sm:$0xff]  ;;  %s952_s24 = scalar_lea.vmem [#allocation5], %s568_s18  ;;  %s578_s22 = sshll.u32 %s749_s15, 12 }
  0x3b   : > { %v913_v1 = vld [vmem:[%s1108_s1] ss:$0 sm:$0xff]  ;;  %v252_v5 = vld [vmem:[%s903_s21 + $0x10] sm:$0xff]  ;;  %v253_v6 = vld [vmem:[%s903_s21 + $0x18] sm:$0xff]  ;;  %s442_s23 = sshll.u32 %s952_s24, 4  ;;  %s1049_s29 = scalar_lea.hbm %s1110_s3, %s578_s22  ;;  %s1051_s23 = int_to_ptr.vmem [resolvable:$true] %s442_s23 }
  0x3c   : > { %v918_v2 = vld [vmem:[%s1109_s2] ss:$0 sm:$0xff]  ;;  %v289_v3 = vmul.f32 %v913_v1, %v250_v0  ;;  %v290_v7 = vmul.f32 %v913_v1, %v251_v4  ;;  %v291_v8 = vmul.f32 %v913_v1, %v252_v5  ;;  %v292_v9 = vmul.f32 %v913_v1, %v253_v6  ;;  %v255_v11 = vld [vmem:[%s903_s21 + $0x28] sm:$0xff]  ;;  %v256_v12 = vld [vmem:[%s903_s21 + $0x30] sm:$0xff]  ;;  %s425_s30 = scalar_lea.sflag [#allocation4], %s897_s11  ;;  %s675_s4 = scalar_lea.vmem %s1051_s23, 4096 }
  0x3d   : > { %v254_v10 = vld [vmem:[%s903_s21 + $0x20] sm:$0xff]  ;;  %v294_v15 = vmul.f32 %v913_v1, %v255_v11  ;;  %v295_v16 = vmul.f32 %v913_v1, %v256_v12  ;;  %v257_v17 = vld [vmem:[%s903_s21 + $0x38] sm:$0xff]  ;;  %v259_v27 = vld [vmem:[%s903_s21 + $0x48] sm:$0xff]  ;;  %p676_p8 = scmp.ne.s32.totalorder %s1051_s23, %s675_s4  ;;  %p1118_p9 = scmp.ne.s32.totalorder %s1114_s25, 0 }
  0x3e   : > { %v328_v13 = vadd.f32 %v918_v2, %v289_v3  ;;  %v293_v14 = vmul.f32 %v913_v1, %v254_v10  ;;  %v329_v18 = vadd.f32 %v918_v2, %v290_v7  ;;  %v330_v19 = vadd.f32 %v918_v2, %v291_v8  ;;  %v258_v22 = vld [vmem:[%s903_s21 + $0x40] sm:$0xff]  ;;  %v260_v28 = vld [vmem:[%s903_s21 + $0x50] sm:$0xff]  ;;  %v261_v29 = vld [vmem:[%s903_s21 + $0x58] sm:$0xff]  ;;  %s762_s5 = smov [#allocation5]  }
  0x3f   : > { %v331_v20 = vadd.f32 %v918_v2, %v292_v9  ;;  %v296_v21 = vmul.f32 %v913_v1, %v257_v17  ;;  %v333_v25 = vadd.f32 %v918_v2, %v294_v15  ;;  %v334_v26 = vadd.f32 %v918_v2, %v295_v16  ;;  %v262_v34 = vld [vmem:[%s903_s21 + $0x60] sm:$0xff]  ;;  %v263_v35 = vld [vmem:[%s903_s21 + $0x68] sm:$0xff]  ;;  %v264_v36 = vld [vmem:[%s903_s21 + $0x70] sm:$0xff]  ;;  %p677_p11 = pnand %p676_p8, %p1118_p9  ;;  %s679_s7 = sshll.u32 %s762_s5, 4  ;;  %s680_s7 = int_to_ptr.vmem [resolvable:$false] %s679_s7 }
  0x40   : > { %v360_v23 = vmax.f32 %v328_v13, 0.0  ;;  %v332_v24 = vadd.f32 %v918_v2, %v293_v14  ;;  %v361_v30 = vmax.f32 %v329_v18, 0.0  ;;  %v362_v31 = vmax.f32 %v330_v19, 0.0  ;;  %v265_v41 = vld [vmem:[%s903_s21 + $0x78] sm:$0xff]  ;;  %v266_v54 = vld [vmem:[%s903_s21 + $0x80] sm:$0xff]  ;;  %v267_v59 = vld [vmem:[%s903_s21 + $0x88] sm:$0xff]  ;;  %p682_p6 = scmp.lt.s32.totalorder %s1051_s23, %s680_s7 }
  0x41   : > { %v363_v32 = vmax.f32 %v331_v20, 0.0  ;;  %v335_v33 = vadd.f32 %v918_v2, %v296_v21  ;;  %v365_v38 = vmax.f32 %v333_v25, 0.0  ;;  %v366_v39 = vmax.f32 %v334_v26, 0.0  ;;  %v268_v60 = vld [vmem:[%s903_s21 + $0x90] sm:$0xff]  ;;  %v269_v61 = vld [vmem:[%s903_s21 + $0x98] sm:$0xff]  ;;  %v270_v4 = vld [vmem:[%s903_s21 + $0xa0] sm:$0xff]  ;;  %p678_p0 = pneg %p677_p11 }
  0x42   : > { %392 = vst [vmem:[%s952_s24] sm:$0xff] %v360_v23  ;;  %v364_v37 = vmax.f32 %v332_v24, 0.0  ;;  %v297_v40 = vmul.f32 %v913_v1, %v258_v22  ;;  %393 = vst [vmem:[%s952_s24 + $0x8] sm:$0xff] %v361_v30  ;;  %v298_v43 = vmul.f32 %v913_v1, %v259_v27  ;;  %v299_v44 = vmul.f32 %v913_v1, %v260_v28  ;;  %v271_v5 = vld [vmem:[%s903_s21 + $0xa8] sm:$0xff]  ;;  %v272_v6 = vld [vmem:[%s903_s21 + $0xb0] sm:$0xff]  ;;  %s681_s18 = scalar_lea.vmem %s680_s7, 8192 }
  0x43   : > { %394 = vst [vmem:[%s952_s24 + $0x10] sm:$0xff] %v362_v31  ;;  %395 = vst [vmem:[%s952_s24 + $0x18] sm:$0xff] %v363_v32  ;;  %v367_v42 = vmax.f32 %v335_v33, 0.0  ;;  %v300_v45 = vmul.f32 %v913_v1, %v261_v29  ;;  %v301_v47 = vmul.f32 %v913_v1, %v262_v34  ;;  %v302_v48 = vmul.f32 %v913_v1, %v263_v35  ;;  %v273_v11 = vld [vmem:[%s903_s21 + $0xb8] sm:$0xff]  ;;  %v274_v24 = vld [vmem:[%s903_s21 + $0xc0] sm:$0xff]  ;;  %p683_p13 = scmp.lt.s32.totalorder %s681_s18, %s675_s4 }
  0x44   : > { %396 = vst [vmem:[%s952_s24 + $0x20] sm:$0xff] %v364_v37  ;;  %397 = vst [vmem:[%s952_s24 + $0x28] sm:$0xff] %v365_v38  ;;  %v336_v46 = vadd.f32 %v918_v2, %v297_v40  ;;  %v303_v49 = vmul.f32 %v913_v1, %v264_v36  ;;  %v337_v50 = vadd.f32 %v918_v2, %v298_v43  ;;  %v275_v29 = vld [vmem:[%s903_s21 + $0xc8] sm:$0xff]  ;;  %v276_v30 = vld [vmem:[%s903_s21 + $0xd0] sm:$0xff] }
  0x45   : > { %398 = vst [vmem:[%s952_s24 + $0x30] sm:$0xff] %v366_v39  ;;  %399 = vst [vmem:[%s952_s24 + $0x38] sm:$0xff] %v367_v42  ;;  %v338_v51 = vadd.f32 %v918_v2, %v299_v44  ;;  %v339_v52 = vadd.f32 %v918_v2, %v300_v45  ;;  %v304_v53 = vmul.f32 %v913_v1, %v265_v41  ;;  %v277_v31 = vld [vmem:[%s903_s21 + $0xd8] sm:$0xff]  ;;  %v278_v36 = vld [vmem:[%s903_s21 + $0xe0] sm:$0xff]  ;;  %p684_p2 = por %p683_p13, %p682_p6 }
  0x46   : > { %v368_v55 = vmax.f32 %v336_v46, 0.0  ;;  %v340_v56 = vadd.f32 %v918_v2, %v301_v47  ;;  %v341_v57 = vadd.f32 %v918_v2, %v302_v48  ;;  %v342_v58 = vadd.f32 %v918_v2, %v303_v49  ;;  %v279_v37 = vld [vmem:[%s903_s21 + $0xe8] sm:$0xff]  ;;  %v280_v38 = vld [vmem:[%s903_s21 + $0xf0] sm:$0xff]  ;;  %v281_v43 = vld [vmem:[%s903_s21 + $0xf8] sm:$0xff] }
  0x47   : > { %v369_v62 = vmax.f32 %v337_v50, 0.0  ;;  %v370_v63 = vmax.f32 %v338_v51, 0.0  ;;  %v371_v0 = vmax.f32 %v339_v52, 0.0  ;;  %v343_v3 = vadd.f32 %v918_v2, %v304_v53  ;;  %p685_p5 = pnand %p684_p2, %p678_p0 }
  0x48   : > { %400 = vst [vmem:[%s952_s24 + $0x40] sm:$0xff] %v368_v55  ;;  %v372_v7 = vmax.f32 %v340_v56, 0.0  ;;  %v373_v8 = vmax.f32 %v341_v57, 0.0  ;;  %v374_v9 = vmax.f32 %v342_v58, 0.0  ;;  %v305_v10 = vmul.f32 %v913_v1, %v266_v54 }
  0x49   : > { %401 = vst [vmem:[%s952_s24 + $0x48] sm:$0xff] %v369_v62  ;;  %402 = vst [vmem:[%s952_s24 + $0x50] sm:$0xff] %v370_v63  ;;  %v375_v12 = vmax.f32 %v343_v3, 0.0  ;;  %v306_v13 = vmul.f32 %v913_v1, %v267_v59  ;;  %v307_v14 = vmul.f32 %v913_v1, %v268_v60  ;;  %v308_v15 = vmul.f32 %v913_v1, %v269_v61 }
  0x4a   : > { %403 = vst [vmem:[%s952_s24 + $0x58] sm:$0xff] %v371_v0  ;;  %404 = vst [vmem:[%s952_s24 + $0x60] sm:$0xff] %v372_v7  ;;  %v344_v16 = vadd.f32 %v918_v2, %v305_v10  ;;  %v309_v17 = vmul.f32 %v913_v1, %v270_v4  ;;  %v310_v18 = vmul.f32 %v913_v1, %v271_v5 }
  0x4b   : > { %405 = vst [vmem:[%s952_s24 + $0x68] sm:$0xff] %v373_v8  ;;  %406 = vst [vmem:[%s952_s24 + $0x70] sm:$0xff] %v374_v9  ;;  %v311_v19 = vmul.f32 %v913_v1, %v272_v6  ;;  %v345_v20 = vadd.f32 %v918_v2, %v306_v13  ;;  %v346_v21 = vadd.f32 %v918_v2, %v307_v14 }
  0x4c   : > { %407 = vst [vmem:[%s952_s24 + $0x78] sm:$0xff] %v375_v12  ;;  %v347_v22 = vadd.f32 %v918_v2, %v308_v15  ;;  %v312_v23 = vmul.f32 %v913_v1, %v273_v11  ;;  %v376_v25 = vmax.f32 %v344_v16, 0.0  ;;  %v348_v26 = vadd.f32 %v918_v2, %v309_v17 }
  0x4d   : > { %v349_v27 = vadd.f32 %v918_v2, %v310_v18  ;;  %v350_v28 = vadd.f32 %v918_v2, %v311_v19  ;;  %v377_v32 = vmax.f32 %v345_v20, 0.0  ;;  %v378_v33 = vmax.f32 %v346_v21, 0.0 }
  0x4e   : > { %v379_v34 = vmax.f32 %v347_v22, 0.0  ;;  %v351_v35 = vadd.f32 %v918_v2, %v312_v23  ;;  %408 = vst [vmem:[%s952_s24 + $0x80] sm:$0xff] %v376_v25  ;;  %v380_v39 = vmax.f32 %v348_v26, 0.0  ;;  %v313_v42 = vmul.f32 %v913_v1, %v274_v24 }
  0x4f   : > { %v381_v40 = vmax.f32 %v349_v27, 0.0  ;;  %v382_v41 = vmax.f32 %v350_v28, 0.0  ;;  %409 = vst [vmem:[%s952_s24 + $0x88] sm:$0xff] %v377_v32  ;;  %410 = vst [vmem:[%s952_s24 + $0x90] sm:$0xff] %v378_v33  ;;  %v314_v45 = vmul.f32 %v913_v1, %v275_v29  ;;  %v315_v46 = vmul.f32 %v913_v1, %v276_v30 }
  0x50   : > { %411 = vst [vmem:[%s952_s24 + $0x98] sm:$0xff] %v379_v34  ;;  %v383_v44 = vmax.f32 %v351_v35, 0.0  ;;  %v316_v47 = vmul.f32 %v913_v1, %v277_v31  ;;  %412 = vst [vmem:[%s952_s24 + $0xa0] sm:$0xff] %v380_v39  ;;  %v352_v48 = vadd.f32 %v918_v2, %v313_v42  ;;  %v317_v49 = vmul.f32 %v913_v1, %v278_v36 }
  0x51   : > { %413 = vst [vmem:[%s952_s24 + $0xa8] sm:$0xff] %v381_v40  ;;  %414 = vst [vmem:[%s952_s24 + $0xb0] sm:$0xff] %v382_v41  ;;  %v318_v50 = vmul.f32 %v913_v1, %v279_v37  ;;  %v319_v51 = vmul.f32 %v913_v1, %v280_v38  ;;  %v353_v52 = vadd.f32 %v918_v2, %v314_v45 }
  0x52   : > { %415 = vst [vmem:[%s952_s24 + $0xb8] sm:$0xff] %v383_v44  ;;  %v354_v53 = vadd.f32 %v918_v2, %v315_v46  ;;  %v355_v54 = vadd.f32 %v918_v2, %v316_v47  ;;  %v320_v55 = vmul.f32 %v913_v1, %v281_v43  ;;  %v384_v56 = vmax.f32 %v352_v48, 0.0 }
  0x53   : > { %v356_v57 = vadd.f32 %v918_v2, %v317_v49  ;;  %v357_v58 = vadd.f32 %v918_v2, %v318_v50  ;;  %v358_v59 = vadd.f32 %v918_v2, %v319_v51  ;;  %v385_v60 = vmax.f32 %v353_v52, 0.0 }
  0x54   : > { %v386_v61 = vmax.f32 %v354_v53, 0.0  ;;  %v387_v62 = vmax.f32 %v355_v54, 0.0  ;;  %v359_v1 = vadd.f32 %v918_v2, %v320_v55  ;;  %416 = vst [vmem:[%s952_s24 + $0xc0] sm:$0xff] %v384_v56 }
  0x55   : > { %v388_v63 = vmax.f32 %v356_v57, 0.0  ;;  %v389_v0 = vmax.f32 %v357_v58, 0.0  ;;  %v390_v3 = vmax.f32 %v358_v59, 0.0  ;;  %417 = vst [vmem:[%s952_s24 + $0xc8] sm:$0xff] %v385_v60 }
  0x56   : > { %418 = vst [vmem:[%s952_s24 + $0xd0] sm:$0xff] %v386_v61  ;;  %419 = vst [vmem:[%s952_s24 + $0xd8] sm:$0xff] %v387_v62  ;;  %v391_v4 = vmax.f32 %v359_v1, 0.0 }
  0x57   : > { %420 = vst [vmem:[%s952_s24 + $0xe0] sm:$0xff] %v388_v63  ;;  %421 = vst [vmem:[%s952_s24 + $0xe8] sm:$0xff] %v389_v0 }
  0x58   : > { %422 = vst [vmem:[%s952_s24 + $0xf0] sm:$0xff] %v390_v3  ;;  %423 = vst [vmem:[%s952_s24 + $0xf8] sm:$0xff] %v391_v4 }
  0x59   : > { %688 = shalt.err (!%p685_p5)
}
  0x5a   : > { %s689_s19 = scalar_lea.hbm %s1049_s29, 4096  ;;  %s693_s8 = scalar_lea.hbm %s1110_s3, 8192 }
  0x5b   : > { %p690_p4 = scmp.ne.s32.totalorder %s1049_s29, %s689_s19  ;;  %p694_p12 = scmp.lt.u32.totalorder %s1049_s29, %s1110_s3 }
  0x5c   : > { %p695_p1 = scmp.lt.u32.totalorder %s693_s8, %s689_s19  ;;  %p697_p8 = scmp.lt.u32.totalorder %s689_s19, %s1049_s29 }
  0x5d   : > { %p691_p7 = pnand %p690_p4, %p1118_p9 }
  0x5e   : > { %p696_p3 = por %p695_p1, %p694_p12 }
  0x5f   : > { %p692_p10 = pneg %p691_p7 }
  0x60   : > { %p698_p11 = por %p697_p8, %p696_p3 }
  0x62   : > { %p699_p0 = pnand %p698_p11, %p692_p10 }
  0x64   : > { %702 = shalt.err (!%p699_p0)
}
  0x65   : > { %s763_s24 = smov 128   ;;  %s764_s22 = smov 8  }
  0x66   : > { %581 = dma.vmem_to_hbm [thread:$0]  (%p1118_p9), %s1051_s23, 4096, %s1049_s29, %s425_s30, %s763_s24, %s763_s24, %s764_s22  }
  0x67 PF: > { %s457_s15 = sand.u32 1, %s737_s12   ;;  %p1119_p6 = scmp.ne.s32.totalorder %s1115_s27, 0 }
  0x68   : > { %p1120_p13 = scmp.ge.s32.totalorder %s757_s17, 2  ;;  %s458_s28 = scalar_lea.sflag [#allocation4], %s457_s15 }
  0x6a   : > { %p588_p2 = pnand %p1120_p13, %p1119_p6 }
  0x6c   : > { %732 = dma.done.wait (!%p588_p2), %s458_s28, 4096  }
  0x6d   : > { %734 = vsyncadd (!%p588_p2), %s458_s28, 4294963200  ;;  %s19_s17 = sadd.s32 1, %s757_s17   ;;  %s1121_s12 = smov %s741_s13 }
  0x6e   : > { %p16_p5 = scmp.ge.s32.totalorder %s19_s17, 4   ;;  %s1122_s13 = smov %s745_s14 }
  0x6f   : > { %s1123_s14 = smov %s841_s26  ;;  %s1124_s15 = smov %s753_s16 }
  0x70   : > { %s1125_s16 = smov %s1127_s20  ;;  %18 = sbr.rel (!%p16_p5) target bundleno = 6 (0x6), region = 83 }
  0x77   :  { %463 = vsyncpa [#allocation3], 1 }
  0x78   :  { %465 = vsyncpa [#allocation3 + $0x1], 1 }
  0x79   :  { %466 = vsyncpa [#allocation4], 1 }
  0x7a   :  { %468 = vsyncpa [#allocation4 + $0x1], 1 }

// kernel: clfe_block.3
= control target key start
LH: loop header
LB: loop body
LE: loop exit
PB: predicated region body
PF: predicated region fallthrough
CT: control target
= control target key end

     0   :  { %9 = vsyncpa [#allocation3], 0  ;;  %s2561_s0 = inlined_call_operand.hbm [shape: f32[2,22,24,128], index: 0, kind: input, shape index: {}]   ;;  %s2562_s1 = inlined_call_operand.hbm [shape: f32[49,128], index: 1, kind: input, shape index: {}]   ;;  %s2563_s2 = inlined_call_operand.hbm [shape: f32[1,128], index: 2, kind: input, shape index: {}]   ;;  %s2564_s3 = inlined_call_operand.hbm [shape: f32[16,16], index: 3, kind: input, shape index: {}]   ;;  %s2565_s4 = inlined_call_operand.hbm [shape: f32[2,1,128], index: 4, kind: output, shape index: {}]  }
   0x1   :  { %11 = vsyncpa [#allocation3 + $0x1], 0 }
   0x2   :  { %12 = vsyncpa [#allocation6], 0 }
   0x3   :  { %13 = vsyncpa [#allocation9], 0 }
   0x4   :  { %14 = vsyncpa [#allocation4], 0 }
   0x5   :  { %16 = vsyncpa [#allocation4 + $0x1], 0  ;;  %s1868_s15 = smov 0   ;;  %s1870_s16 = smov 0  }
   0x6   :  { %s1872_s17 = smov 0   ;;  %s1874_s18 = smov 0  }
   0x7   :  { %s1876_s19 = smov 0   ;;  %s1878_s20 = smov 0  }
   0x8 LB: > { %s1445_s21 = sadd.s32 4294967295, %s1823_s20   ;;  %s1446_s22 = sadd.s32 4294967294, %s1823_s20   ;;  %s1823_s20 = sphi %s1878_s20, %s22_s20   ;;  %s1819_s19 = sphi %s1876_s19, %s2595_s19   ;;  %s1815_s18 = sphi %s1874_s18, %s2594_s18   ;;  %s1811_s17 = sphi %s1872_s17, %s2593_s17   ;;  %s1807_s16 = sphi %s1870_s16, %s2592_s16   ;;  %s1803_s15 = sphi %s1868_s15, %s2591_s15  }
   0x9   : > { %p56_p0 = scmp.ne.s32.totalorder %s1807_s16, %s1803_s15  ;;  %p1902_p1 = scmp.eq.s32.totalorder %s1445_s21, 0 }
   0xa   : > { %p1906_p2 = scmp.eq.s32.totalorder %s1445_s21, 1  ;;  %p161_p3 = scmp.eq.s32.totalorder %s1446_s22, 1 }
   0xb   : > { %s2572_s23 = scalar_select %p1902_p1, 1, 0 }
   0xc   : > { %s2573_s24 = scalar_select %p1906_p2, 1, 0 }
   0xd   : > { %p1912_p4 = por %p1902_p1, %p56_p0  ;;  %p1447_p5 = scmp.ge.s32.totalorder %s1823_s20, 1 }
   0xe   : > { %p1917_p6 = por %p161_p3, %p56_p0  ;;  %p168_p7 = scmp.lt.s32.totalorder %s1823_s20, 3 }
   0xf   : > { %s2574_s25 = scalar_select %p1912_p4, 1, 0 }
  0x10   : > { %s2575_s26 = scalar_select %p1917_p6, 1, 0 }
  0x11   : > { %p1922_p8 = pnand %p1447_p5, %p168_p7  ;;  %s1833_s28 = smov [#allocation5]  }
  0x12   : > { %2576 = sst [smem:[#allocation15_spill]] %s2575_s26  ;;  %s182_s29 = sshll.u32 %s1833_s28, 4  ;;  %s1926_s29 = int_to_ptr.vmem [resolvable:$true] %s182_s29 }
  0x13   : > { %s2577_s27 = scalar_select %p1922_p8, 1, 0 }
  0x14   : > { %p1513_p9 = pneg %p1922_p8  ;;  %s1834_s5 = smov [#allocation7]  }
  0x15   : > { %s198_s6 = sshll.u32 %s1834_s5, 4  ;;  %s1835_s7 = smov [#allocation8]   ;;  %s1937_s6 = int_to_ptr.vmem [resolvable:$true] %s198_s6 }
  0x16   : > { %p1933_p11 = pnand %p1513_p9, %p1902_p1  ;;  %s1939_s8 = sshll.u32 %s1835_s7, 4  ;;  %s209_s8 = int_to_ptr.vmem [resolvable:$true] %s1939_s8 }
  0x17   : > { %s1611_s11 = scalar_lea.hbm %s2562_s1, 896 }
  0x18   : > { %p1612_p12 = scmp.ne.s32.totalorder %s2562_s1, %s1611_s11  ;;  %p1949_p13 = pneg %p1933_p11 }
  0x19   : > { %p1618_p5 = scmp.lt.u32.totalorder %s1611_s11, %s2562_s1 }
  0x1a   : > { %p1614_p0 = pnand %p1949_p13, %p1612_p12 }
  0x1c   : > { %p1615_p3 = pneg %p1614_p0 }
  0x1e   : > { %p1620_p7 = pnand %p1618_p5, %p1615_p3 }
  0x20   : > { %1623 = shalt.err (!%p1620_p7)
}
  0x21   : > { %s1624_s28 = scalar_lea.vmem %s1926_s29, 896  ;;  %p1632_p1 = scmp.lt.s32.totalorder %s1926_s29, %s1926_s29 }
  0x22   : > { %p1625_p9 = scmp.ne.s32.totalorder %s1926_s29, %s1624_s28  ;;  %p1633_p4 = scmp.lt.s32.totalorder %s1624_s28, %s1624_s28 }
  0x24   : > { %p1627_p10 = pnand %p1625_p9, %p1949_p13  ;;  %p1634_p12 = por %p1633_p4, %p1632_p1 }
  0x26   : > { %p1628_p6 = pneg %p1627_p10 }
  0x28   : > { %p1635_p0 = pnand %p1634_p12, %p1628_p6 }
  0x2a   : > { %1638 = shalt.err (!%p1635_p0)
}
  0x2b   : > { %s2571_s5 = smov 128   ;;  %s1837_s7 = smov 8  }
  0x2c   : > { %1516 = dma.hbm_to_vmem [thread:$0]  (!%p1933_p11), %s2562_s1, 896, %s1926_s29, [#allocation6], %s2571_s5, %s2571_s5, %s1837_s7  }
  0x2d   : > { %s1639_s13 = scalar_lea.hbm %s2563_s2, 16 }
  0x2e   : > { %p1640_p1 = scmp.ne.s32.totalorder %s2563_s2, %s1639_s13  ;;  %p1646_p10 = scmp.lt.u32.totalorder %s1639_s13, %s2563_s2 }
  0x30   : > { %p1642_p4 = pnand %p1640_p1, %p1949_p13 }
  0x32   : > { %p1643_p6 = pneg %p1642_p4 }
  0x34   : > { %p1648_p3 = pnand %p1646_p10, %p1643_p6 }
  0x36   : > { %1651 = shalt.err (!%p1648_p3)
}
  0x37   : > { %s1652_s29 = scalar_lea.vmem %s1937_s6, 16  ;;  %s1659_s9 = scalar_lea.vmem %s1937_s6, 32 }
  0x38   : > { %p1653_p5 = scmp.ne.s32.totalorder %s1937_s6, %s1652_s29  ;;  %p1660_p12 = scmp.lt.s32.totalorder %s1937_s6, %s1937_s6 }
  0x39   : > { %p1661_p0 = scmp.lt.s32.totalorder %s1659_s9, %s1652_s29 }
  0x3a   : > { %p1655_p7 = pnand %p1653_p5, %p1949_p13 }
  0x3b   : > { %p1662_p1 = por %p1661_p0, %p1660_p12 }
  0x3c   : > { %p1656_p9 = pneg %p1655_p7 }
  0x3e   : > { %p1663_p4 = pnand %p1662_p1, %p1656_p9 }
  0x40   : > { %1666 = shalt.err (!%p1663_p4)
}
  0x41   : > { %1519 = dma.hbm_to_vmem [thread:$0]  (!%p1933_p11), %s2563_s2, 16, %s1937_s6, [#allocation6]  }
  0x42   : > { %s1667_s13 = scalar_lea.hbm %s2564_s3, 256 }
  0x43   : > { %p1668_p6 = scmp.ne.s32.totalorder %s2564_s3, %s1667_s13  ;;  %p1674_p5 = scmp.lt.u32.totalorder %s1667_s13, %s2564_s3 }
  0x45   : > { %p1670_p10 = pnand %p1668_p6, %p1949_p13 }
  0x47   : > { %p1671_p3 = pneg %p1670_p10 }
  0x49   : > { %p1676_p7 = pnand %p1674_p5, %p1671_p3 }
  0x4b   : > { %1679 = shalt.err (!%p1676_p7)
}
  0x4c   : > { %s1680_s9 = scalar_lea.vmem %s209_s8, 256  ;;  %p1688_p1 = scmp.lt.s32.totalorder %s209_s8, %s209_s8 }
  0x4d   : > { %p1681_p9 = scmp.ne.s32.totalorder %s209_s8, %s1680_s9  ;;  %p1689_p4 = scmp.lt.s32.totalorder %s1680_s9, %s1680_s9 }
  0x4f   : > { %p1683_p12 = pnand %p1681_p9, %p1949_p13  ;;  %p1690_p8 = por %p1689_p4, %p1688_p1 }
  0x51   : > { %p1684_p0 = pneg %p1683_p12 }
  0x53   : > { %p1691_p2 = pnand %p1690_p8, %p1684_p0 }
  0x55   : > { %1694 = shalt.err (!%p1691_p2)
}
  0x56   : > { %1522 = dma.hbm_to_vmem [thread:$0]  (!%p1933_p11), %s2564_s3, 256, %s209_s8, [#allocation9], %s2571_s5, %s2571_s5, %s1837_s7  }
  0x57   : > { %s43_s14 = sadd.s32 1, %s1811_s17  ;;  %s34_s30 = sadd.s32 1, %s1819_s19 }
  0x58   : > { %p50_p2 = scmp.ne.s32.totalorder %s1811_s17, %s1807_s16  ;;  %p36_p8 = scmp.ge.s32.totalorder %s34_s30, 2 }
  0x59   : > { %p51_p13 = scmp.eq.s32.totalorder %s1823_s20, 0  ;;  %p2580_p6 = scmp.ne.s32.totalorder %s2573_s24, 0 }
  0x5a   : > { %p1534_p3 = scmp.lt.s32.totalorder %s1823_s20, 2  ;;  %s2597_s30 = smov (%p36_p8, %s34_s30), 0 }
  0x5b   : > { %p2026_p10 = por %p2580_p6, %p50_p2  ;;  %p52_p5 = por %p51_p13, %p50_p2 }
  0x5c   : > { %s222_s11 = sand.u32 1, %s1811_s17   ;;  %s38_s12 = ssub.s32 %s1819_s19, %s2597_s30 }
  0x5d   : > { %p41_p7 = scmp.eq.s32.totalorder %s38_s12, 0  ;;  %s1494_s8 = smul.u32 528, %s222_s11 }
  0x5e   : > { %s1495_s13 = smul.u32 8448, %s1819_s19  ;;  %p2037_p11 = pnand %p1534_p3, %p52_p5 }
  0x5f   : > { %s2042_s24 = scalar_select %p41_p7, %s1811_s17, %s43_s14  }
  0x60   : > { %s2047_s29 = scalar_lea.hbm %s2561_s0, %s1495_s13  ;;  %s226_s9 = scalar_lea.vmem [#allocation2], %s1494_s8 }
  0x61   : > { %s234_s6 = sshll.u32 %s226_s9, 4  ;;  %s2051_s26 = scalar_lea.sflag [#allocation3], %s222_s11  ;;  %s2049_s6 = int_to_ptr.vmem [resolvable:$true] %s234_s6 }
  0x62   : > { %s1695_s12 = scalar_lea.hbm %s2047_s29, 8448  ;;  %p1697_p12 = pneg %p2037_p11 }
  0x63   : > { %p1696_p9 = scmp.ne.s32.totalorder %s2047_s29, %s1695_s12  ;;  %s1700_s22 = scalar_lea.hbm %s2561_s0, 16896 }
  0x64   : > { %p1701_p4 = scmp.lt.u32.totalorder %s2047_s29, %s2561_s0  ;;  %p1702_p2 = scmp.lt.u32.totalorder %s1700_s22, %s1695_s12 }
  0x65   : > { %p1698_p0 = pnand %p1697_p12, %p1696_p9  ;;  %p1704_p13 = scmp.lt.u32.totalorder %s1695_s12, %s2047_s29 }
  0x66   : > { %p1703_p8 = por %p1702_p2, %p1701_p4 }
  0x67   : > { %p1699_p1 = pneg %p1698_p0 }
  0x68   : > { %p1705_p6 = por %p1704_p13, %p1703_p8 }
  0x6a   : > { %p1706_p3 = pnand %p1705_p6, %p1699_p1 }
  0x6c   : > { %1709 = shalt.err (!%p1706_p3)
}
  0x6d   : > { %s1710_s11 = scalar_lea.vmem %s2049_s6, 8448  ;;  %s1838_s8 = smov [#allocation2]  }
  0x6e   : > { %p1711_p5 = scmp.ne.s32.totalorder %s2049_s6, %s1710_s11  ;;  %s1715_s9 = sshll.u32 %s1838_s8, 4  ;;  %s1716_s9 = int_to_ptr.vmem [resolvable:$false] %s1715_s9 }
  0x6f   : > { %s1717_s5 = scalar_lea.vmem %s1716_s9, 16896  ;;  %p1718_p0 = scmp.lt.s32.totalorder %s2049_s6, %s1716_s9 }
  0x70   : > { %p1713_p7 = pnand %p1711_p5, %p1697_p12  ;;  %p1719_p4 = scmp.lt.s32.totalorder %s1717_s5, %s1710_s11 }
  0x72   : > { %p1714_p9 = pneg %p1713_p7  ;;  %p1720_p2 = por %p1719_p4, %p1718_p0 }
  0x74   : > { %p1721_p8 = pnand %p1720_p2, %p1714_p9 }
  0x76   : > { %1724 = shalt.err (!%p1721_p8)
}
  0x77   : > { %s2583_s12 = smov 128   ;;  %p2584_p12 = scmp.ne.s32.totalorder %s2577_s27, 0 }
  0x78   : > { %1526 = dma.hbm_to_vmem [thread:$0]  (!%p2037_p11), %s2047_s29, 8448, %s2049_s6, %s2051_s26, %s2583_s12, %s2583_s12, %s1837_s7  }
  0x79   : > { %246 = sbr.rel (%p2584_p12) target bundleno = 507 (0x1fb), region = 36  ;;  %s2085_s14 = sand.u32 (!%p2584_p12), 1, %s1807_s16  }
  0x7a   : > { %s1496_s13 = smul.u32 (!%p2584_p12), 528, %s2085_s14  ;;  %s249_s22 = scalar_lea.sflag (!%p2584_p12), [#allocation3], %s2085_s14 }
  0x7b   : > { %p2585_p1 = scmp.ne.s32.totalorder (!%p2584_p12), %s2574_s25, 0 }
  0x7c   : > { %s2089_s28 = scalar_lea.vmem (!%p2584_p12), [#allocation2], %s1496_s13 }
  0x80   : > { %1786 = dma.done.wait (%p2585_p1), %s249_s22, 8448  }
  0x81   : > { %1788 = vsyncadd (%p2585_p1), %s249_s22, 4294958848  ;;  %p2586_p11 = scmp.ne.s32.totalorder %s2572_s23, 0 }
  0x83   : > { %1790 = dma.done.wait (%p2586_p11), [#allocation6], 912  }
  0x84   : > { %1792 = vsyncadd (%p2586_p11), [#allocation6], 4294966384 }
  0x85   : > { %1794 = dma.done.wait (%p2586_p11), [#allocation9], 256  }
  0x86   : > { %1796 = vsyncadd (%p2586_p11), [#allocation9], 4294967040  ;;  %v2103_v0 = vld [vmem:[#allocation5] sm:$0xff]  ;;  %v2105_v1 = vld [vmem:[#allocation5 + $0x8] sm:$0xff]  ;;  %s287_s25 = scalar_lea.vmem [#allocation10], %s2085_s14  ;;  %v2120_v8 = vmov 0.0  }
  0x87   : > { %v2107_v2 = vld [vmem:[#allocation5 + $0x10] sm:$0xff]  ;;  %v2109_v3 = vld [vmem:[#allocation5 + $0x18] sm:$0xff]  ;;  %v2111_v4 = vld [vmem:[#allocation5 + $0x20] sm:$0xff]  ;;  %s2122_s23 = smov 0  }
  0x88   : > { %v2113_v5 = vld [vmem:[#allocation5 + $0x28] sm:$0xff]  ;;  %v2115_v6 = vld [vmem:[#allocation5 + $0x30] ss:$0 sm:$0xff]  ;;  %v2117_v7 = vld [vmem:[#allocation7] ss:$0 sm:$0xff] }
  0x89 LB: >> { %v308_v9 = vlaneseq  ;;  %s303_s27 = smul.u32 24, %s1831_s23  ;;  %vm326_vm0 = vcmask 1046528   ;;  %vm346_vm1 = vcmask 1045504   ;;  %vm366_vm2 = vcmask 1044480   ;;  %s1214_s21 = scalar_lea.vmem [#allocation8], %s1831_s23  ;;  %s1831_s23 = sphi %s2122_s23, %s301_s23   ;;  %v1827_v8 = vphi %v2120_v8, %v2587_v8  }
  0x8a   : >> { %vm386_vm3 = vcmask 1043456   ;;  %vm406_vm4 = vcmask 1042432   ;;  %vm426_vm5 = vcmask 1041408   ;;  %vm1840_vm6 = vmmov 0   ;;  %s301_s23 = sadd.s32 1, %s1831_s23  }
  0x8b   : >> { %v309_v10 = vshrl.u32 %v308_v9, 7  ;;  %s2132_s7 = scalar_lea.vmem %s2089_s28, %s303_s27 [#allocation2]  ;;  %vm1216_vm7 = vcmask 130048   ;;  %p298_p13 = scmp.ge.s32.totalorder %s301_s23, 16  }
  0x8c   : >> { %v305_v15 = vld [vmem:[%s2132_s7] sm:$0xff]  ;;  %v2144_v16 = vld [vmem:[%s2132_s7 + $0x8] sm:$0xff]  ;;  %v2153_v20 = vld [vmem:[%s2132_s7 + $0x10] sm:$0xff]  ;;  %s1478_s29 = sshll.u32 (%p298_p13), %s1815_s18, 4  ;;  %s1306_s8 = sshll.u32 (%p298_p13), %s287_s25, 4  ;;  %s1307_s8 = int_to_ptr.vmem [resolvable:$true] %s1306_s8 }
  0x8d   : >> { %v2134_v11 = vsub.s32 0, %v309_v10  ;;  %v2136_v12 = vsub.s32 1, %v309_v10  ;;  %v2138_v13 = vsub.s32 2, %v309_v10  ;;  %v2140_v14 = vsub.s32 3, %v309_v10  ;;  %s2516_s11 = scalar_lea.hbm (%p298_p13), %s2565_s4, %s1478_s29  ;;  %s1293_s9 = scalar_lea.sflag (%p298_p13), [#allocation4], %s2085_s14 }
  0x8e   : >> { %v2146_v17 = vsub.s32 4, %v309_v10  ;;  %v2148_v18 = vsub.s32 5, %v309_v10  ;;  %v2150_v19 = vsub.s32 6, %v309_v10  ;;  %v2169_v28 = vsub.s32 7, %v309_v10  ;;  %s1725_s5 = scalar_lea.vmem (%p298_p13), %s1307_s8, 16  ;;  %s1842_s12 = smov (%p298_p13), [#allocation10]  }
  0x8f   : >> { %v311_v21 = vrot.slane %v2103_v0, %v2134_v11  ;;  %v319_v22 = vrot.slane %v2103_v0, %v2136_v12  ;;  %v339_v23 = vrot.slane %v2103_v0, %v2138_v13  ;;  %v359_v24 = vrot.slane %v2103_v0, %v2140_v14  ;;  %p1726_p6 = scmp.ne.s32.totalorder (%p298_p13), %s1307_s8, %s1725_s5  ;;  %s1729_s13 = sshll.u32 (%p298_p13), %s1842_s12, 4  ;;  %s1730_s13 = int_to_ptr.vmem [resolvable:$false] %s1729_s13 }
  0x90   : >> { %v379_v25 = vrot.slane %v2103_v0, %v2146_v17  ;;  %v399_v26 = vrot.slane %v2103_v0, %v2148_v18  ;;  %v419_v27 = vrot.slane %v2103_v0, %v2150_v19  ;;  %s1731_s22 = scalar_lea.vmem (%p298_p13), %s1730_s13, 32  ;;  %p1732_p7 = scmp.lt.s32.totalorder (%p298_p13), %s1307_s8, %s1730_s13 }
  0x91   : >> { %v312_v29 = vmul.f32 %v311_v21, %v305_v15  ;;  %v313_v30 = vmul.f32 %v311_v21, %v2144_v16  ;;  %v320_v31 = vmul.f32 %v319_v22, %v305_v15  ;;  %v321_v32 = vmul.f32 %v319_v22, %v2144_v16  ;;  %p1727_p3 = pnand (%p298_p13), %p1726_p6, %p2026_p10  ;;  %p1733_p9 = scmp.lt.s32.totalorder (%p298_p13), %s1731_s22, %s1725_s5 }
  0x92   : >> { %v322_v33 = vmul.f32 %v319_v22, %v2153_v20  ;;  %v340_v34 = vmul.f32 %v339_v23, %v305_v15  ;;  %v341_v35 = vmul.f32 %v339_v23, %v2144_v16  ;;  %v342_v36 = vmul.f32 %v339_v23, %v2153_v20 }
  0x93   : >> { %v327_v37 = vrot.slane %v320_v31, 1  ;;  %v328_v38 = vrot.slane %v321_v32, 1  ;;  %v360_v39 = vmul.f32 %v359_v24, %v305_v15  ;;  %v361_v40 = vmul.f32 %v359_v24, %v2144_v16  ;;  %p1728_p5 = pneg (%p298_p13), %p1727_p3  ;;  %p1734_p0 = por (%p298_p13), %p1733_p9, %p1732_p7 }
  0x94   : >> { %v330_v41 = vrot.slane %v322_v33, 1  ;;  %v347_v42 = vrot.slane %v340_v34, 2  ;;  %v348_v43 = vrot.slane %v341_v35, 2  ;;  %v350_v44 = vrot.slane %v342_v36, 2 }
  0x95   : >> { %v329_v45 = vsel %vm326_vm0, %v327_v37, %v328_v38  ;;  %v362_v46 = vmul.f32 %v359_v24, %v2153_v20  ;;  %v367_v47 = vrot.slane %v360_v39, 3  ;;  %v368_v48 = vrot.slane %v361_v40, 3  ;;  %v2194_v39 = vld [vmem:[%s2132_s7 + $0x18] sm:$0xff]  ;;  %p1735_p4 = pnand (%p298_p13), %p1734_p0, %p1728_p5 }
  0x96   : >> { %v331_v49 = vsel %vm326_vm0, %v328_v38, %v330_v41  ;;  %v334_v50 = vadd.f32 %v329_v45, %v312_v29  ;;  %v349_v51 = vsel %vm346_vm1, %v347_v42, %v348_v43  ;;  %v351_v52 = vsel %vm346_vm1, %v348_v43, %v350_v44  ;;  %v2203_v45 = vld [vmem:[%s2132_s7 + $0x28] sm:$0xff] }
  0x97   : >> { %v335_v53 = vadd.f32 %v331_v49, %v313_v30  ;;  %v369_v54 = vsel %vm366_vm2, %v367_v47, %v368_v48  ;;  %v370_v55 = vrot.slane %v362_v46, 3  ;;  %v380_v56 = vmul.f32 %v379_v25, %v305_v15 }
  0x98   : >> { %v354_v57 = vadd.f32 %v349_v51, %v334_v50  ;;  %v381_v58 = vmul.f32 %v379_v25, %v2144_v16  ;;  %v382_v59 = vmul.f32 %v379_v25, %v2153_v20  ;;  %v400_v60 = vmul.f32 %v399_v26, %v305_v15 }
  0x99   : >> { %v355_v61 = vadd.f32 %v351_v52, %v335_v53  ;;  %v371_v62 = vsel %vm366_vm2, %v368_v48, %v370_v55  ;;  %v387_v63 = vrot.slane %v380_v56, 4  ;;  %v401_v9 = vmul.f32 %v399_v26, %v2144_v16 }
  0x9a   : >> { %v374_v10 = vadd.f32 %v369_v54, %v354_v57  ;;  %v388_v21 = vrot.slane %v381_v58, 4  ;;  %v390_v22 = vrot.slane %v382_v59, 4  ;;  %v402_v23 = vmul.f32 %v399_v26, %v2153_v20  ;;  %v2197_v26 = vld [vmem:[%s2132_s7 + $0x20] sm:$0xff] }
  0x9b   : >> { %v375_v24 = vadd.f32 %v371_v62, %v355_v61  ;;  %v407_v29 = vrot.slane %v400_v60, 5  ;;  %v408_v30 = vrot.slane %v401_v9, 5  ;;  %v420_v31 = vmul.f32 %v419_v27, %v305_v15 }
  0x9c   : >> { %v389_v25 = vsel %vm386_vm3, %v387_v63, %v388_v21  ;;  %v391_v32 = vsel %vm386_vm3, %v388_v21, %v390_v22  ;;  %v410_v33 = vrot.slane %v402_v23, 5  ;;  %v421_v34 = vmul.f32 %v419_v27, %v2144_v16 }
  0x9d   : >> { %v394_v35 = vadd.f32 %v389_v25, %v374_v10  ;;  %v395_v36 = vadd.f32 %v391_v32, %v375_v24  ;;  %v409_v37 = vsel %vm406_vm4, %v407_v29, %v408_v30  ;;  %v422_v38 = vmul.f32 %v419_v27, %v2153_v20 }
  0x9e   : >> { %v411_v15 = vsel %vm406_vm4, %v408_v30, %v410_v33  ;;  %v427_v40 = vrot.slane %v420_v31, 6  ;;  %v428_v41 = vrot.slane %v421_v34, 6  ;;  %v445_v42 = vrot.slane %v2103_v0, %v2169_v28 }
  0x9f   : >> { %v414_v43 = vadd.f32 %v409_v37, %v394_v35  ;;  %v415_v44 = vadd.f32 %v411_v15, %v395_v36  ;;  %v430_v16 = vrot.slane %v422_v38, 6  ;;  %v453_v46 = vrot.slane %v2105_v1, %v2134_v11 }
  0xa0   : >> { %v429_v20 = vsel %vm426_vm5, %v427_v40, %v428_v41  ;;  %v446_v27 = vmul.f32 %v2194_v39, %v445_v42  ;;  %v447_v47 = vmul.f32 %v2197_v26, %v445_v42  ;;  %v472_v48 = vrot.slane %v2105_v1, %v2136_v12 }
  0xa1   : >> { %v431_v49 = vsel %vm426_vm5, %v428_v41, %v430_v16  ;;  %v434_v50 = vadd.f32 %v429_v20, %v414_v43  ;;  %v454_v51 = vmul.f32 %v2194_v39, %v453_v46  ;;  %v455_v52 = vmul.f32 %v2197_v26, %v453_v46 }
  0xa2   : >> { %v435_v53 = vadd.f32 %v431_v49, %v415_v44  ;;  %v456_v54 = vmul.f32 %v2203_v45, %v453_v46  ;;  %v473_v55 = vmul.f32 %v2194_v39, %v472_v48  ;;  %v474_v56 = vmul.f32 %v2197_v26, %v472_v48 }
  0xa3   : >> { %v448_v57 = vadd.f32 %v446_v27, %v434_v50  ;;  %v460_v58 = vrot.slane %v454_v51, 1  ;;  %v461_v59 = vrot.slane %v455_v52, 1  ;;  %v475_v60 = vmul.f32 %v2203_v45, %v472_v48 }
  0xa4   : >> { %v449_v61 = vadd.f32 %v447_v47, %v435_v53  ;;  %v463_v62 = vrot.slane %v456_v54, 1  ;;  %v479_v63 = vrot.slane %v473_v55, 2  ;;  %v480_v9 = vrot.slane %v474_v56, 2 }
  0xa5   : >> { %v462_v10 = vsel %vm326_vm0, %v460_v58, %v461_v59  ;;  %v482_v21 = vrot.slane %v475_v60, 2  ;;  %v491_v22 = vrot.slane %v2105_v1, %v2138_v13  ;;  %v510_v23 = vrot.slane %v2105_v1, %v2140_v14  ;;  %v2248_v60 = vld [vmem:[%s2132_s7 + $0x38] sm:$0xff] }
  0xa6   : >> { %v464_v24 = vsel %vm326_vm0, %v461_v59, %v463_v62  ;;  %v467_v29 = vadd.f32 %v462_v10, %v448_v57  ;;  %v481_v30 = vsel %vm346_vm1, %v479_v63, %v480_v9  ;;  %v529_v31 = vrot.slane %v2105_v1, %v2146_v17  ;;  %v2245_v59 = vld [vmem:[%s2132_s7 + $0x30] sm:$0xff] }
  0xa7   : >> { %v468_v25 = vadd.f32 %v464_v24, %v449_v61  ;;  %v483_v32 = vsel %vm346_vm1, %v480_v9, %v482_v21  ;;  %v492_v33 = vmul.f32 %v2194_v39, %v491_v22  ;;  %v493_v34 = vmul.f32 %v2197_v26, %v491_v22 }
  0xa8   : >> { %v486_v35 = vadd.f32 %v481_v30, %v467_v29  ;;  %v494_v36 = vmul.f32 %v2203_v45, %v491_v22  ;;  %v511_v37 = vmul.f32 %v2194_v39, %v510_v23  ;;  %v512_v38 = vmul.f32 %v2197_v26, %v510_v23  ;;  %v2262_v30 = vld [vmem:[%s2132_s7 + $0x40] sm:$0xff] }
  0xa9   : >> { %v487_v15 = vadd.f32 %v483_v32, %v468_v25  ;;  %v498_v40 = vrot.slane %v492_v33, 3  ;;  %v499_v41 = vrot.slane %v493_v34, 3  ;;  %v513_v42 = vmul.f32 %v2203_v45, %v510_v23 }
  0xaa   : >> { %v501_v43 = vrot.slane %v494_v36, 3  ;;  %v517_v44 = vrot.slane %v511_v37, 4  ;;  %v518_v16 = vrot.slane %v512_v38, 4  ;;  %v530_v46 = vmul.f32 %v2194_v39, %v529_v31 }
  0xab   : >> { %v500_v20 = vsel %vm366_vm2, %v498_v40, %v499_v41  ;;  %v520_v27 = vrot.slane %v513_v42, 4  ;;  %v531_v47 = vmul.f32 %v2197_v26, %v529_v31  ;;  %v532_v48 = vmul.f32 %v2203_v45, %v529_v31 }
  0xac   : >> { %v502_v49 = vsel %vm366_vm2, %v499_v41, %v501_v43  ;;  %v505_v50 = vadd.f32 %v500_v20, %v486_v35  ;;  %v519_v51 = vsel %vm386_vm3, %v517_v44, %v518_v16  ;;  %v536_v52 = vrot.slane %v530_v46, 5 }
  0xad   : >> { %v506_v53 = vadd.f32 %v502_v49, %v487_v15  ;;  %v521_v54 = vsel %vm386_vm3, %v518_v16, %v520_v27  ;;  %v537_v55 = vrot.slane %v531_v47, 5  ;;  %v539_v56 = vrot.slane %v532_v48, 5 }
  0xae   : >> { %v524_v57 = vadd.f32 %v519_v51, %v505_v50  ;;  %v548_v58 = vrot.slane %v2105_v1, %v2148_v18  ;;  %v573_v61 = vrot.slane %v2105_v1, %v2150_v19  ;;  %v581_v62 = vrot.slane %v2105_v1, %v2169_v28 }
  0xaf   : >> { %v525_v63 = vadd.f32 %v521_v54, %v506_v53  ;;  %v538_v9 = vsel %vm406_vm4, %v536_v52, %v537_v55  ;;  %v540_v10 = vsel %vm406_vm4, %v537_v55, %v539_v56  ;;  %v600_v21 = vrot.slane %v2107_v2, %v2134_v11 }
  0xb0   : >> { %v543_v22 = vadd.f32 %v538_v9, %v524_v57  ;;  %v549_v23 = vmul.f32 %v2194_v39, %v548_v58  ;;  %v550_v24 = vmul.f32 %v2197_v26, %v548_v58  ;;  %v551_v29 = vmul.f32 %v2203_v45, %v548_v58 }
  0xb1   : >> { %v544_v31 = vadd.f32 %v540_v10, %v525_v63  ;;  %v574_v25 = vmul.f32 %v2245_v59, %v573_v61  ;;  %v575_v32 = vmul.f32 %v2248_v60, %v573_v61  ;;  %v582_v33 = vmul.f32 %v2245_v59, %v581_v62 }
  0xb2   : >> { %v555_v34 = vrot.slane %v549_v23, 6  ;;  %v556_v35 = vrot.slane %v550_v24, 6  ;;  %v558_v36 = vrot.slane %v551_v29, 6  ;;  %v583_v37 = vmul.f32 %v2248_v60, %v581_v62 }
  0xb3   : >> { %v584_v39 = vmul.f32 %v2262_v30, %v581_v62  ;;  %v588_v38 = vrot.slane %v582_v33, 1  ;;  %v601_v26 = vmul.f32 %v2245_v59, %v600_v21  ;;  %v602_v45 = vmul.f32 %v2248_v60, %v600_v21 }
  0xb4   : >> { %v557_v15 = vsel %vm426_vm5, %v555_v34, %v556_v35  ;;  %v559_v40 = vsel %vm426_vm5, %v556_v35, %v558_v36  ;;  %v589_v41 = vrot.slane %v583_v37, 1  ;;  %v603_v42 = vmul.f32 %v2262_v30, %v600_v21 }
  0xb5   : >> { %v562_v43 = vadd.f32 %v557_v15, %v543_v22  ;;  %v563_v44 = vadd.f32 %v559_v40, %v544_v31  ;;  %v591_v16 = vrot.slane %v584_v39, 1  ;;  %v607_v46 = vrot.slane %v601_v26, 2  ;;  %v2300_v15 = vld [vmem:[%s2132_s7 + $0x48] sm:$0xff] }
  0xb6   : >> { %v590_v20 = vsel %vm326_vm0, %v588_v38, %v589_v41  ;;  %v608_v27 = vrot.slane %v602_v45, 2  ;;  %v610_v47 = vrot.slane %v603_v42, 2  ;;  %v619_v48 = vrot.slane %v2107_v2, %v2136_v12 }
  0xb7   : >> { %v576_v49 = vadd.f32 %v574_v25, %v562_v43  ;;  %v577_v50 = vadd.f32 %v575_v32, %v563_v44  ;;  %v592_v51 = vsel %vm326_vm0, %v589_v41, %v591_v16  ;;  %v638_v52 = vrot.slane %v2107_v2, %v2138_v13  ;;  %v2306_v44 = vld [vmem:[%s2132_s7 + $0x50] sm:$0xff] }
  0xb8   : >> { %v609_v53 = vsel %vm346_vm1, %v607_v46, %v608_v27  ;;  %v611_v54 = vsel %vm346_vm1, %v608_v27, %v610_v47  ;;  %v620_v55 = vmul.f32 %v2245_v59, %v619_v48  ;;  %v621_v56 = vmul.f32 %v2248_v60, %v619_v48 }
  0xb9   : >> { %v595_v57 = vadd.f32 %v590_v20, %v576_v49  ;;  %v596_v58 = vadd.f32 %v592_v51, %v577_v50  ;;  %v622_v61 = vmul.f32 %v2262_v30, %v619_v48  ;;  %v639_v62 = vmul.f32 %v2245_v59, %v638_v52 }
  0xba   : >> { %v626_v63 = vrot.slane %v620_v55, 3  ;;  %v627_v9 = vrot.slane %v621_v56, 3  ;;  %v640_v10 = vmul.f32 %v2248_v60, %v638_v52  ;;  %v641_v21 = vmul.f32 %v2262_v30, %v638_v52 }
  0xbb   : >> { %v614_v22 = vadd.f32 %v609_v53, %v595_v57  ;;  %v615_v23 = vadd.f32 %v611_v54, %v596_v58  ;;  %v629_v24 = vrot.slane %v622_v61, 3  ;;  %v645_v29 = vrot.slane %v639_v62, 4  ;;  %v2312_v53 = vld [vmem:[%s2132_s7 + $0x58] sm:$0xff] }
  0xbc   : >> { %v628_v31 = vsel %vm366_vm2, %v626_v63, %v627_v9  ;;  %v646_v25 = vrot.slane %v640_v10, 4  ;;  %v648_v32 = vrot.slane %v641_v21, 4  ;;  %v657_v33 = vrot.slane %v2107_v2, %v2140_v14 }
  0xbd   : >> { %v630_v34 = vsel %vm366_vm2, %v627_v9, %v629_v24  ;;  %v633_v35 = vadd.f32 %v628_v31, %v614_v22  ;;  %v676_v36 = vrot.slane %v2107_v2, %v2146_v17  ;;  %v701_v37 = vrot.slane %v2107_v2, %v2148_v18 }
  0xbe   : >> { %v634_v39 = vadd.f32 %v630_v34, %v615_v23  ;;  %v647_v38 = vsel %vm386_vm3, %v645_v29, %v646_v25  ;;  %v649_v26 = vsel %vm386_vm3, %v646_v25, %v648_v32  ;;  %v658_v45 = vmul.f32 %v2245_v59, %v657_v33 }
  0xbf   : >> { %v652_v40 = vadd.f32 %v647_v38, %v633_v35  ;;  %v659_v41 = vmul.f32 %v2248_v60, %v657_v33  ;;  %v660_v42 = vmul.f32 %v2262_v30, %v657_v33  ;;  %v677_v43 = vmul.f32 %v2245_v59, %v676_v36 }
  0xc0   : >> { %v653_v16 = vadd.f32 %v649_v26, %v634_v39  ;;  %v664_v46 = vrot.slane %v658_v45, 5  ;;  %v678_v20 = vmul.f32 %v2248_v60, %v676_v36  ;;  %v679_v27 = vmul.f32 %v2262_v30, %v676_v36 }
  0xc1   : >> { %v665_v47 = vrot.slane %v659_v41, 5  ;;  %v667_v48 = vrot.slane %v660_v42, 5  ;;  %v683_v49 = vrot.slane %v677_v43, 6  ;;  %v702_v50 = vmul.f32 %v2300_v15, %v701_v37 }
  0xc2   : >> { %v684_v51 = vrot.slane %v678_v20, 6  ;;  %v686_v52 = vrot.slane %v679_v27, 6  ;;  %v703_v54 = vmul.f32 %v2306_v44, %v701_v37  ;;  %v709_v59 = vrot.slane %v2107_v2, %v2150_v19 }
  0xc3   : >> { %v666_v55 = vsel %vm406_vm4, %v664_v46, %v665_v47  ;;  %v668_v60 = vsel %vm406_vm4, %v665_v47, %v667_v48  ;;  %v728_v30 = vrot.slane %v2107_v2, %v2169_v28  ;;  %v747_v56 = vrot.slane %v2109_v3, %v2134_v11 }
  0xc4   : >> { %v671_v57 = vadd.f32 %v666_v55, %v652_v40  ;;  %v672_v58 = vadd.f32 %v668_v60, %v653_v16  ;;  %v685_v61 = vsel %vm426_vm5, %v683_v49, %v684_v51  ;;  %v687_v62 = vsel %vm426_vm5, %v684_v51, %v686_v52 }
  0xc5   : >> { %v710_v63 = vmul.f32 %v2300_v15, %v709_v59  ;;  %v711_v9 = vmul.f32 %v2306_v44, %v709_v59  ;;  %v712_v10 = vmul.f32 %v2312_v53, %v709_v59  ;;  %v729_v21 = vmul.f32 %v2300_v15, %v728_v30 }
  0xc6   : >> { %v690_v22 = vadd.f32 %v685_v61, %v671_v57  ;;  %v691_v23 = vadd.f32 %v687_v62, %v672_v58  ;;  %v730_v24 = vmul.f32 %v2306_v44, %v728_v30  ;;  %v731_v29 = vmul.f32 %v2312_v53, %v728_v30 }
  0xc7   : >> { %v716_v31 = vrot.slane %v710_v63, 1  ;;  %v717_v25 = vrot.slane %v711_v9, 1  ;;  %v719_v32 = vrot.slane %v712_v10, 1  ;;  %v735_v33 = vrot.slane %v729_v21, 2 }
  0xc8   : >> { %v704_v34 = vadd.f32 %v702_v50, %v690_v22  ;;  %v705_v35 = vadd.f32 %v703_v54, %v691_v23  ;;  %v736_v36 = vrot.slane %v730_v24, 2  ;;  %v738_v37 = vrot.slane %v731_v29, 2 }
  0xc9   : >> { %v718_v39 = vsel %vm326_vm0, %v716_v31, %v717_v25  ;;  %v720_v38 = vsel %vm326_vm0, %v717_v25, %v719_v32  ;;  %v748_v26 = vmul.f32 %v2300_v15, %v747_v56  ;;  %v749_v45 = vmul.f32 %v2306_v44, %v747_v56 }
  0xca   : >> { %v723_v40 = vadd.f32 %v718_v39, %v704_v34  ;;  %v724_v41 = vadd.f32 %v720_v38, %v705_v35  ;;  %v737_v42 = vsel %vm346_vm1, %v735_v33, %v736_v36  ;;  %v739_v43 = vsel %vm346_vm1, %v736_v36, %v738_v37  ;;  %v1466_v39 = vld [vmem:[%s2132_s7 + $0x60] sm:$0xff]  ;;  %v1467_v38 = vld [vmem:[%s2132_s7 + $0x68] sm:$0xff] }
  0xcb   : >> { %v750_v16 = vmul.f32 %v2312_v53, %v747_v56  ;;  %v754_v46 = vrot.slane %v748_v26, 3  ;;  %v755_v20 = vrot.slane %v749_v45, 3  ;;  %v766_v27 = vrot.slane %v2109_v3, %v2136_v12 }
  0xcc   : >> { %v742_v47 = vadd.f32 %v737_v42, %v723_v40  ;;  %v743_v48 = vadd.f32 %v739_v43, %v724_v41  ;;  %v785_v49 = vrot.slane %v2109_v3, %v2138_v13  ;;  %v804_v50 = vrot.slane %v2109_v3, %v2140_v14  ;;  %v1468_v40 = vld [vmem:[%s2132_s7 + $0x70] sm:$0xff] }
  0xcd   : >> { %v756_v51 = vsel %vm366_vm2, %v754_v46, %v755_v20  ;;  %v757_v52 = vrot.slane %v750_v16, 3  ;;  %v767_v54 = vmul.f32 %v2300_v15, %v766_v27  ;;  %v768_v59 = vmul.f32 %v2306_v44, %v766_v27 }
  0xce   : >> { %v761_v55 = vadd.f32 %v756_v51, %v742_v47  ;;  %v769_v60 = vmul.f32 %v2312_v53, %v766_v27  ;;  %v786_v30 = vmul.f32 %v2300_v15, %v785_v49  ;;  %v787_v56 = vmul.f32 %v2306_v44, %v785_v49 }
  0xcf   : >> { %v758_v57 = vsel %vm366_vm2, %v755_v20, %v757_v52  ;;  %v773_v58 = vrot.slane %v767_v54, 4  ;;  %v774_v61 = vrot.slane %v768_v59, 4  ;;  %v788_v62 = vmul.f32 %v2312_v53, %v785_v49 }
  0xd0   : >> { %v762_v63 = vadd.f32 %v758_v57, %v743_v48  ;;  %v776_v9 = vrot.slane %v769_v60, 4  ;;  %v792_v10 = vrot.slane %v786_v30, 5  ;;  %v793_v21 = vrot.slane %v787_v56, 5 }
  0xd1   : >> { %v775_v22 = vsel %vm386_vm3, %v773_v58, %v774_v61  ;;  %v795_v23 = vrot.slane %v788_v62, 5  ;;  %v805_v24 = vmul.f32 %v2300_v15, %v804_v50  ;;  %v806_v29 = vmul.f32 %v2306_v44, %v804_v50 }
  0xd2   : >> { %v777_v31 = vsel %vm386_vm3, %v774_v61, %v776_v9  ;;  %v780_v25 = vadd.f32 %v775_v22, %v761_v55  ;;  %v794_v32 = vsel %vm406_vm4, %v792_v10, %v793_v21  ;;  %v807_v33 = vmul.f32 %v2312_v53, %v804_v50 }
  0xd3   : >> { %v781_v34 = vadd.f32 %v777_v31, %v762_v63  ;;  %v796_v35 = vsel %vm406_vm4, %v793_v21, %v795_v23  ;;  %v811_v36 = vrot.slane %v805_v24, 6  ;;  %v812_v37 = vrot.slane %v806_v29, 6 }
  0xd4   : >> { %v799_v26 = vadd.f32 %v794_v32, %v780_v25  ;;  %v814_v45 = vrot.slane %v807_v33, 6  ;;  %v829_v15 = vrot.slane %v2109_v3, %v2146_v17  ;;  %v837_v44 = vrot.slane %v2109_v3, %v2148_v18 }
  0xd5   : >> { %v800_v41 = vadd.f32 %v796_v35, %v781_v34  ;;  %v813_v42 = vsel %vm426_vm5, %v811_v36, %v812_v37  ;;  %v856_v53 = vrot.slane %v2109_v3, %v2150_v19  ;;  %v875_v43 = vrot.slane %v2109_v3, %v2169_v28 }
  0xd6   : >> { %v815_v16 = vsel %vm426_vm5, %v812_v37, %v814_v45  ;;  %v818_v46 = vadd.f32 %v813_v42, %v799_v26  ;;  %v830_v20 = vmul.f32 %v1466_v39, %v829_v15  ;;  %v831_v27 = vmul.f32 %v1467_v38, %v829_v15 }
  0xd7   : >> { %v819_v47 = vadd.f32 %v815_v16, %v800_v41  ;;  %v838_v48 = vmul.f32 %v1466_v39, %v837_v44  ;;  %v839_v49 = vmul.f32 %v1467_v38, %v837_v44  ;;  %v840_v50 = vmul.f32 %v1468_v40, %v837_v44 }
  0xd8   : >> { %v832_v51 = vadd.f32 %v830_v20, %v818_v46  ;;  %v857_v52 = vmul.f32 %v1466_v39, %v856_v53  ;;  %v858_v54 = vmul.f32 %v1467_v38, %v856_v53  ;;  %v859_v59 = vmul.f32 %v1468_v40, %v856_v53 }
  0xd9   : >> { %v833_v55 = vadd.f32 %v831_v27, %v819_v47  ;;  %v844_v60 = vrot.slane %v838_v48, 1  ;;  %v845_v30 = vrot.slane %v839_v49, 1  ;;  %v847_v56 = vrot.slane %v840_v50, 1 }
  0xda   : >> { %v863_v57 = vrot.slane %v857_v52, 2  ;;  %v864_v58 = vrot.slane %v858_v54, 2  ;;  %v866_v61 = vrot.slane %v859_v59, 2  ;;  %v876_v62 = vmul.f32 %v1466_v39, %v875_v43 }
  0xdb   : >> { %v846_v63 = vsel %vm326_vm0, %v844_v60, %v845_v30  ;;  %v848_v9 = vsel %vm326_vm0, %v845_v30, %v847_v56  ;;  %v877_v10 = vmul.f32 %v1467_v38, %v875_v43  ;;  %v878_v21 = vmul.f32 %v1468_v40, %v875_v43 }
  0xdc   : >> { %v851_v22 = vadd.f32 %v846_v63, %v832_v51  ;;  %v852_v23 = vadd.f32 %v848_v9, %v833_v55  ;;  %v865_v24 = vsel %vm346_vm1, %v863_v57, %v864_v58  ;;  %v867_v29 = vsel %vm346_vm1, %v864_v58, %v866_v61  ;;  %v2389_v63 = vld [vmem:[%s2132_s7 + $0x78] sm:$0xff] }
  0xdd   : >> { %v882_v31 = vrot.slane %v876_v62, 3  ;;  %v883_v25 = vrot.slane %v877_v10, 3  ;;  %v885_v32 = vrot.slane %v878_v21, 3  ;;  %v894_v33 = vrot.slane %v2111_v4, %v2134_v11  ;;  %v2396_v10 = vld [vmem:[%s2132_s7 + $0x88] sm:$0xff] }
  0xde   : >> { %v870_v34 = vadd.f32 %v865_v24, %v851_v22  ;;  %v871_v35 = vadd.f32 %v867_v29, %v852_v23  ;;  %v913_v36 = vrot.slane %v2111_v4, %v2136_v12  ;;  %v932_v37 = vrot.slane %v2111_v4, %v2138_v13 }
  0xdf   : >> { %v884_v26 = vsel %vm366_vm2, %v882_v31, %v883_v25  ;;  %v886_v45 = vsel %vm366_vm2, %v883_v25, %v885_v32  ;;  %v895_v15 = vmul.f32 %v1466_v39, %v894_v33  ;;  %v896_v44 = vmul.f32 %v1467_v38, %v894_v33 }
  0xe0   : >> { %v889_v41 = vadd.f32 %v884_v26, %v870_v34  ;;  %v890_v42 = vadd.f32 %v886_v45, %v871_v35  ;;  %v897_v53 = vmul.f32 %v1468_v40, %v894_v33  ;;  %v914_v43 = vmul.f32 %v1466_v39, %v913_v36 }
  0xe1   : >> { %v901_v16 = vrot.slane %v895_v15, 4  ;;  %v902_v46 = vrot.slane %v896_v44, 4  ;;  %v915_v20 = vmul.f32 %v1467_v38, %v913_v36  ;;  %v916_v27 = vmul.f32 %v1468_v40, %v913_v36 }
  0xe2   : >> { %v904_v47 = vrot.slane %v897_v53, 4  ;;  %v920_v48 = vrot.slane %v914_v43, 5  ;;  %v933_v49 = vmul.f32 %v1466_v39, %v932_v37  ;;  %v934_v50 = vmul.f32 %v1467_v38, %v932_v37  ;;  %v2392_v39 = vld [vmem:[%s2132_s7 + $0x80] sm:$0xff] }
  0xe3   : >> { %v903_v51 = vsel %vm386_vm3, %v901_v16, %v902_v46  ;;  %v921_v52 = vrot.slane %v915_v20, 5  ;;  %v923_v54 = vrot.slane %v916_v27, 5  ;;  %v935_v59 = vmul.f32 %v1468_v40, %v932_v37 }
  0xe4   : >> { %v905_v55 = vsel %vm386_vm3, %v902_v46, %v904_v47  ;;  %v908_v60 = vadd.f32 %v903_v51, %v889_v41  ;;  %v939_v30 = vrot.slane %v933_v49, 6  ;;  %v940_v56 = vrot.slane %v934_v50, 6 }
  0xe5   : >> { %v909_v57 = vadd.f32 %v905_v55, %v890_v42  ;;  %v922_v58 = vsel %vm406_vm4, %v920_v48, %v921_v52  ;;  %v924_v61 = vsel %vm406_vm4, %v921_v52, %v923_v54  ;;  %v942_v62 = vrot.slane %v935_v59, 6 }
  0xe6   : >> { %v927_v38 = vadd.f32 %v922_v58, %v908_v60  ;;  %v941_v9 = vsel %vm426_vm5, %v939_v30, %v940_v56  ;;  %v957_v40 = vrot.slane %v2111_v4, %v2140_v14  ;;  %v965_v21 = vrot.slane %v2111_v4, %v2146_v17 }
  0xe7   : >> { %v928_v22 = vadd.f32 %v924_v61, %v909_v57  ;;  %v943_v23 = vsel %vm426_vm5, %v940_v56, %v942_v62  ;;  %v984_v24 = vrot.slane %v2111_v4, %v2148_v18  ;;  %v1003_v29 = vrot.slane %v2111_v4, %v2150_v19 }
  0xe8   : >> { %v946_v31 = vadd.f32 %v941_v9, %v927_v38  ;;  %v958_v25 = vmul.f32 %v2389_v63, %v957_v40  ;;  %v959_v32 = vmul.f32 %v2392_v39, %v957_v40  ;;  %v966_v33 = vmul.f32 %v2389_v63, %v965_v21 }
  0xe9   : >> { %v947_v34 = vadd.f32 %v943_v23, %v928_v22  ;;  %v967_v35 = vmul.f32 %v2392_v39, %v965_v21  ;;  %v968_v36 = vmul.f32 %v2396_v10, %v965_v21  ;;  %v985_v37 = vmul.f32 %v2389_v63, %v984_v24 }
  0xea   : >> { %v960_v26 = vadd.f32 %v958_v25, %v946_v31  ;;  %v972_v45 = vrot.slane %v966_v33, 1  ;;  %v986_v15 = vmul.f32 %v2392_v39, %v984_v24  ;;  %v987_v44 = vmul.f32 %v2396_v10, %v984_v24 }
  0xeb   : >> { %v961_v41 = vadd.f32 %v959_v32, %v947_v34  ;;  %v973_v42 = vrot.slane %v967_v35, 1  ;;  %v975_v53 = vrot.slane %v968_v36, 1  ;;  %v991_v43 = vrot.slane %v985_v37, 2  ;;  %v2439_v36 = vld [vmem:[%s2132_s7 + $0x90] sm:$0xff] }
  0xec   : >> { %v992_v16 = vrot.slane %v986_v15, 2  ;;  %v994_v46 = vrot.slane %v987_v44, 2  ;;  %v1004_v20 = vmul.f32 %v2389_v63, %v1003_v29  ;;  %v1005_v27 = vmul.f32 %v2392_v39, %v1003_v29 }
  0xed   : >> { %v974_v47 = vsel %vm326_vm0, %v972_v45, %v973_v42  ;;  %v976_v48 = vsel %vm326_vm0, %v973_v42, %v975_v53  ;;  %v1006_v49 = vmul.f32 %v2396_v10, %v1003_v29  ;;  %v1022_v50 = vrot.slane %v2111_v4, %v2169_v28 }
  0xee   : >> { %v979_v51 = vadd.f32 %v974_v47, %v960_v26  ;;  %v980_v52 = vadd.f32 %v976_v48, %v961_v41  ;;  %v993_v54 = vsel %vm346_vm1, %v991_v43, %v992_v16  ;;  %v995_v59 = vsel %vm346_vm1, %v992_v16, %v994_v46  ;;  %v2452_v16 = vld [vmem:[%s2132_s7 + $0xa0] sm:$0xff] }
  0xef   : >> { %v1010_v55 = vrot.slane %v1004_v20, 3  ;;  %v1011_v60 = vrot.slane %v1005_v27, 3  ;;  %v1013_v30 = vrot.slane %v1006_v49, 3  ;;  %v1023_v56 = vmul.f32 %v2389_v63, %v1022_v50 }
  0xf0   : >> { %v998_v57 = vadd.f32 %v993_v54, %v979_v51  ;;  %v999_v58 = vadd.f32 %v995_v59, %v980_v52  ;;  %v1024_v61 = vmul.f32 %v2392_v39, %v1022_v50  ;;  %v1025_v62 = vmul.f32 %v2396_v10, %v1022_v50 }
  0xf1   : >> { %v1012_v38 = vsel %vm366_vm2, %v1010_v55, %v1011_v60  ;;  %v1014_v9 = vsel %vm366_vm2, %v1011_v60, %v1013_v30  ;;  %v1029_v40 = vrot.slane %v1023_v56, 4  ;;  %v1041_v21 = vrot.slane %v2113_v5, %v2134_v11  ;;  %v2442_v11 = vld [vmem:[%s2132_s7 + $0x98] sm:$0xff] }
  0xf2   : >> { %v1017_v22 = vadd.f32 %v1012_v38, %v998_v57  ;;  %v1018_v23 = vadd.f32 %v1014_v9, %v999_v58  ;;  %v1030_v24 = vrot.slane %v1024_v61, 4  ;;  %v1032_v29 = vrot.slane %v1025_v62, 4 }
  0xf3   : >> { %v1042_v31 = vmul.f32 %v2389_v63, %v1041_v21  ;;  %v1043_v25 = vmul.f32 %v2392_v39, %v1041_v21  ;;  %v1044_v32 = vmul.f32 %v2396_v10, %v1041_v21  ;;  %v1060_v33 = vrot.slane %v2113_v5, %v2136_v12 }
  0xf4   : >> { %v1031_v34 = vsel %vm386_vm3, %v1029_v40, %v1030_v24  ;;  %v1033_v35 = vsel %vm386_vm3, %v1030_v24, %v1032_v29  ;;  %v1085_v37 = vrot.slane %v2113_v5, %v2138_v13  ;;  %v1093_v26 = vrot.slane %v2113_v5, %v2140_v14 }
  0xf5   : >> { %v1036_v45 = vadd.f32 %v1031_v34, %v1017_v22  ;;  %v1037_v15 = vadd.f32 %v1033_v35, %v1018_v23  ;;  %v1048_v44 = vrot.slane %v1042_v31, 5  ;;  %v1049_v41 = vrot.slane %v1043_v25, 5 }
  0xf6   : >> { %v1051_v42 = vrot.slane %v1044_v32, 5  ;;  %v1061_v12 = vmul.f32 %v2389_v63, %v1060_v33  ;;  %v1062_v53 = vmul.f32 %v2392_v39, %v1060_v33  ;;  %v1063_v43 = vmul.f32 %v2396_v10, %v1060_v33 }
  0xf7   : >> { %v1050_v46 = vsel %vm406_vm4, %v1048_v44, %v1049_v41  ;;  %v1086_v13 = vmul.f32 %v2439_v36, %v1085_v37  ;;  %v1087_v20 = vmul.f32 %v2442_v11, %v1085_v37  ;;  %v1094_v14 = vmul.f32 %v2439_v36, %v1093_v26 }
  0xf8   : >> { %v1052_v27 = vsel %vm406_vm4, %v1049_v41, %v1051_v42  ;;  %v1055_v47 = vadd.f32 %v1050_v46, %v1036_v45  ;;  %v1067_v48 = vrot.slane %v1061_v12, 6  ;;  %v1068_v49 = vrot.slane %v1062_v53, 6 }
  0xf9   : >> { %v1056_v63 = vadd.f32 %v1052_v27, %v1037_v15  ;;  %v1070_v50 = vrot.slane %v1063_v43, 6  ;;  %v1095_v39 = vmul.f32 %v2442_v11, %v1093_v26  ;;  %v1096_v10 = vmul.f32 %v2452_v16, %v1093_v26 }
  0xfa   : >> { %v1069_v51 = vsel %vm426_vm5, %v1067_v48, %v1068_v49  ;;  %v1100_v52 = vrot.slane %v1094_v14, 1  ;;  %v1112_v54 = vrot.slane %v2113_v5, %v2146_v17  ;;  %v1131_v59 = vrot.slane %v2113_v5, %v2148_v18 }
  0xfb   : >> { %v1071_v55 = vsel %vm426_vm5, %v1068_v49, %v1070_v50  ;;  %v1074_v60 = vadd.f32 %v1069_v51, %v1055_v47  ;;  %v1101_v30 = vrot.slane %v1095_v39, 1  ;;  %v1103_v56 = vrot.slane %v1096_v10, 1 }
  0xfc   : >> { %v1075_v57 = vadd.f32 %v1071_v55, %v1056_v63  ;;  %v1113_v58 = vmul.f32 %v2439_v36, %v1112_v54  ;;  %v1114_v61 = vmul.f32 %v2442_v11, %v1112_v54  ;;  %v1115_v62 = vmul.f32 %v2452_v16, %v1112_v54 }
  0xfd   : >> { %v1088_v38 = vadd.f32 %v1086_v13, %v1074_v60  ;;  %v1102_v9 = vsel %vm326_vm0, %v1100_v52, %v1101_v30  ;;  %v1104_v17 = vsel %vm326_vm0, %v1101_v30, %v1103_v56  ;;  %v1132_v40 = vmul.f32 %v2439_v36, %v1131_v59 }
  0xfe   : >> { %v1089_v18 = vadd.f32 %v1087_v20, %v1075_v57  ;;  %v1119_v21 = vrot.slane %v1113_v58, 2  ;;  %v1120_v22 = vrot.slane %v1114_v61, 2  ;;  %v1122_v23 = vrot.slane %v1115_v62, 2 }
  0xff   : >> { %v1107_v24 = vadd.f32 %v1102_v9, %v1088_v38  ;;  %v1133_v29 = vmul.f32 %v2442_v11, %v1131_v59  ;;  %v1134_v31 = vmul.f32 %v2452_v16, %v1131_v59  ;;  %v1138_v25 = vrot.slane %v1132_v40, 3 }
 0x100   : >> { %v1108_v32 = vadd.f32 %v1104_v17, %v1089_v18  ;;  %v1121_v33 = vsel %vm346_vm1, %v1119_v21, %v1120_v22  ;;  %v1123_v34 = vsel %vm346_vm1, %v1120_v22, %v1122_v23  ;;  %v1150_v35 = vrot.slane %v2113_v5, %v2150_v19  ;;  %v1215_v23 = vld [vmem:[%s1214_s21] sm:$0x1] }
 0x101   : >> { %v1126_v37 = vadd.f32 %v1121_v33, %v1107_v24  ;;  %v1139_v26 = vrot.slane %v1133_v29, 3  ;;  %v1141_v45 = vrot.slane %v1134_v31, 3  ;;  %v1169_v15 = vrot.slane %v2113_v5, %v2169_v28 }
 0x102   : >> { %v1127_v44 = vadd.f32 %v1123_v34, %v1108_v32  ;;  %v1151_v41 = vmul.f32 %v2439_v36, %v1150_v35  ;;  %v1152_v42 = vmul.f32 %v2442_v11, %v1150_v35  ;;  %v1153_v12 = vmul.f32 %v2452_v16, %v1150_v35 }
 0x103   : >> { %v1140_v53 = vsel %vm366_vm2, %v1138_v25, %v1139_v26  ;;  %v1142_v43 = vsel %vm366_vm2, %v1139_v26, %v1141_v45  ;;  %v1170_v46 = vmul.f32 %v2439_v36, %v1169_v15  ;;  %v1171_v19 = vmul.f32 %v2442_v11, %v1169_v15 }
 0x104   : >> { %v1145_v13 = vadd.f32 %v1140_v53, %v1126_v37  ;;  %v1146_v20 = vadd.f32 %v1142_v43, %v1127_v44  ;;  %v1157_v14 = vrot.slane %v1151_v41, 4  ;;  %v1158_v27 = vrot.slane %v1152_v42, 4 }
 0x105   : >> { %v1160_v28 = vrot.slane %v1153_v12, 4  ;;  %v1172_v47 = vmul.f32 %v2452_v16, %v1169_v15  ;;  %v1176_v48 = vrot.slane %v1170_v46, 5  ;;  %v1177_v49 = vrot.slane %v1171_v19, 5 }
 0x106   : >> { %v1159_v63 = vsel %vm386_vm3, %v1157_v14, %v1158_v27  ;;  %v1189_v50 = vmul.f32 %v2115_v6, %v2439_v36  ;;  %v1190_v39 = vmul.f32 %v2115_v6, %v2442_v11  ;;  %v1191_v10 = vmul.f32 %v2115_v6, %v2452_v16 }
 0x107   : >> { %v1161_v51 = vsel %vm386_vm3, %v1158_v27, %v1160_v28  ;;  %v1164_v52 = vadd.f32 %v1159_v63, %v1145_v13  ;;  %v1178_v54 = vsel %vm406_vm4, %v1176_v48, %v1177_v49  ;;  %v1179_v59 = vrot.slane %v1172_v47, 5 }
 0x108   : >> { %v1165_v55 = vadd.f32 %v1161_v51, %v1146_v20  ;;  %v1195_v60 = vrot.slane %v1189_v50, 6  ;;  %v1196_v30 = vrot.slane %v1190_v39, 6  ;;  %v1198_v56 = vrot.slane %v1191_v10, 6 }
 0x109   : >> { %v1180_v57 = vsel %vm406_vm4, %v1177_v49, %v1179_v59  ;;  %v1183_v58 = vadd.f32 %v1178_v54, %v1164_v52  ;;  %v1839_v16 = vmov 0.0|0.0   ;;  %v1841_v9 = vmov 0.0  }
 0x10a   : >> { %v1184_v36 = vadd.f32 %v1180_v57, %v1165_v55  ;;  %v1197_v11 = vsel %vm426_vm5, %v1195_v60, %v1196_v30  ;;  %v1199_v61 = vsel %vm426_vm5, %v1196_v30, %v1198_v56  ;;  %1491 = vmatprep.subr.bf16.mxu0 %v1839_v16  ;;  %1488 = vmatprep.mubr.msk.f32.mxu0 %vm1840_vm6, %v1841_v9 }
 0x10b   : >> { %v1202_v62 = vadd.f32 %v1197_v11, %v1183_v58 }
 0x10c   : >> { %v1203_v38 = vadd.f32 %v1199_v61, %v1184_v36 }
 0x10d   : >> { %v1210_v17 = vadd.f32 %v2117_v7, %v1202_v62 }
 0x10e   : >> { %v1211_v40 = vadd.f32 %v2117_v7, %v1203_v38 }
 0x10f   : >> { %v1212_v18 = vmax.f32 %v1210_v17, 0.0 }
 0x110   : >> { %v1213_v21 = vmax.f32 %v1211_v40, 0.0 }
 0x112   : >> { %v1492_v22 = vpack.c.bf16 %v1213_v21, %v1212_v18 }
 0x114   : >> { %1493 = vmatpush3.bf16.msra.mxu0 %v1492_v22 }
 0x117   : >> { %1489 = vmatmul.mubr.msk.f32.vlgmr.msra.gmra.mrb[0].mxu0 %vm1216_vm7, %v1215_v23 }
 0x1e7   : > { %300 = sbr.rel (!%p298_p13) target bundleno = 137 (0x89), region = 110 }
 0x1ea   : >> { %v1286_v24 = vpop.f32.mrb[0].mxu0 }
 0x1eb   : >> { %v1490_v29 = vpop.f32.mrb[1].mxu0  ;;  %v1290_v31 = vadd.f32 %v1827_v8, %v1286_v24  }
 0x1ed   : >> { %v2587_v8 = vmov %v1290_v31  ;;  %1291 = vst [vmem:[%s287_s25] sm:$0x1] (%p298_p13), %v1290_v31 }
 0x1ee   : > { %1738 = shalt.err (!%p1735_p4)
}
 0x1ef   : > { %s1739_s18 = scalar_lea.hbm %s2516_s11, 16  ;;  %s1743_s25 = scalar_lea.hbm %s2565_s4, 32 }
 0x1f0   : > { %p1740_p2 = scmp.ne.s32.totalorder %s2516_s11, %s1739_s18  ;;  %p1744_p1 = scmp.lt.u32.totalorder %s2516_s11, %s2565_s4 }
 0x1f1   : > { %p1745_p11 = scmp.lt.u32.totalorder %s1743_s25, %s1739_s18  ;;  %p1747_p6 = scmp.lt.u32.totalorder %s1739_s18, %s2516_s11 }
 0x1f2   : > { %p1741_p8 = pnand %p1740_p2, %p2026_p10 }
 0x1f3   : > { %p1746_p13 = por %p1745_p11, %p1744_p1 }
 0x1f4   : > { %p1742_p12 = pneg %p1741_p8 }
 0x1f5   : > { %p1748_p3 = por %p1747_p6, %p1746_p13 }
 0x1f7   : > { %p1749_p5 = pnand %p1748_p3, %p1742_p12 }
 0x1f9   : > { %1752 = shalt.err (!%p1749_p5)
}
 0x1fa   : > { %1511 = dma.vmem_to_hbm [thread:$0]  (%p2026_p10), %s1307_s8, 16, %s2516_s11, %s1293_s9  }
 0x1fb PF: > { %s2588_s7 = sld [smem:[#allocation15_spill]]  ;;  %s1318_s21 = sand.u32 1, %s1803_s15  }
 0x1fc   : > { %p2590_p9 = scmp.ge.s32.totalorder %s1823_s20, 2  ;;  %s1319_s29 = scalar_lea.sflag [#allocation4], %s1318_s21 }
 0x201   : > { %p2589_p7 = scmp.ne.s32.totalorder %s2588_s7, 0 }
 0x203   : > { %p1528_p0 = pnand %p2590_p9, %p2589_p7 }
 0x205   : > { %1798 = dma.done.wait (!%p1528_p0), %s1319_s29, 16  }
 0x206   : > { %1800 = vsyncadd (!%p1528_p0), %s1319_s29, 4294967280  ;;  %s22_s20 = sadd.s32 1, %s1823_s20   ;;  %s2591_s15 = smov %s1807_s16 }
 0x207   : > { %p19_p4 = scmp.ge.s32.totalorder %s22_s20, 4   ;;  %s2592_s16 = smov %s1811_s17 }
 0x208   : > { %s2593_s17 = smov %s2042_s24  ;;  %s2594_s18 = smov %s1819_s19 }
 0x209   : > { %s2595_s19 = smov %s2597_s30  ;;  %21 = sbr.rel (!%p19_p4) target bundleno = 8 (0x8), region = 121 }
 0x210   :  { %1323 = vsyncpa [#allocation3], 1 }
 0x211   :  { %1325 = vsyncpa [#allocation3 + $0x1], 1 }
 0x212   :  { %1326 = vsyncpa [#allocation6], 1 }
 0x213   :  { %1327 = vsyncpa [#allocation9], 1 }
 0x214   :  { %1328 = vsyncpa [#allocation4], 1 }
 0x215   :  { %1330 = vsyncpa [#allocation4 + $0x1], 1 }

// kernel: clfe_block.4
= control target key start
LH: loop header
LB: loop body
LE: loop exit
PB: predicated region body
PF: predicated region fallthrough
CT: control target
= control target key end

     0   :  { %s3236_s0 = inlined_call_operand.hbm [shape: f32[2,22,24,128], index: 0, kind: input, shape index: {}]   ;;  %s3237_s1 = inlined_call_operand.hbm [shape: f32[2,1,128], index: 1, kind: input, shape index: {}]   ;;  %s3238_s2 = inlined_call_operand.hbm [shape: f32[49,128], index: 2, kind: input, shape index: {}]   ;;  %s3239_s3 = inlined_call_operand.hbm [shape: f32[1,128], index: 3, kind: input, shape index: {}]   ;;  %s3240_s4 = inlined_call_operand.hbm [shape: f32[2,16,16,128], index: 4, kind: output, shape index: {0}]   ;;  %s3241_s5 = inlined_call_operand.hbm [shape: f32[2,1,128], index: 5, kind: output, shape index: {1}]   ;;  %s3242_s6 = inlined_call_operand.hbm [shape: f32[2,1,128], index: 6, kind: output, shape index: {2}]  }
   0x1   :  { %3251 = sst [smem:[#allocation22_spill]] %s3236_s0 }
   0x2   :  { %3252 = sst [smem:[#allocation23_spill]] %s3238_s2 }
   0x3   :  { %3253 = sst [smem:[#allocation24_spill]] %s3239_s3 }
   0x4   :  { %12 = vsyncpa [#allocation3], 0 }
   0x5   :  { %14 = vsyncpa [#allocation3 + $0x1], 0 }
   0x6   :  { %15 = vsyncpa [#allocation6], 0 }
   0x7   :  { %17 = vsyncpa [#allocation6 + $0x1], 0 }
   0x8   :  { %18 = vsyncpa [#allocation9], 0 }
   0x9   :  { %19 = vsyncpa [#allocation4], 0 }
   0xa   :  { %21 = vsyncpa [#allocation4 + $0x1], 0 }
   0xb   :  { %22 = vsyncpa [#allocation12], 0 }
   0xc   :  { %24 = vsyncpa [#allocation12 + $0x1], 0  ;;  %s2392_s21 = smov 0   ;;  %s2394_s22 = smov 0  }
   0xd   :  { %s2396_s23 = smov 0   ;;  %s2398_s24 = smov 0  }
   0xe   :  { %s2400_s25 = smov 0   ;;  %s2402_s26 = smov 0  }
   0xf LB: > { %s2423_s27 = sadd.s32 4294967295, %s2320_s26   ;;  %s3244_s28 = sadd.s32 4294967294, %s2320_s26   ;;  %s2320_s26 = sphi %s2402_s26, %s30_s26   ;;  %s2316_s25 = sphi %s2400_s25, %s3285_s25   ;;  %s2312_s24 = sphi %s2398_s24, %s3284_s24   ;;  %s2308_s23 = sphi %s2396_s23, %s3283_s23   ;;  %s2304_s22 = sphi %s2394_s22, %s3282_s22   ;;  %s2300_s21 = sphi %s2392_s21, %s3281_s21  }
  0x10   : > { %p64_p0 = scmp.ne.s32.totalorder %s2304_s22, %s2300_s21  ;;  %p3243_p1 = scmp.eq.s32.totalorder %s2423_s27, 0 }
  0x11   : > { %p176_p3 = scmp.eq.s32.totalorder %s3244_s28, 1  ;;  %p1821_p5 = scmp.ge.s32.totalorder %s2320_s26, 1 }
  0x12   : > { %p2434_p4 = por %p3243_p1, %p64_p0  ;;  %p239_p7 = scmp.lt.s32.totalorder %s2320_s26, 3 }
  0x13   : > { %p2439_p6 = por %p176_p3, %p64_p0  ;;  %s2338_s8 = smov [#allocation7]  }
  0x14   : > { %s3254_s29 = scalar_select %p2434_p4, 1, 0 }
  0x15   : > { %s3255_s30 = scalar_select %p2439_p6, 1, 0 }
  0x16   : > { %p2444_p8 = pnand %p1821_p5, %p239_p7  ;;  %s253_s9 = sshll.u32 %s2338_s8, 4  ;;  %s2448_s9 = int_to_ptr.vmem [resolvable:$true] %s253_s9 }
  0x17   : > { %s2339_s11 = smov [#allocation8]   ;;  %s3258_s2 = sld [smem:[#allocation23_spill]] }
  0x18   : > { %s3256_s7 = scalar_select %p2444_p8, 1, 0 }
  0x19   : > { %p1910_p9 = pneg %p2444_p8  ;;  %s269_s12 = sshll.u32 %s2339_s11, 4  ;;  %s2459_s12 = int_to_ptr.vmem [resolvable:$true] %s269_s12 }
  0x1b   : > { %p2455_p11 = pnand %p1910_p9, %p3243_p1 }
  0x1d   : > { %s2034_s15 = scalar_lea.hbm %s3258_s2, 896  ;;  %p2036_p13 = pneg %p2455_p11 }
  0x1e   : > { %p2035_p12 = scmp.ne.s32.totalorder %s3258_s2, %s2034_s15  ;;  %p2041_p5 = scmp.lt.u32.totalorder %s2034_s15, %s3258_s2 }
  0x20   : > { %p2037_p0 = pnand %p2036_p13, %p2035_p12 }
  0x22   : > { %p2038_p3 = pneg %p2037_p0 }
  0x24   : > { %p2043_p7 = pnand %p2041_p5, %p2038_p3 }
  0x26   : > { %2046 = shalt.err (!%p2043_p7)
}
  0x27   : > { %s2047_s20 = scalar_lea.vmem %s2448_s9, 896  ;;  %p2055_p2 = scmp.lt.s32.totalorder %s2448_s9, %s2448_s9 }
  0x28   : > { %p2048_p9 = scmp.ne.s32.totalorder %s2448_s9, %s2047_s20  ;;  %p2056_p12 = scmp.lt.s32.totalorder %s2047_s20, %s2047_s20 }
  0x2a   : > { %p2050_p10 = pnand %p2048_p9, %p2036_p13  ;;  %p2057_p0 = por %p2056_p12, %p2055_p2 }
  0x2c   : > { %p2051_p1 = pneg %p2050_p10 }
  0x2e   : > { %p2058_p6 = pnand %p2057_p0, %p2051_p1 }
  0x30   : > { %2061 = shalt.err (!%p2058_p6)
}
  0x31   : > { %s3245_s8 = smov 128   ;;  %s3246_s11 = smov 8  }
  0x32   : > { %1913 = dma.hbm_to_vmem [thread:$0]  (!%p2455_p11), %s3258_s2, 896, %s2448_s9, [#allocation6], %s3245_s8, %s3245_s8, %s3246_s11  }
  0x33   : > { %s3259_s3 = sld [smem:[#allocation24_spill]] }
  0x39   : > { %s2062_s17 = scalar_lea.hbm %s3259_s3, 16 }
  0x3a   : > { %p2063_p1 = scmp.ne.s32.totalorder %s3259_s3, %s2062_s17  ;;  %p2069_p10 = scmp.lt.u32.totalorder %s2062_s17, %s3259_s3 }
  0x3c   : > { %p2065_p2 = pnand %p2063_p1, %p2036_p13 }
  0x3e   : > { %p2066_p6 = pneg %p2065_p2 }
  0x40   : > { %p2071_p3 = pnand %p2069_p10, %p2066_p6 }
  0x42   : > { %2074 = shalt.err (!%p2071_p3)
}
  0x43   : > { %s2075_s9 = scalar_lea.vmem %s2459_s12, 16  ;;  %s2082_s13 = scalar_lea.vmem %s2459_s12, 32 }
  0x44   : > { %p2076_p5 = scmp.ne.s32.totalorder %s2459_s12, %s2075_s9  ;;  %p2083_p12 = scmp.lt.s32.totalorder %s2459_s12, %s2459_s12 }
  0x45   : > { %p2084_p0 = scmp.lt.s32.totalorder %s2082_s13, %s2075_s9 }
  0x46   : > { %p2078_p7 = pnand %p2076_p5, %p2036_p13 }
  0x47   : > { %p2085_p1 = por %p2084_p0, %p2083_p12 }
  0x48   : > { %p2079_p9 = pneg %p2078_p7 }
  0x4a   : > { %p2086_p2 = pnand %p2085_p1, %p2079_p9 }
  0x4c   : > { %2089 = shalt.err (!%p2086_p2)
}
  0x4d   : > { %1916 = dma.hbm_to_vmem [thread:$0]  (!%p2455_p11), %s3259_s3, 16, %s2459_s12, [#allocation9]  }
  0x4e   : > { %s42_s15 = sadd.s32 1, %s2316_s25  ;;  %s51_s16 = sadd.s32 1, %s2308_s23 }
  0x4f   : > { %p44_p13 = scmp.ge.s32.totalorder %s42_s15, 2  ;;  %p58_p6 = scmp.ne.s32.totalorder %s2308_s23, %s2304_s22 }
  0x50   : > { %p59_p10 = scmp.eq.s32.totalorder %s2320_s26, 0  ;;  %p1936_p3 = scmp.lt.s32.totalorder %s2320_s26, 2 }
  0x51   : > { %s3287_s15 = smov (%p44_p13, %s42_s15), 0  ;;  %p3261_p7 = scmp.eq.s32.totalorder %s2423_s27, 1 }
  0x52   : > { %3260 = sst [smem:[#allocation20_spill]] %s3287_s15  ;;  %p60_p5 = por %p59_p10, %p58_p6 }
  0x53   : > { %p2527_p9 = por %p3261_p7, %p58_p6  ;;  %s46_s17 = ssub.s32 %s2316_s25, %s3287_s15 }
  0x54   : > { %s2534_s18 = sand.u32 1, %s2308_s23   ;;  %p49_p11 = scmp.eq.s32.totalorder %s46_s17, 0 }
  0x55   : > { %s3262_s10 = scalar_select %p2527_p9, 1, 0 }
  0x56   : > { %s1889_s12 = smul.u32 528, %s2534_s18  ;;  %p2537_p12 = pnand %p1936_p3, %p60_p5 }
  0x57   : > { %s2542_s20 = scalar_select %p49_p11, %s2308_s23, %s51_s16  }
  0x58   : > { %s1890_s9 = smul.u32 8448, %s2316_s25  ;;  %s284_s13 = scalar_lea.vmem [#allocation2], %s1889_s12 }
  0x59   : > { %3264 = sst [smem:[#allocation21_spill]] %s2542_s20  ;;  %s292_s28 = sshll.u32 %s284_s13, 4  ;;  %s2550_s28 = int_to_ptr.vmem [resolvable:$true] %s292_s28 }
  0x5a   : > { %s3265_s0 = sld [smem:[#allocation22_spill]]  ;;  %s281_s17 = scalar_lea.sflag [#allocation3], %s2534_s18 }
  0x5b   : > { %p2092_p1 = pneg %p2537_p12 }
  0x60   : > { %s2548_s11 = scalar_lea.hbm %s3265_s0, %s1890_s9  ;;  %s2095_s8 = scalar_lea.hbm %s3265_s0, 16896 }
  0x61   : > { %s2090_s2 = scalar_lea.hbm %s2548_s11, 8448  ;;  %p2096_p6 = scmp.lt.u32.totalorder %s2548_s11, %s3265_s0 }
  0x62   : > { %p2091_p0 = scmp.ne.s32.totalorder %s2548_s11, %s2090_s2  ;;  %p2097_p10 = scmp.lt.u32.totalorder %s2095_s8, %s2090_s2 }
  0x63   : > { %p2099_p5 = scmp.lt.u32.totalorder %s2090_s2, %s2548_s11 }
  0x64   : > { %p2093_p2 = pnand %p2092_p1, %p2091_p0  ;;  %p2098_p3 = por %p2097_p10, %p2096_p6 }
  0x66   : > { %p2094_p13 = pneg %p2093_p2  ;;  %p2100_p7 = por %p2099_p5, %p2098_p3 }
  0x68   : > { %p2101_p11 = pnand %p2100_p7, %p2094_p13 }
  0x6a   : > { %2104 = shalt.err (!%p2101_p11)
}
  0x6b   : > { %s2105_s14 = scalar_lea.vmem %s2550_s28, 8448  ;;  %s2342_s16 = smov [#allocation2]  }
  0x6c   : > { %p2106_p0 = scmp.ne.s32.totalorder %s2550_s28, %s2105_s14  ;;  %s2110_s12 = sshll.u32 %s2342_s16, 4  ;;  %s2111_s12 = int_to_ptr.vmem [resolvable:$false] %s2110_s12 }
  0x6d   : > { %s2112_s9 = scalar_lea.vmem %s2111_s12, 16896  ;;  %p2113_p4 = scmp.lt.s32.totalorder %s2550_s28, %s2111_s12 }
  0x6e   : > { %p2108_p2 = pnand %p2106_p0, %p2092_p1  ;;  %p2114_p6 = scmp.lt.s32.totalorder %s2112_s9, %s2105_s14 }
  0x70   : > { %p2109_p9 = pneg %p2108_p2  ;;  %p2115_p10 = por %p2114_p6, %p2113_p4 }
  0x72   : > { %p2116_p3 = pnand %p2115_p10, %p2109_p9 }
  0x74   : > { %2119 = shalt.err (!%p2116_p3)
}
  0x75   : > { %s3266_s2 = smov 8   ;;  %s3267_s8 = smov 128  }
  0x76   : > { %1920 = dma.hbm_to_vmem [thread:$0]  (!%p2537_p12), %s2548_s11, 8448, %s2550_s28, %s281_s17, %s3267_s8, %s3267_s8, %s3266_s2  }
  0x77   : > { %s302_s13 = sand.u32 1, %s2320_s26   ;;  %s1826_s16 = sshll.u32 %s2316_s25, 4 }
  0x78   : > { %s2588_s9 = scalar_lea.hbm %s3237_s1, %s1826_s16  ;;  %s305_s0 = scalar_lea.vmem [#allocation5], %s2534_s18 }
  0x79   : > { %s313_s3 = sshll.u32 %s305_s0, 4  ;;  %s303_s15 = scalar_lea.sflag [#allocation6], %s302_s13  ;;  %s314_s3 = int_to_ptr.vmem [resolvable:$true] %s313_s3 }
  0x7a   : > { %s2120_s20 = scalar_lea.hbm %s2588_s9, 16  ;;  %s2125_s17 = scalar_lea.hbm %s3237_s1, 32 }
  0x7b   : > { %p2121_p4 = scmp.ne.s32.totalorder %s2588_s9, %s2120_s20  ;;  %p2126_p5 = scmp.lt.u32.totalorder %s2588_s9, %s3237_s1 }
  0x7c   : > { %p2127_p7 = scmp.lt.u32.totalorder %s2125_s17, %s2120_s20  ;;  %p2129_p0 = scmp.lt.u32.totalorder %s2120_s20, %s2588_s9 }
  0x7d   : > { %p2123_p9 = pnand %p2121_p4, %p2092_p1 }
  0x7e   : > { %p2128_p11 = por %p2127_p7, %p2126_p5 }
  0x7f   : > { %p2124_p13 = pneg %p2123_p9 }
  0x80   : > { %p2130_p2 = por %p2129_p0, %p2128_p11 }
  0x82   : > { %p2131_p6 = pnand %p2130_p2, %p2124_p13 }
  0x84   : > { %2134 = shalt.err (!%p2131_p6)
}
  0x85   : > { %s2135_s0 = scalar_lea.vmem %s314_s3, 16  ;;  %s2343_s18 = smov [#allocation5]  }
  0x86   : > { %p2136_p10 = scmp.ne.s32.totalorder %s314_s3, %s2135_s0  ;;  %s2140_s13 = sshll.u32 %s2343_s18, 4  ;;  %s2141_s13 = int_to_ptr.vmem [resolvable:$false] %s2140_s13 }
  0x87   : > { %s2142_s16 = scalar_lea.vmem %s2141_s13, 32  ;;  %p2143_p9 = scmp.lt.s32.totalorder %s314_s3, %s2141_s13 }
  0x88   : > { %p2138_p3 = pnand %p2136_p10, %p2092_p1  ;;  %p2144_p8 = scmp.lt.s32.totalorder %s2142_s16, %s2135_s0 }
  0x8a   : > { %p2139_p4 = pneg %p2138_p3  ;;  %p2145_p5 = por %p2144_p8, %p2143_p9 }
  0x8c   : > { %p2146_p7 = pnand %p2145_p5, %p2139_p4 }
  0x8e   : > { %2149 = shalt.err (!%p2146_p7)
}
  0x8f   : > { %1923 = dma.hbm_to_vmem [thread:$0]  (!%p2537_p12), %s2588_s9, 16, %s314_s3, %s303_s15  }
  0x90   : > { %p3268_p13 = scmp.ne.s32.totalorder %s3256_s7, 0 }
  0x91   : > { %s2613_s20 = sand.u32 (!%p3268_p13), 1, %s2304_s22   ;;  %p3269_p8 = scmp.ne.s32.totalorder (!%p3268_p13), %s3254_s29, 0 }
  0x92   : > { %322 = sbr.rel (%p3268_p13) target bundleno = 828 (0x33c), region = 36  ;;  %s325_s12 = scalar_lea.sflag (!%p3268_p13), [#allocation3], %s2613_s20 }
  0x93   : > { %s1891_s14 = smul.u32 (!%p3268_p13), 528, %s2613_s20 }
  0x95   : > { %s2617_s11 = scalar_lea.vmem (!%p3268_p13), [#allocation2], %s1891_s14 }
  0x99   : > { %2275 = dma.done.wait (%p3269_p8), %s325_s12, 8448  }
  0x9a   : > { %2277 = vsyncadd (%p3269_p8), %s325_s12, 4294958848  ;;  %s333_s3 = sand.u32 1, %s2423_s27   ;;  %s336_s15 = scalar_lea.vmem [#allocation5], %s2613_s20 }
  0x9b   : > { %s334_s7 = scalar_lea.sflag [#allocation6], %s333_s3 }
  0x9c   : > { %2279 = dma.done.wait (%p3269_p8), %s334_s7, 16  }
  0x9d   : > { %2281 = vsyncadd (%p3269_p8), %s334_s7, 4294967280  ;;  %p3270_p12 = scmp.eq.s32.totalorder %s2423_s27, 0 }
  0x9f   : > { %2283 = dma.done.wait (%p3270_p12), [#allocation6], 896   ;;  %p3271_p1 = pmov %p3270_p12 }
  0xa1   : > { %2285 = vsyncadd (%p3271_p1), [#allocation6], 4294966400  ;;  %p3272_p11 = pmov %p3271_p1 }
  0xa2   : > { %p3273_p0 = pmov %p3271_p1 }
  0xa3   : > { %2287 = dma.done.wait (%p3272_p11), [#allocation9], 16  }
  0xa4   : > { %2289 = vsyncadd (%p3273_p0), [#allocation9], 4294967280  ;;  %s1830_s19 = sshll.u32 %s2613_s20, 8  ;;  %v385_v0 = vld [vmem:[#allocation7] sm:$0xff]  ;;  %v386_v1 = vld [vmem:[#allocation7 + $0x8] sm:$0xff]  ;;  %s378_s9 = scalar_lea.vmem [#allocation11], %s2613_s20 }
  0xa5   : > { %v387_v2 = vld [vmem:[#allocation7 + $0x10] sm:$0xff]  ;;  %v388_v3 = vld [vmem:[#allocation7 + $0x18] sm:$0xff]  ;;  %v389_v4 = vld [vmem:[#allocation7 + $0x20] sm:$0xff]  ;;  %s2656_s29 = scalar_lea.vmem [#allocation10], %s1830_s19  ;;  %s384_s28 = scalar_lea.vmem [#allocation13], %s2613_s20  ;;  %v2660_v16 = vmov 0.0  }
  0xa6   : > { %v390_v5 = vld [vmem:[#allocation7 + $0x28] sm:$0xff]  ;;  %v391_v6 = vld [vmem:[#allocation7 + $0x30] sm:$0x1]  ;;  %v1831_v7 = vld [vmem:[%s336_s15] ss:$0 sm:$0xff]  ;;  %s2662_s17 = smov 0  }
  0xa7   : > { %v2640_v8 = vld [vmem:[#allocation8] ss:$0 sm:$0xff]  ;;  %v2642_v9 = vmul.f32 %v1831_v7, %v385_v0  ;;  %v2644_v10 = vmul.f32 %v1831_v7, %v386_v1  ;;  %v2646_v11 = vmul.f32 %v1831_v7, %v387_v2  ;;  %v2648_v12 = vmul.f32 %v1831_v7, %v388_v3 }
  0xa8   : > { %v2650_v13 = vmul.f32 %v1831_v7, %v389_v4  ;;  %v2652_v14 = vmul.f32 %v1831_v7, %v390_v5  ;;  %v2654_v15 = vmul.f32 %v1831_v7, %v391_v6 }
  0xa9 LB: >> { %v422_v17 = vlaneseq  ;;  %s414_s2 = smul.u32 24, %s2328_s17  ;;  %vm440_vm0 = vcmask 1046528   ;;  %vm460_vm1 = vcmask 1045504   ;;  %vm480_vm2 = vcmask 1044480   ;;  %s1851_s0 = sshll.u32 %s2328_s17, 4  ;;  %s2328_s17 = sphi %s2662_s17, %s412_s17   ;;  %v2324_v16 = vphi %v2660_v16, %v3274_v16  }
  0xaa   : >> { %vm500_vm3 = vcmask 1043456   ;;  %vm520_vm4 = vcmask 1042432   ;;  %vm540_vm5 = vcmask 1041408   ;;  %vm2345_vm6 = vmmov 0   ;;  %s1358_s18 = scalar_lea.vmem %s2656_s29, %s1851_s0 [#allocation10]  ;;  %s412_s17 = sadd.s32 1, %s2328_s17  }
  0xab   : >> { %v2671_v18 = vshrl.u32 %v422_v17, 7  ;;  %s2674_s8 = scalar_lea.vmem %s2617_s11, %s414_s2 [#allocation2]  ;;  %vm1372_vm7 = vcmask 130048   ;;  %p409_p2 = scmp.ge.s32.totalorder %s412_s17, 16  }
  0xac   : >> { %v416_v23 = vld [vmem:[%s2674_s8] sm:$0xff]  ;;  %v417_v24 = vld [vmem:[%s2674_s8 + $0x8] sm:$0xff]  ;;  %v418_v25 = vld [vmem:[%s2674_s8 + $0x10] sm:$0xff]  ;;  %s3102_s13 = smov (%p409_p2), 0  }
  0xad   : >> { %v2677_v19 = vsub.s32 0, %v2671_v18  ;;  %v2680_v20 = vsub.s32 1, %v2671_v18  ;;  %v2683_v21 = vsub.s32 2, %v2671_v18  ;;  %v2686_v22 = vsub.s32 3, %v2671_v18 }
  0xae   : >> { %v2692_v26 = vsub.s32 4, %v2671_v18  ;;  %v2695_v27 = vsub.s32 5, %v2671_v18  ;;  %v2698_v28 = vsub.s32 6, %v2671_v18  ;;  %v419_v29 = vmax.f32 %v416_v23, 0.0 }
  0xaf   : >> { %v2700_v30 = vmax.f32 %v417_v24, 0.0  ;;  %v2702_v31 = vmax.f32 %v418_v25, 0.0  ;;  %v425_v32 = vrot.slane %v2642_v9, %v2677_v19  ;;  %v433_v33 = vrot.slane %v2642_v9, %v2680_v20 }
  0xb0   : >> { %v453_v34 = vrot.slane %v2642_v9, %v2683_v21  ;;  %v473_v35 = vrot.slane %v2642_v9, %v2686_v22  ;;  %v493_v36 = vrot.slane %v2642_v9, %v2692_v26  ;;  %v513_v39 = vrot.slane %v2642_v9, %v2695_v27 }
  0xb1   : >> { %v426_v37 = vmul.f32 %v425_v32, %v419_v29  ;;  %v427_v38 = vmul.f32 %v425_v32, %v2700_v30  ;;  %v533_v40 = vrot.slane %v2642_v9, %v2698_v28  ;;  %v434_v41 = vmul.f32 %v433_v33, %v419_v29 }
  0xb2   : >> { %v435_v42 = vmul.f32 %v433_v33, %v2700_v30  ;;  %v436_v43 = vmul.f32 %v433_v33, %v2702_v31  ;;  %v454_v44 = vmul.f32 %v453_v34, %v419_v29  ;;  %v455_v45 = vmul.f32 %v453_v34, %v2700_v30 }
  0xb3   : >> { %v456_v46 = vmul.f32 %v453_v34, %v2702_v31  ;;  %v474_v47 = vmul.f32 %v473_v35, %v419_v29  ;;  %v475_v48 = vmul.f32 %v473_v35, %v2700_v30  ;;  %v441_v49 = vrot.slane %v434_v41, 1 }
  0xb4   : >> { %v442_v50 = vrot.slane %v435_v42, 1  ;;  %v444_v51 = vrot.slane %v436_v43, 1  ;;  %v461_v52 = vrot.slane %v454_v44, 2  ;;  %v462_v53 = vrot.slane %v455_v45, 2  ;;  %v1833_v44 = vld [vmem:[%s2674_s8 + $0x20] sm:$0xff] }
  0xb5   : >> { %v464_v54 = vrot.slane %v456_v46, 2  ;;  %v476_v55 = vmul.f32 %v473_v35, %v2702_v31  ;;  %v481_v56 = vrot.slane %v474_v47, 3  ;;  %v482_v59 = vrot.slane %v475_v48, 3 }
  0xb6   : >> { %v443_v57 = vsel %vm440_vm0, %v441_v49, %v442_v50  ;;  %v445_v58 = vsel %vm440_vm0, %v442_v50, %v444_v51  ;;  %v494_v60 = vmul.f32 %v493_v36, %v419_v29  ;;  %v463_v63 = vsel %vm460_vm1, %v461_v52, %v462_v53  ;;  %v1834_v49 = vld [vmem:[%s2674_s8 + $0x28] sm:$0xff] }
  0xb7   : >> { %v448_v61 = vadd.f32 %v443_v57, %v426_v37  ;;  %v449_v62 = vadd.f32 %v445_v58, %v427_v38  ;;  %v465_v0 = vsel %vm460_vm1, %v462_v53, %v464_v54  ;;  %v483_v1 = vsel %vm480_vm2, %v481_v56, %v482_v59  ;;  %v1832_v38 = vld [vmem:[%s2674_s8 + $0x18] sm:$0xff] }
  0xb8   : >> { %v484_v2 = vrot.slane %v476_v55, 3  ;;  %v495_v3 = vmul.f32 %v493_v36, %v2700_v30  ;;  %v496_v4 = vmul.f32 %v493_v36, %v2702_v31  ;;  %v501_v7 = vrot.slane %v494_v60, 4 }
  0xb9   : >> { %v468_v5 = vadd.f32 %v463_v63, %v448_v61  ;;  %v469_v6 = vadd.f32 %v465_v0, %v449_v62  ;;  %v514_v17 = vmul.f32 %v513_v39, %v419_v29  ;;  %v515_v32 = vmul.f32 %v513_v39, %v2700_v30 }
  0xba   : >> { %v485_v23 = vsel %vm480_vm2, %v482_v59, %v484_v2  ;;  %v502_v24 = vrot.slane %v495_v3, 4  ;;  %v504_v25 = vrot.slane %v496_v4, 4  ;;  %v516_v35 = vmul.f32 %v513_v39, %v2702_v31 }
  0xbb   : >> { %v488_v33 = vadd.f32 %v483_v1, %v468_v5  ;;  %v489_v34 = vadd.f32 %v485_v23, %v469_v6  ;;  %v521_v37 = vrot.slane %v514_v17, 5  ;;  %v522_v42 = vrot.slane %v515_v32, 5 }
  0xbc   : >> { %v503_v36 = vsel %vm500_vm3, %v501_v7, %v502_v24  ;;  %v505_v41 = vsel %vm500_vm3, %v502_v24, %v504_v25  ;;  %v534_v43 = vmul.f32 %v533_v40, %v419_v29  ;;  %v524_v47 = vrot.slane %v516_v35, 5 }
  0xbd   : >> { %v508_v45 = vadd.f32 %v503_v36, %v488_v33  ;;  %v509_v46 = vadd.f32 %v505_v41, %v489_v34  ;;  %v535_v48 = vmul.f32 %v533_v40, %v2700_v30  ;;  %v523_v50 = vsel %vm520_vm4, %v521_v37, %v522_v42 }
  0xbe   : >> { %v536_v51 = vmul.f32 %v533_v40, %v2702_v31  ;;  %v541_v39 = vrot.slane %v534_v43, 6  ;;  %v2743_v52 = vmax.f32 %v1832_v38, 0.0  ;;  %v525_v53 = vsel %vm520_vm4, %v522_v42, %v524_v47 }
  0xbf   : >> { %v528_v54 = vadd.f32 %v523_v50, %v508_v45  ;;  %v542_v55 = vrot.slane %v535_v48, 6  ;;  %v2746_v56 = vmax.f32 %v1833_v44, 0.0  ;;  %v529_v29 = vadd.f32 %v525_v53, %v509_v46  ;;  %v1835_v50 = vld [vmem:[%s2674_s8 + $0x30] sm:$0xff] }
  0xc0   : >> { %v544_v57 = vrot.slane %v536_v51, 6  ;;  %v2748_v58 = vmax.f32 %v1834_v49, 0.0  ;;  %v2751_v30 = vsub.s32 7, %v2671_v18  ;;  %v570_v31 = vrot.slane %v2644_v10, %v2677_v19 }
  0xc1   : >> { %v543_v59 = vsel %vm540_vm5, %v541_v39, %v542_v55  ;;  %v589_v40 = vrot.slane %v2644_v10, %v2680_v20  ;;  %v608_v60 = vrot.slane %v2644_v10, %v2683_v21  ;;  %v627_v18 = vrot.slane %v2644_v10, %v2686_v22 }
  0xc2   : >> { %v545_v61 = vsel %vm540_vm5, %v542_v55, %v544_v57  ;;  %v548_v62 = vadd.f32 %v543_v59, %v528_v54  ;;  %v562_v63 = vrot.slane %v2642_v9, %v2751_v30  ;;  %v571_v1 = vmul.f32 %v570_v31, %v2743_v52 }
  0xc3   : >> { %v549_v0 = vadd.f32 %v545_v61, %v529_v29  ;;  %v572_v2 = vmul.f32 %v570_v31, %v2746_v56  ;;  %v573_v3 = vmul.f32 %v570_v31, %v2748_v58  ;;  %v590_v6 = vmul.f32 %v589_v40, %v2743_v52 }
  0xc4   : >> { %v563_v4 = vmul.f32 %v562_v63, %v2743_v52  ;;  %v564_v5 = vmul.f32 %v562_v63, %v2746_v56  ;;  %v591_v7 = vmul.f32 %v589_v40, %v2746_v56  ;;  %v577_v17 = vrot.slane %v571_v1, 1 }
  0xc5   : >> { %v578_v23 = vrot.slane %v572_v2, 1  ;;  %v580_v24 = vrot.slane %v573_v3, 1  ;;  %v592_v25 = vmul.f32 %v589_v40, %v2748_v58  ;;  %v596_v34 = vrot.slane %v590_v6, 2  ;;  %v1837_v6 = vld [vmem:[%s2674_s8 + $0x40] sm:$0xff] }
  0xc6   : >> { %v565_v32 = vadd.f32 %v563_v4, %v548_v62  ;;  %v566_v33 = vadd.f32 %v564_v5, %v549_v0  ;;  %v597_v35 = vrot.slane %v591_v7, 2  ;;  %v609_v41 = vmul.f32 %v608_v60, %v2743_v52  ;;  %v1836_v5 = vld [vmem:[%s2674_s8 + $0x38] sm:$0xff] }
  0xc7   : >> { %v579_v37 = vsel %vm440_vm0, %v577_v17, %v578_v23  ;;  %v581_v38 = vsel %vm440_vm0, %v578_v23, %v580_v24  ;;  %v599_v36 = vrot.slane %v592_v25, 2  ;;  %v610_v45 = vmul.f32 %v608_v60, %v2746_v56 }
  0xc8   : >> { %v584_v42 = vadd.f32 %v579_v37, %v565_v32  ;;  %v585_v43 = vadd.f32 %v581_v38, %v566_v33  ;;  %v598_v44 = vsel %vm460_vm1, %v596_v34, %v597_v35  ;;  %v611_v47 = vmul.f32 %v608_v60, %v2748_v58 }
  0xc9   : >> { %v600_v46 = vsel %vm460_vm1, %v597_v35, %v599_v36  ;;  %v615_v48 = vrot.slane %v609_v41, 3  ;;  %v628_v49 = vmul.f32 %v627_v18, %v2743_v52  ;;  %v616_v53 = vrot.slane %v610_v45, 3 }
  0xca   : >> { %v603_v51 = vadd.f32 %v598_v44, %v584_v42  ;;  %v604_v39 = vadd.f32 %v600_v46, %v585_v43  ;;  %v629_v54 = vmul.f32 %v627_v18, %v2746_v56  ;;  %v618_v55 = vrot.slane %v611_v47, 3 }
  0xcb   : >> { %v630_v29 = vmul.f32 %v627_v18, %v2748_v58  ;;  %v634_v57 = vrot.slane %v628_v49, 4  ;;  %v646_v59 = vrot.slane %v2644_v10, %v2692_v26  ;;  %v617_v31 = vsel %vm480_vm2, %v615_v48, %v616_v53 }
  0xcc   : >> { %v635_v40 = vrot.slane %v629_v54, 4  ;;  %v665_v60 = vrot.slane %v2644_v10, %v2695_v27  ;;  %v2789_v61 = vmax.f32 %v1835_v50, 0.0  ;;  %v619_v62 = vsel %vm480_vm2, %v616_v53, %v618_v55 }
  0xcd   : >> { %v622_v63 = vadd.f32 %v617_v31, %v603_v51  ;;  %v637_v0 = vrot.slane %v630_v29, 4  ;;  %v647_v1 = vmul.f32 %v646_v59, %v2743_v52  ;;  %v623_v18 = vadd.f32 %v619_v62, %v604_v39 }
  0xce   : >> { %v636_v2 = vsel %vm500_vm3, %v634_v57, %v635_v40  ;;  %v648_v3 = vmul.f32 %v646_v59, %v2746_v56  ;;  %v649_v4 = vmul.f32 %v646_v59, %v2748_v58  ;;  %v666_v24 = vmul.f32 %v665_v60, %v2743_v52 }
  0xcf   : >> { %v638_v7 = vsel %vm500_vm3, %v635_v40, %v637_v0  ;;  %v641_v17 = vadd.f32 %v636_v2, %v622_v63  ;;  %v653_v23 = vrot.slane %v647_v1, 5  ;;  %v667_v34 = vmul.f32 %v665_v60, %v2746_v56 }
  0xd0   : >> { %v642_v25 = vadd.f32 %v638_v7, %v623_v18  ;;  %v654_v32 = vrot.slane %v648_v3, 5  ;;  %v656_v33 = vrot.slane %v649_v4, 5  ;;  %v668_v35 = vmul.f32 %v665_v60, %v2748_v58 }
  0xd1   : >> { %v672_v37 = vrot.slane %v666_v24, 6  ;;  %v2802_v38 = vmax.f32 %v1836_v5, 0.0  ;;  %v2804_v36 = vmax.f32 %v1837_v6, 0.0  ;;  %v673_v43 = vrot.slane %v667_v34, 6 }
  0xd2   : >> { %v655_v41 = vsel %vm520_vm4, %v653_v23, %v654_v32  ;;  %v657_v42 = vsel %vm520_vm4, %v654_v32, %v656_v33  ;;  %v693_v52 = vrot.slane %v2644_v10, %v2698_v28  ;;  %v675_v46 = vrot.slane %v668_v35, 6 }
  0xd3   : >> { %v660_v44 = vadd.f32 %v655_v41, %v641_v17  ;;  %v661_v45 = vadd.f32 %v657_v42, %v642_v25  ;;  %v701_v56 = vrot.slane %v2644_v10, %v2751_v30  ;;  %v674_v58 = vsel %vm540_vm5, %v672_v37, %v673_v43 }
  0xd4   : >> { %v694_v47 = vmul.f32 %v693_v52, %v2789_v61  ;;  %v695_v48 = vmul.f32 %v693_v52, %v2802_v38  ;;  %v720_v49 = vrot.slane %v2646_v11, %v2677_v19  ;;  %v676_v50 = vsel %vm540_vm5, %v673_v43, %v675_v46 }
  0xd5   : >> { %v679_v51 = vadd.f32 %v674_v58, %v660_v44  ;;  %v702_v39 = vmul.f32 %v701_v56, %v2789_v61  ;;  %v703_v53 = vmul.f32 %v701_v56, %v2802_v38  ;;  %v680_v54 = vadd.f32 %v676_v50, %v661_v45  ;;  %v2845_v50 = vld [vmem:[%s2674_s8 + $0x48] sm:$0xff] }
  0xd6   : >> { %v704_v55 = vmul.f32 %v701_v56, %v2804_v36  ;;  %v721_v29 = vmul.f32 %v720_v49, %v2789_v61  ;;  %v722_v57 = vmul.f32 %v720_v49, %v2802_v38  ;;  %v723_v60 = vmul.f32 %v720_v49, %v2804_v36 }
  0xd7   : >> { %v696_v59 = vadd.f32 %v694_v47, %v679_v51  ;;  %v708_v31 = vrot.slane %v702_v39, 1  ;;  %v709_v40 = vrot.slane %v703_v53, 1  ;;  %v697_v62 = vadd.f32 %v695_v48, %v680_v54  ;;  %v2848_v51 = vld [vmem:[%s2674_s8 + $0x50] sm:$0xff] }
  0xd8   : >> { %v711_v63 = vrot.slane %v704_v55, 1  ;;  %v727_v0 = vrot.slane %v721_v29, 2  ;;  %v728_v1 = vrot.slane %v722_v57, 2  ;;  %v730_v2 = vrot.slane %v723_v60, 2  ;;  %v2853_v29 = vld [vmem:[%s2674_s8 + $0x58] sm:$0xff] }
  0xd9   : >> { %v710_v18 = vsel %vm440_vm0, %v708_v31, %v709_v40  ;;  %v739_v3 = vrot.slane %v2646_v11, %v2680_v20  ;;  %v758_v4 = vrot.slane %v2646_v11, %v2683_v21  ;;  %v777_v17 = vrot.slane %v2646_v11, %v2686_v22 }
  0xda   : >> { %v712_v5 = vsel %vm440_vm0, %v709_v40, %v711_v63  ;;  %v715_v6 = vadd.f32 %v710_v18, %v696_v59  ;;  %v729_v7 = vsel %vm460_vm1, %v727_v0, %v728_v1  ;;  %v731_v24 = vsel %vm460_vm1, %v728_v1, %v730_v2 }
  0xdb   : >> { %v716_v23 = vadd.f32 %v712_v5, %v697_v62  ;;  %v740_v25 = vmul.f32 %v739_v3, %v2789_v61  ;;  %v741_v32 = vmul.f32 %v739_v3, %v2802_v38  ;;  %v742_v34 = vmul.f32 %v739_v3, %v2804_v36 }
  0xdc   : >> { %v734_v33 = vadd.f32 %v729_v7, %v715_v6  ;;  %v759_v35 = vmul.f32 %v758_v4, %v2789_v61  ;;  %v760_v37 = vmul.f32 %v758_v4, %v2802_v38  ;;  %v761_v52 = vmul.f32 %v758_v4, %v2804_v36 }
  0xdd   : >> { %v735_v41 = vadd.f32 %v731_v24, %v716_v23  ;;  %v746_v42 = vrot.slane %v740_v25, 3  ;;  %v747_v43 = vrot.slane %v741_v32, 3  ;;  %v749_v44 = vrot.slane %v742_v34, 3 }
  0xde   : >> { %v765_v45 = vrot.slane %v759_v35, 4  ;;  %v766_v46 = vrot.slane %v760_v37, 4  ;;  %v778_v56 = vmul.f32 %v777_v17, %v2789_v61  ;;  %v768_v47 = vrot.slane %v761_v52, 4 }
  0xdf   : >> { %v748_v58 = vsel %vm480_vm2, %v746_v42, %v747_v43  ;;  %v779_v48 = vmul.f32 %v777_v17, %v2802_v38  ;;  %v780_v49 = vmul.f32 %v777_v17, %v2804_v36  ;;  %v750_v39 = vsel %vm480_vm2, %v747_v43, %v749_v44 }
  0xe0   : >> { %v753_v53 = vadd.f32 %v748_v58, %v734_v33  ;;  %v767_v54 = vsel %vm500_vm3, %v765_v45, %v766_v46  ;;  %v784_v55 = vrot.slane %v778_v56, 5  ;;  %v754_v57 = vadd.f32 %v750_v39, %v735_v41 }
  0xe1   : >> { %v769_v59 = vsel %vm500_vm3, %v766_v46, %v768_v47  ;;  %v785_v31 = vrot.slane %v779_v48, 5  ;;  %v787_v40 = vrot.slane %v780_v49, 5  ;;  %v796_v62 = vrot.slane %v2646_v11, %v2692_v26 }
  0xe2   : >> { %v772_v60 = vadd.f32 %v767_v54, %v753_v53  ;;  %v2859_v63 = vmax.f32 %v2845_v50, 0.0  ;;  %v2862_v0 = vmax.f32 %v2848_v51, 0.0  ;;  %v773_v1 = vadd.f32 %v769_v59, %v754_v57 }
  0xe3   : >> { %v786_v18 = vsel %vm520_vm4, %v784_v55, %v785_v31  ;;  %v788_v2 = vsel %vm520_vm4, %v785_v31, %v787_v40  ;;  %v2867_v3 = vmax.f32 %v2853_v29, 0.0  ;;  %v797_v5 = vmul.f32 %v796_v62, %v2789_v61 }
  0xe4   : >> { %v791_v4 = vadd.f32 %v786_v18, %v772_v60  ;;  %v798_v6 = vmul.f32 %v796_v62, %v2802_v38  ;;  %v799_v7 = vmul.f32 %v796_v62, %v2804_v36  ;;  %v792_v17 = vadd.f32 %v788_v2, %v773_v1 }
  0xe5   : >> { %v824_v23 = vrot.slane %v2646_v11, %v2695_v27  ;;  %v832_v24 = vrot.slane %v2646_v11, %v2698_v28  ;;  %v851_v25 = vrot.slane %v2646_v11, %v2751_v30  ;;  %v803_v32 = vrot.slane %v797_v5, 6 }
  0xe6   : >> { %v804_v33 = vrot.slane %v798_v6, 6  ;;  %v806_v34 = vrot.slane %v799_v7, 6  ;;  %v870_v61 = vrot.slane %v2648_v12, %v2677_v19  ;;  %v889_v6 = vrot.slane %v2648_v12, %v2680_v20 }
  0xe7   : >> { %v825_v38 = vmul.f32 %v824_v23, %v2859_v63  ;;  %v826_v36 = vmul.f32 %v824_v23, %v2862_v0  ;;  %v833_v35 = vmul.f32 %v832_v24, %v2859_v63  ;;  %v834_v37 = vmul.f32 %v832_v24, %v2862_v0 }
  0xe8   : >> { %v805_v41 = vsel %vm540_vm5, %v803_v32, %v804_v33  ;;  %v807_v42 = vsel %vm540_vm5, %v804_v33, %v806_v34  ;;  %v835_v43 = vmul.f32 %v832_v24, %v2867_v3  ;;  %v852_v52 = vmul.f32 %v851_v25, %v2859_v63 }
  0xe9   : >> { %v810_v44 = vadd.f32 %v805_v41, %v791_v4  ;;  %v811_v45 = vadd.f32 %v807_v42, %v792_v17  ;;  %v839_v46 = vrot.slane %v833_v35, 1  ;;  %v840_v56 = vrot.slane %v834_v37, 1  ;;  %v1841_v37 = vld [vmem:[%s2674_s8 + $0x60] sm:$0xff]  ;;  %v1842_v41 = vld [vmem:[%s2674_s8 + $0x68] sm:$0xff] }
  0xea   : >> { %v842_v58 = vrot.slane %v835_v43, 1  ;;  %v853_v47 = vmul.f32 %v851_v25, %v2862_v0  ;;  %v854_v48 = vmul.f32 %v851_v25, %v2867_v3  ;;  %v858_v49 = vrot.slane %v852_v52, 2 }
  0xeb   : >> { %v827_v39 = vadd.f32 %v825_v38, %v810_v44  ;;  %v828_v53 = vadd.f32 %v826_v36, %v811_v45  ;;  %v841_v54 = vsel %vm440_vm0, %v839_v46, %v840_v56  ;;  %v871_v55 = vmul.f32 %v870_v61, %v2859_v63 }
  0xec   : >> { %v843_v57 = vsel %vm440_vm0, %v840_v56, %v842_v58  ;;  %v859_v59 = vrot.slane %v853_v47, 2  ;;  %v861_v31 = vrot.slane %v854_v48, 2  ;;  %v872_v40 = vmul.f32 %v870_v61, %v2862_v0  ;;  %v1843_v47 = vld [vmem:[%s2674_s8 + $0x70] sm:$0xff] }
  0xed   : >> { %v846_v60 = vadd.f32 %v841_v54, %v827_v39  ;;  %v847_v62 = vadd.f32 %v843_v57, %v828_v53  ;;  %v873_v1 = vmul.f32 %v870_v61, %v2867_v3  ;;  %v877_v18 = vrot.slane %v871_v55, 3 }
  0xee   : >> { %v860_v2 = vsel %vm460_vm1, %v858_v49, %v859_v59  ;;  %v862_v4 = vsel %vm460_vm1, %v859_v59, %v861_v31  ;;  %v878_v5 = vrot.slane %v872_v40, 3  ;;  %v908_v24 = vrot.slane %v2648_v12, %v2683_v21 }
  0xef   : >> { %v865_v7 = vadd.f32 %v860_v2, %v846_v60  ;;  %v866_v17 = vadd.f32 %v862_v4, %v847_v62  ;;  %v880_v23 = vrot.slane %v873_v1, 3  ;;  %v890_v32 = vmul.f32 %v889_v6, %v2859_v63 }
  0xf0   : >> { %v879_v25 = vsel %vm480_vm2, %v877_v18, %v878_v5  ;;  %v891_v33 = vmul.f32 %v889_v6, %v2862_v0  ;;  %v892_v34 = vmul.f32 %v889_v6, %v2867_v3  ;;  %v909_v36 = vmul.f32 %v908_v24, %v2859_v63 }
  0xf1   : >> { %v881_v61 = vsel %vm480_vm2, %v878_v5, %v880_v23  ;;  %v884_v38 = vadd.f32 %v879_v25, %v865_v7  ;;  %v910_v35 = vmul.f32 %v908_v24, %v2862_v0  ;;  %v896_v43 = vrot.slane %v890_v32, 4 }
  0xf2   : >> { %v885_v42 = vadd.f32 %v881_v61, %v866_v17  ;;  %v897_v52 = vrot.slane %v891_v33, 4  ;;  %v899_v44 = vrot.slane %v892_v34, 4  ;;  %v911_v45 = vmul.f32 %v908_v24, %v2867_v3 }
  0xf3   : >> { %v915_v46 = vrot.slane %v909_v36, 5  ;;  %v916_v56 = vrot.slane %v910_v35, 5  ;;  %v927_v58 = vrot.slane %v2648_v12, %v2686_v22  ;;  %v2916_v39 = vmax.f32 %v1841_v37, 0.0 }
  0xf4   : >> { %v898_v48 = vsel %vm500_vm3, %v896_v43, %v897_v52  ;;  %v900_v49 = vsel %vm500_vm3, %v897_v52, %v899_v44  ;;  %v2918_v53 = vmax.f32 %v1842_v41, 0.0  ;;  %v918_v59 = vrot.slane %v911_v45, 5 }
  0xf5   : >> { %v903_v54 = vadd.f32 %v898_v48, %v884_v38  ;;  %v904_v55 = vadd.f32 %v900_v49, %v885_v42  ;;  %v917_v57 = vsel %vm520_vm4, %v915_v46, %v916_v56  ;;  %v928_v31 = vmul.f32 %v927_v58, %v2859_v63 }
  0xf6   : >> { %v929_v40 = vmul.f32 %v927_v58, %v2862_v0  ;;  %v930_v60 = vmul.f32 %v927_v58, %v2867_v3  ;;  %v2924_v62 = vmax.f32 %v1843_v47, 0.0  ;;  %v919_v1 = vsel %vm520_vm4, %v916_v56, %v918_v59 }
  0xf7   : >> { %v922_v18 = vadd.f32 %v917_v57, %v903_v54  ;;  %v955_v2 = vrot.slane %v2648_v12, %v2692_v26  ;;  %v963_v4 = vrot.slane %v2648_v12, %v2695_v27  ;;  %v923_v5 = vadd.f32 %v919_v1, %v904_v55 }
  0xf8   : >> { %v934_v6 = vrot.slane %v928_v31, 6  ;;  %v935_v7 = vrot.slane %v929_v40, 6  ;;  %v937_v17 = vrot.slane %v930_v60, 6  ;;  %v982_v33 = vrot.slane %v2648_v12, %v2698_v28  ;;  %v1844_v60 = vld [vmem:[%s2674_s8 + $0x78] sm:$0xff] }
  0xf9   : >> { %v956_v63 = vmul.f32 %v955_v2, %v2916_v39  ;;  %v957_v0 = vmul.f32 %v955_v2, %v2918_v53  ;;  %v964_v3 = vmul.f32 %v963_v4, %v2916_v39  ;;  %v965_v23 = vmul.f32 %v963_v4, %v2918_v53 }
  0xfa   : >> { %v936_v24 = vsel %vm540_vm5, %v934_v6, %v935_v7  ;;  %v938_v25 = vsel %vm540_vm5, %v935_v7, %v937_v17  ;;  %v966_v32 = vmul.f32 %v963_v4, %v2924_v62  ;;  %v983_v37 = vmul.f32 %v982_v33, %v2916_v39 }
  0xfb   : >> { %v941_v34 = vadd.f32 %v936_v24, %v922_v18  ;;  %v942_v61 = vadd.f32 %v938_v25, %v923_v5  ;;  %v970_v38 = vrot.slane %v964_v3, 1  ;;  %v971_v36 = vrot.slane %v965_v23, 1 }
  0xfc   : >> { %v973_v35 = vrot.slane %v966_v32, 1  ;;  %v984_v41 = vmul.f32 %v982_v33, %v2918_v53  ;;  %v985_v42 = vmul.f32 %v982_v33, %v2924_v62  ;;  %v1001_v45 = vrot.slane %v2648_v12, %v2751_v30 }
  0xfd   : >> { %v958_v43 = vadd.f32 %v956_v63, %v941_v34  ;;  %v959_v52 = vadd.f32 %v957_v0, %v942_v61  ;;  %v972_v44 = vsel %vm440_vm0, %v970_v38, %v971_v36  ;;  %v989_v56 = vrot.slane %v983_v37, 2 }
  0xfe   : >> { %v974_v46 = vsel %vm440_vm0, %v971_v36, %v973_v35  ;;  %v990_v58 = vrot.slane %v984_v41, 2  ;;  %v992_v47 = vrot.slane %v985_v42, 2  ;;  %v1002_v54 = vmul.f32 %v1001_v45, %v2916_v39 }
  0xff   : >> { %v977_v48 = vadd.f32 %v972_v44, %v958_v43  ;;  %v978_v49 = vadd.f32 %v974_v46, %v959_v52  ;;  %v1003_v55 = vmul.f32 %v1001_v45, %v2918_v53  ;;  %v1004_v31 = vmul.f32 %v1001_v45, %v2924_v62  ;;  %v1845_v43 = vld [vmem:[%s2674_s8 + $0x80] sm:$0xff]  ;;  %v1846_v52 = vld [vmem:[%s2674_s8 + $0x88] sm:$0xff] }
 0x100   : >> { %v991_v57 = vsel %vm460_vm1, %v989_v56, %v990_v58  ;;  %v993_v59 = vsel %vm460_vm1, %v990_v58, %v992_v47  ;;  %v1020_v40 = vrot.slane %v2650_v13, %v2677_v19  ;;  %v1008_v2 = vrot.slane %v1002_v54, 3 }
 0x101   : >> { %v996_v1 = vadd.f32 %v991_v57, %v977_v48  ;;  %v997_v18 = vadd.f32 %v993_v59, %v978_v49  ;;  %v1009_v4 = vrot.slane %v1003_v55, 3  ;;  %v1011_v5 = vrot.slane %v1004_v31, 3 }
 0x102   : >> { %v1021_v6 = vmul.f32 %v1020_v40, %v2916_v39  ;;  %v1022_v7 = vmul.f32 %v1020_v40, %v2918_v53  ;;  %v1023_v17 = vmul.f32 %v1020_v40, %v2924_v62  ;;  %v1039_v0 = vrot.slane %v2650_v13, %v2680_v20 }
 0x103   : >> { %v1010_v63 = vsel %vm480_vm2, %v1008_v2, %v1009_v4  ;;  %v1058_v3 = vrot.slane %v2650_v13, %v2683_v21  ;;  %v2963_v23 = vmax.f32 %v1844_v60, 0.0  ;;  %v1012_v24 = vsel %vm480_vm2, %v1009_v4, %v1011_v5 }
 0x104   : >> { %v1015_v25 = vadd.f32 %v1010_v63, %v996_v1  ;;  %v1027_v32 = vrot.slane %v1021_v6, 4  ;;  %v1028_v33 = vrot.slane %v1022_v7, 4  ;;  %v1016_v34 = vadd.f32 %v1012_v24, %v997_v18 }
 0x105   : >> { %v1030_v61 = vrot.slane %v1023_v17, 4  ;;  %v1040_v38 = vmul.f32 %v1039_v0, %v2916_v39  ;;  %v1041_v36 = vmul.f32 %v1039_v0, %v2918_v53  ;;  %v1042_v37 = vmul.f32 %v1039_v0, %v2924_v62 }
 0x106   : >> { %v1029_v35 = vsel %vm500_vm3, %v1027_v32, %v1028_v33  ;;  %v1059_v41 = vmul.f32 %v1058_v3, %v2916_v39  ;;  %v1060_v42 = vmul.f32 %v1058_v3, %v2918_v53  ;;  %v1061_v48 = vmul.f32 %v1058_v3, %v2924_v62 }
 0x107   : >> { %v1031_v44 = vsel %vm500_vm3, %v1028_v33, %v1030_v61  ;;  %v1034_v45 = vadd.f32 %v1029_v35, %v1015_v25  ;;  %v1046_v46 = vrot.slane %v1040_v38, 5  ;;  %v1047_v56 = vrot.slane %v1041_v36, 5 }
 0x108   : >> { %v1035_v58 = vadd.f32 %v1031_v44, %v1016_v34  ;;  %v1049_v47 = vrot.slane %v1042_v37, 5  ;;  %v1065_v49 = vrot.slane %v1059_v41, 6  ;;  %v1066_v55 = vrot.slane %v1060_v42, 6 }
 0x109   : >> { %v1048_v54 = vsel %vm520_vm4, %v1046_v46, %v1047_v56  ;;  %v2977_v57 = vmax.f32 %v1845_v43, 0.0  ;;  %v2979_v39 = vmax.f32 %v1846_v52, 0.0  ;;  %v1068_v31 = vrot.slane %v1061_v48, 6 }
 0x10a   : >> { %v1050_v53 = vsel %vm520_vm4, %v1047_v56, %v1049_v47  ;;  %v1053_v59 = vadd.f32 %v1048_v54, %v1034_v45  ;;  %v1086_v40 = vrot.slane %v2650_v13, %v2686_v22  ;;  %v1067_v1 = vsel %vm540_vm5, %v1065_v49, %v1066_v55 }
 0x10b   : >> { %v1054_v60 = vadd.f32 %v1050_v53, %v1035_v58  ;;  %v1094_v62 = vrot.slane %v2650_v13, %v2692_v26  ;;  %v1113_v18 = vrot.slane %v2650_v13, %v2695_v27  ;;  %v1069_v2 = vsel %vm540_vm5, %v1066_v55, %v1068_v31 }
 0x10c   : >> { %v1072_v4 = vadd.f32 %v1067_v1, %v1053_v59  ;;  %v1087_v5 = vmul.f32 %v1086_v40, %v2963_v23  ;;  %v1088_v6 = vmul.f32 %v1086_v40, %v2977_v57  ;;  %v1132_v41 = vrot.slane %v2650_v13, %v2698_v28 }
 0x10d   : >> { %v1073_v7 = vadd.f32 %v1069_v2, %v1054_v60  ;;  %v1095_v17 = vmul.f32 %v1094_v62, %v2963_v23  ;;  %v1096_v63 = vmul.f32 %v1094_v62, %v2977_v57  ;;  %v1097_v0 = vmul.f32 %v1094_v62, %v2979_v39 }
 0x10e   : >> { %v1089_v3 = vadd.f32 %v1087_v5, %v1072_v4  ;;  %v1114_v24 = vmul.f32 %v1113_v18, %v2963_v23  ;;  %v1115_v25 = vmul.f32 %v1113_v18, %v2977_v57  ;;  %v1116_v32 = vmul.f32 %v1113_v18, %v2979_v39 }
 0x10f   : >> { %v1090_v33 = vadd.f32 %v1088_v6, %v1073_v7  ;;  %v1101_v34 = vrot.slane %v1095_v17, 1  ;;  %v1102_v61 = vrot.slane %v1096_v63, 1  ;;  %v1104_v38 = vrot.slane %v1097_v0, 1 }
 0x110   : >> { %v1120_v36 = vrot.slane %v1114_v24, 2  ;;  %v1121_v35 = vrot.slane %v1115_v25, 2  ;;  %v1123_v37 = vrot.slane %v1116_v32, 2  ;;  %v1151_v52 = vrot.slane %v2650_v13, %v2751_v30  ;;  %v1847_v32 = vld [vmem:[%s2674_s8 + $0x90] sm:$0xff] }
 0x111   : >> { %v1103_v42 = vsel %vm440_vm0, %v1101_v34, %v1102_v61  ;;  %v1105_v43 = vsel %vm440_vm0, %v1102_v61, %v1104_v38  ;;  %v1170_v44 = vrot.slane %v2652_v14, %v2677_v19  ;;  %v1133_v47 = vmul.f32 %v1132_v41, %v2963_v23 }
 0x112   : >> { %v1108_v45 = vadd.f32 %v1103_v42, %v1089_v3  ;;  %v1109_v46 = vadd.f32 %v1105_v43, %v1090_v33  ;;  %v1122_v56 = vsel %vm460_vm1, %v1120_v36, %v1121_v35  ;;  %v1124_v58 = vsel %vm460_vm1, %v1121_v35, %v1123_v37  ;;  %v1848_v42 = vld [vmem:[%s2674_s8 + $0x98] sm:$0xff] }
 0x113   : >> { %v1134_v48 = vmul.f32 %v1132_v41, %v2977_v57  ;;  %v1135_v49 = vmul.f32 %v1132_v41, %v2979_v39  ;;  %v1152_v54 = vmul.f32 %v1151_v52, %v2963_v23  ;;  %v1153_v59 = vmul.f32 %v1151_v52, %v2977_v57 }
 0x114   : >> { %v1127_v55 = vadd.f32 %v1122_v56, %v1108_v45  ;;  %v1128_v53 = vadd.f32 %v1124_v58, %v1109_v46  ;;  %v1154_v31 = vmul.f32 %v1151_v52, %v2979_v39  ;;  %v1139_v40 = vrot.slane %v1133_v47, 3 }
 0x115   : >> { %v1140_v60 = vrot.slane %v1134_v48, 3  ;;  %v1142_v1 = vrot.slane %v1135_v49, 3  ;;  %v1158_v62 = vrot.slane %v1152_v54, 4  ;;  %v1159_v18 = vrot.slane %v1153_v59, 4 }
 0x116   : >> { %v1161_v2 = vrot.slane %v1154_v31, 4  ;;  %v1171_v4 = vmul.f32 %v1170_v44, %v2963_v23  ;;  %v1172_v5 = vmul.f32 %v1170_v44, %v2977_v57  ;;  %v1173_v17 = vmul.f32 %v1170_v44, %v2979_v39 }
 0x117   : >> { %v1141_v6 = vsel %vm480_vm2, %v1139_v40, %v1140_v60  ;;  %v1143_v7 = vsel %vm480_vm2, %v1140_v60, %v1142_v1  ;;  %v1189_v63 = vrot.slane %v2652_v14, %v2680_v20  ;;  %v1160_v24 = vsel %vm500_vm3, %v1158_v62, %v1159_v18  ;;  %v1849_v20 = vld [vmem:[%s2674_s8 + $0xa0] sm:$0xff] }
 0x118   : >> { %v1146_v0 = vadd.f32 %v1141_v6, %v1127_v55  ;;  %v1147_v3 = vadd.f32 %v1143_v7, %v1128_v53  ;;  %v1162_v25 = vsel %vm500_vm3, %v1159_v18, %v1161_v2  ;;  %v1177_v33 = vrot.slane %v1171_v4, 5 }
 0x119   : >> { %v1178_v34 = vrot.slane %v1172_v5, 5  ;;  %v1180_v61 = vrot.slane %v1173_v17, 5  ;;  %v1190_v38 = vmul.f32 %v1189_v63, %v2963_v23  ;;  %v1191_v37 = vmul.f32 %v1189_v63, %v2977_v57 }
 0x11a   : >> { %v1165_v36 = vadd.f32 %v1160_v24, %v1146_v0  ;;  %v1166_v35 = vadd.f32 %v1162_v25, %v1147_v3  ;;  %v1192_v41 = vmul.f32 %v1189_v63, %v2979_v39  ;;  %v3031_v45 = vmax.f32 %v1847_v32, 0.0 }
 0x11b   : >> { %v1179_v43 = vsel %vm520_vm4, %v1177_v33, %v1178_v34  ;;  %v1181_v52 = vsel %vm520_vm4, %v1178_v34, %v1180_v61  ;;  %v1196_v44 = vrot.slane %v1190_v38, 6  ;;  %v1197_v58 = vrot.slane %v1191_v37, 6 }
 0x11c   : >> { %v1184_v46 = vadd.f32 %v1179_v43, %v1165_v36  ;;  %v1185_v56 = vadd.f32 %v1181_v52, %v1166_v35  ;;  %v1199_v47 = vrot.slane %v1192_v41, 6  ;;  %v3033_v23 = vmax.f32 %v1848_v42, 0.0 }
 0x11d   : >> { %v3035_v48 = vmax.f32 %v1849_v20, 0.0  ;;  %v1217_v57 = vrot.slane %v2652_v14, %v2683_v21  ;;  %v1225_v39 = vrot.slane %v2652_v14, %v2686_v22  ;;  %v1198_v49 = vsel %vm540_vm5, %v1196_v44, %v1197_v58 }
 0x11e   : >> { %v1200_v54 = vsel %vm540_vm5, %v1197_v58, %v1199_v47  ;;  %v1244_v55 = vrot.slane %v2652_v14, %v2692_v26  ;;  %v1263_v53 = vrot.slane %v2652_v14, %v2695_v27  ;;  %v1203_v59 = vadd.f32 %v1198_v49, %v1184_v46 }
 0x11f   : >> { %v1204_v31 = vadd.f32 %v1200_v54, %v1185_v56  ;;  %v1218_v40 = vmul.f32 %v1217_v57, %v3031_v45  ;;  %v1219_v60 = vmul.f32 %v1217_v57, %v3033_v23  ;;  %v1226_v21 = vmul.f32 %v1225_v39, %v3031_v45 }
 0x120   : >> { %v1227_v22 = vmul.f32 %v1225_v39, %v3033_v23  ;;  %v1228_v1 = vmul.f32 %v1225_v39, %v3035_v48  ;;  %v1245_v62 = vmul.f32 %v1244_v55, %v3031_v45  ;;  %v1246_v26 = vmul.f32 %v1244_v55, %v3033_v23 }
 0x121   : >> { %v1220_v18 = vadd.f32 %v1218_v40, %v1203_v59  ;;  %v1221_v2 = vadd.f32 %v1219_v60, %v1204_v31  ;;  %v1247_v27 = vmul.f32 %v1244_v55, %v3035_v48  ;;  %v1232_v4 = vrot.slane %v1226_v21, 1 }
 0x122   : >> { %v1233_v5 = vrot.slane %v1227_v22, 1  ;;  %v1235_v6 = vrot.slane %v1228_v1, 1  ;;  %v1251_v7 = vrot.slane %v1245_v62, 2  ;;  %v1252_v17 = vrot.slane %v1246_v26, 2 }
 0x123   : >> { %v1254_v63 = vrot.slane %v1247_v27, 2  ;;  %v1264_v0 = vmul.f32 %v1263_v53, %v3031_v45  ;;  %v1265_v3 = vmul.f32 %v1263_v53, %v3033_v23  ;;  %v1266_v32 = vmul.f32 %v1263_v53, %v3035_v48 }
 0x124   : >> { %v1234_v24 = vsel %vm440_vm0, %v1232_v4, %v1233_v5  ;;  %v1236_v25 = vsel %vm440_vm0, %v1233_v5, %v1235_v6  ;;  %v1282_v33 = vrot.slane %v2652_v14, %v2698_v28  ;;  %v1253_v38 = vsel %vm460_vm1, %v1251_v7, %v1252_v17 }
 0x125   : >> { %v1239_v34 = vadd.f32 %v1234_v24, %v1220_v18  ;;  %v1240_v61 = vadd.f32 %v1236_v25, %v1221_v2  ;;  %v1255_v36 = vsel %vm460_vm1, %v1252_v17, %v1254_v63  ;;  %v1270_v35 = vrot.slane %v1264_v0, 3 }
 0x126   : >> { %v1271_v37 = vrot.slane %v1265_v3, 3  ;;  %v1273_v41 = vrot.slane %v1266_v32, 3  ;;  %v1283_v42 = vmul.f32 %v1282_v33, %v3031_v45  ;;  %v1284_v52 = vmul.f32 %v1282_v33, %v3033_v23 }
 0x127   : >> { %v1258_v20 = vadd.f32 %v1253_v38, %v1239_v34  ;;  %v1259_v43 = vadd.f32 %v1255_v36, %v1240_v61  ;;  %v1285_v44 = vmul.f32 %v1282_v33, %v3035_v48  ;;  %v1301_v58 = vrot.slane %v2652_v14, %v2751_v30 }
 0x128   : >> { %v1272_v46 = vsel %vm480_vm2, %v1270_v35, %v1271_v37  ;;  %v1274_v28 = vsel %vm480_vm2, %v1271_v37, %v1273_v41  ;;  %v1289_v56 = vrot.slane %v1283_v42, 4  ;;  %v1290_v39 = vrot.slane %v1284_v52, 4 }
 0x129   : >> { %v1277_v47 = vadd.f32 %v1272_v46, %v1258_v20  ;;  %v1278_v57 = vadd.f32 %v1274_v28, %v1259_v43  ;;  %v1292_v49 = vrot.slane %v1285_v44, 4  ;;  %v1302_v54 = vmul.f32 %v1301_v58, %v3031_v45 }
 0x12a   : >> { %v1303_v55 = vmul.f32 %v1301_v58, %v3033_v23  ;;  %v1304_v53 = vmul.f32 %v1301_v58, %v3035_v48  ;;  %v1320_v59 = vrot.slane %v2654_v15, %v2677_v19  ;;  %v1291_v31 = vsel %vm500_vm3, %v1289_v56, %v1290_v39 }
 0x12b   : >> { %v1293_v40 = vsel %vm500_vm3, %v1290_v39, %v1292_v49  ;;  %v1296_v60 = vadd.f32 %v1291_v31, %v1277_v47  ;;  %v1308_v30 = vrot.slane %v1302_v54, 5  ;;  %v2344_v1 = vmov 0.0|0.0  }
 0x12c   : >> { %v1297_v21 = vadd.f32 %v1293_v40, %v1278_v57  ;;  %v1309_v22 = vrot.slane %v1303_v55, 5  ;;  %1883 = vmatprep.subr.bf16.mxu0 %v2344_v1  ;;  %v1311_v62 = vrot.slane %v1304_v53, 5  ;;  %v1321_v18 = vmul.f32 %v1320_v59, %v3031_v45 }
 0x12d   : >> { %v1322_v2 = vmul.f32 %v1320_v59, %v3033_v23  ;;  %v1323_v26 = vmul.f32 %v1320_v59, %v3035_v48  ;;  %v2346_v17 = vmov 0.0   ;;  %v2330_v56 = vmov (%p409_p2), 0.0  }
 0x12e   : >> { %v1310_v27 = vsel %vm520_vm4, %v1308_v30, %v1309_v22  ;;  %v1312_v4 = vsel %vm520_vm4, %v1309_v22, %v1311_v62  ;;  %v1327_v6 = vrot.slane %v1321_v18, 6  ;;  %1873 = vmatprep.mubr.msk.f32.mxu0 %vm2345_vm6, %v2346_v17 }
 0x12f   : >> { %v1315_v5 = vadd.f32 %v1310_v27, %v1296_v60  ;;  %v1328_v7 = vrot.slane %v1322_v2, 6  ;;  %v1316_v63 = vadd.f32 %v1312_v4, %v1297_v21  ;;  %v1330_v0 = vrot.slane %v1323_v26, 6 }
 0x131   : >> { %v1329_v45 = vsel %vm540_vm5, %v1327_v6, %v1328_v7  ;;  %v1331_v23 = vsel %vm540_vm5, %v1328_v7, %v1330_v0 }
 0x132   : >> { %v1334_v3 = vadd.f32 %v1329_v45, %v1315_v5  ;;  %v1335_v48 = vadd.f32 %v1331_v23, %v1316_v63 }
 0x134   : >> { %v1342_v24 = vadd.f32 %v2640_v8, %v1334_v3  ;;  %v1343_v25 = vadd.f32 %v2640_v8, %v1335_v48 }
 0x136   : >> { %v1344_v32 = vmax.f32 %v1342_v24, 0.0  ;;  %v1345_v33 = vmax.f32 %v1343_v25, 0.0 }
 0x138   : >> { %v1348_v34 = vrot.slane %v1344_v32, 5  ;;  %v1349_v61 = vrot.slane %v1345_v33, 5 }
 0x13a   : >> { %v1354_v38 = vadd.f32 %v2845_v50, %v1348_v34  ;;  %v1350_v36 = vsel %vm520_vm4, %v1348_v34, %v1349_v61  ;;  %v1356_v35 = vadd.f32 %v2853_v29, %v1349_v61  ;;  %v2347_v50 = vmov 1.0  }
 0x13b   : >> { %v1355_v37 = vadd.f32 %v2848_v51, %v1350_v36 }
 0x13c   : >> { %1359 = vst [vmem:[%s1358_s18 - $0x3] sm:$0xf8] %v1354_v38  ;;  %v1365_v41 = vrot.slane %v1354_v38, 3  ;;  %1361 = vst [vmem:[%s1358_s18 + $0xd] sm:$0x7] %v1356_v35  ;;  %v1368_v42 = vrot.slane %v1356_v35, 3 }
 0x13d   : >> { %1360 = vst [vmem:[%s1358_s18 + $0x5] sm:$0xff] %v1355_v37  ;;  %v1366_v20 = vrot.slane %v1355_v37, 3 }
 0x13f   : >> { %v1367_v43 = vsel %vm480_vm2, %v1365_v41, %v1366_v20  ;;  %v1369_v52 = vsel %vm480_vm2, %v1366_v20, %v1368_v42 }
 0x140   : >> { %v1884_v44 = vpack.c.bf16 %v1369_v52, %v1367_v43 }
 0x142   : >> { %1885 = vmatpush3.bf16.msra.mxu0 %v1884_v44 }
 0x145   : >> { %1874 = vmatmul.mubr.msk.f32.vlgmr.msra.gmra.mrb[0].mxu0 %vm1372_vm7, %v2347_v50 }
 0x215   : > { %411 = sbr.rel (!%p409_p2) target bundleno = 169 (0xa9), region = 159 }
 0x218   : >> { %v1442_v46 = vpop.f32.mrb[0].mxu0 }
 0x219   : >> { %v1875_v29 = vpop.f32.mrb[1].mxu0  ;;  %v1446_v51 = vadd.f32 %v2324_v16, %v1442_v46  }
 0x21b   : >> { %v3274_v16 = vmov %v1446_v51  ;;  %v1447_v28 = vmul.f32 (%p409_p2), 0.00390625, %v1446_v51 }
 0x21c LB: >> { %v2348_v58 = vmov 0.0|0.0   ;;  %vm2349_vm8 = vmmov 0   ;;  %v2350_v47 = vmov 0.0   ;;  %s1853_s16 = sshll.u32 %s2336_s13, 4  ;;  %v2351_v14 = vmov 1.0   ;;  %s1453_s13 = sadd.s32 1, %s2336_s13   ;;  %s2336_s13 = sphi %s3102_s13, %s1453_s13   ;;  %v2332_v56 = vphi %v2330_v56, %v2331_v56  }
 0x21d   : >> { %1886 = vmatprep.subr.bf16.mxu0 %v2348_v58  ;;  %v1462_v16 = vrot.slane %v1447_v28, %v2677_v19  ;;  %1880 = vmatprep.mubr.msk.f32.mxu0 %vm2349_vm8, %v2350_v47  ;;  %s1456_s14 = scalar_lea.vmem %s2656_s29, %s1853_s16 [#allocation10]  ;;  %p1450_p6 = scmp.ge.s32.totalorder %s1453_s13, 16  }
 0x21e   : >> { %v1457_v57 = vld [vmem:[%s1456_s14] sm:$0xff]  ;;  %v1458_v8 = vld [vmem:[%s1456_s14 + $0x8] sm:$0xff]  ;;  %1542 = vst [vmem:[%s378_s9] sm:$0x1] (%p1450_p6), %v1446_v51  ;;  %s1858_s12 = sshll.u32 (%p1450_p6), %s2312_s24, 4  ;;  %s1584_s19 = sshll.u32 (%p1450_p6), %s378_s9, 4  ;;  %s3122_s19 = int_to_ptr.vmem [resolvable:$true] %s1584_s19 }
 0x21f   : >> { %v1463_v9 = vsub.f32 %v1457_v57, %v1462_v16  ;;  %v1464_v10 = vsub.f32 %v1458_v8, %v1462_v16  ;;  %s3118_s15 = scalar_lea.hbm (%p1450_p6), %s3241_s5, %s1858_s12  ;;  %s3127_s8 = scalar_lea.hbm (%p1450_p6), %s3242_s6, %s1858_s12 }
 0x220   : > { %s3131_s0 = scalar_lea.sflag (%p1450_p6), [#allocation12], %s333_s3  ;;  %s2150_s18 = scalar_lea.vmem (%p1450_p6), %s3122_s19, 16 }
 0x221   : >> { %v1465_v11 = vmul.f32 %v1463_v9, %v1463_v9  ;;  %v1466_v12 = vmul.f32 %v1464_v10, %v1464_v10  ;;  %p2151_p10 = scmp.ne.s32.totalorder (%p1450_p6), %s3122_s19, %s2150_s18  ;;  %p3275_p3 = scmp.ne.s32.totalorder (%p1450_p6), %s3262_s10, 0 }
 0x222   : > { %s2352_s13 = smov (%p1450_p6), [#allocation11]  }
 0x223   : >> { %v1887_v13 = vpack.c.bf16 %v1466_v12, %v1465_v11  ;;  %p2152_p4 = pnand (%p1450_p6), %p2151_p10, %p3275_p3  ;;  %s2154_s9 = sshll.u32 (%p1450_p6), %s2352_s13, 4  ;;  %s2155_s9 = int_to_ptr.vmem [resolvable:$false] %s2154_s9 }
 0x224   : > { %s2156_s16 = scalar_lea.vmem (%p1450_p6), %s2155_s9, 32  ;;  %p2157_p5 = scmp.lt.s32.totalorder (%p1450_p6), %s3122_s19, %s2155_s9 }
 0x225   : >> { %1888 = vmatpush3.bf16.msra.mxu0 %v1887_v13  ;;  %p2153_p9 = pneg (%p1450_p6), %p2152_p4  ;;  %p2158_p7 = scmp.lt.s32.totalorder (%p1450_p6), %s2156_s16, %s2150_s18 }
 0x227   : > { %p2159_p13 = por (%p1450_p6), %p2158_p7, %p2157_p5 }
 0x228   : >> { %1881 = vmatmul.mubr.msk.f32.vlgmr.msra.gmra.mrb[0].mxu0 %vm1372_vm7, %v2351_v14 }
 0x229   : > { %p2160_p8 = pnand (%p1450_p6), %p2159_p13, %p2153_p9 }
 0x2f8   : > { %1452 = sbr.rel (!%p1450_p6) target bundleno = 540 (0x21c), region = 170 }
 0x2fb   : >> { %v1537_v15 = vpop.f32.mrb[0].mxu0 }
 0x2fc   : >> { %v1541_v39 = vadd.f32 %v2332_v56, %v1537_v15   ;;  %v1882_v49 = vpop.f32.mrb[1].mxu0 }
 0x2fe   : >> { %v2331_v56 = vmov %v1541_v39   ;;  %1543 = vst [vmem:[%s384_s28] sm:$0x1] (%p1450_p6), %v1541_v39 }
 0x2ff   : > { %2163 = shalt.err (!%p2160_p8)
}
 0x300   : > { %s2164_s27 = scalar_lea.hbm %s3118_s15, 16  ;;  %s2168_s12 = scalar_lea.hbm %s3241_s5, 32 }
 0x301   : > { %p2165_p12 = scmp.ne.s32.totalorder %s3118_s15, %s2164_s27  ;;  %p2169_p0 = scmp.lt.u32.totalorder %s3118_s15, %s3241_s5 }
 0x302   : > { %p2170_p2 = scmp.lt.u32.totalorder %s2168_s12, %s2164_s27  ;;  %p2172_p10 = scmp.lt.u32.totalorder %s2164_s27, %s3118_s15 }
 0x303   : > { %p2166_p1 = pnand %p2165_p12, %p3275_p3 }
 0x304   : > { %p2171_p6 = por %p2170_p2, %p2169_p0 }
 0x305   : > { %p2167_p11 = pneg %p2166_p1 }
 0x306   : > { %p2173_p4 = por %p2172_p10, %p2171_p6 }
 0x308   : > { %p2174_p9 = pnand %p2173_p4, %p2167_p11 }
 0x30a   : > { %2177 = shalt.err (!%p2174_p9)
}
 0x30b   : > { %1905 = dma.vmem_to_hbm [thread:$0]  (%p3275_p3), %s3122_s19, 16, %s3118_s15, %s3131_s0  }
 0x30c   : > { %s1862_s17 = sshll.u32 %s2312_s24, 12  ;;  %s1567_s9 = sshll.u32 %s2656_s29, 4  ;;  %s3162_s9 = int_to_ptr.vmem [resolvable:$true] %s1567_s9 }
 0x30d   : > { %s3159_s13 = scalar_lea.hbm %s3240_s4, %s1862_s17  ;;  %s3166_s16 = sshll.u32 %s384_s28, 4  ;;  %s1599_s16 = int_to_ptr.vmem [resolvable:$true] %s3166_s16 }
 0x30e   : > { %s1545_s27 = scalar_lea.sflag [#allocation4], %s2613_s20  ;;  %s2178_s3 = scalar_lea.vmem %s3162_s9, 4096 }
 0x30f   : > { %p2179_p5 = scmp.ne.s32.totalorder %s3162_s9, %s2178_s3  ;;  %s2353_s24 = smov [#allocation10]  }
 0x310   : > { %s2182_s15 = sshll.u32 %s2353_s24, 4  ;;  %s2183_s15 = int_to_ptr.vmem [resolvable:$false] %s2182_s15 }
 0x311   : > { %p2180_p7 = pnand %p2179_p5, %p3275_p3  ;;  %s2184_s19 = scalar_lea.vmem %s2183_s15, 8192 }
 0x312   : > { %p2185_p8 = scmp.lt.s32.totalorder %s3162_s9, %s2183_s15  ;;  %p2186_p12 = scmp.lt.s32.totalorder %s2184_s19, %s2178_s3 }
 0x313   : > { %p2181_p13 = pneg %p2180_p7 }
 0x314   : > { %p2187_p1 = por %p2186_p12, %p2185_p8 }
 0x316   : > { %p2188_p11 = pnand %p2187_p1, %p2181_p13 }
 0x318   : > { %2191 = shalt.err (!%p2188_p11)
}
 0x319   : > { %s2192_s29 = scalar_lea.hbm %s3159_s13, 4096  ;;  %s2196_s12 = scalar_lea.hbm %s3240_s4, 8192 }
 0x31a   : > { %p2193_p0 = scmp.ne.s32.totalorder %s3159_s13, %s2192_s29  ;;  %p2197_p10 = scmp.lt.u32.totalorder %s3159_s13, %s3240_s4 }
 0x31b   : > { %p2198_p4 = scmp.lt.u32.totalorder %s2196_s12, %s2192_s29  ;;  %p2200_p5 = scmp.lt.u32.totalorder %s2192_s29, %s3159_s13 }
 0x31c   : > { %p2194_p2 = pnand %p2193_p0, %p3275_p3 }
 0x31d   : > { %p2199_p9 = por %p2198_p4, %p2197_p10 }
 0x31e   : > { %p2195_p6 = pneg %p2194_p2 }
 0x31f   : > { %p2201_p7 = por %p2200_p5, %p2199_p9 }
 0x321   : > { %p2202_p13 = pnand %p2201_p7, %p2195_p6 }
 0x323   : > { %2205 = shalt.err (!%p2202_p13)
}
 0x324   : > { %s2354_s17 = smov 128   ;;  %s2355_s2 = smov 8  }
 0x325   : > { %1904 = dma.vmem_to_hbm [thread:$0]  (%p3275_p3), %s3162_s9, 4096, %s3159_s13, %s1545_s27, %s2354_s17, %s2354_s17, %s2355_s2  }
 0x326   : > { %s2206_s18 = scalar_lea.vmem %s1599_s16, 16  ;;  %s2356_s3 = smov [#allocation13]  }
 0x327   : > { %p2207_p8 = scmp.ne.s32.totalorder %s1599_s16, %s2206_s18  ;;  %s2210_s24 = sshll.u32 %s2356_s3, 4  ;;  %s2211_s24 = int_to_ptr.vmem [resolvable:$false] %s2210_s24 }
 0x328   : > { %s2212_s15 = scalar_lea.vmem %s2211_s24, 32  ;;  %p2213_p11 = scmp.lt.s32.totalorder %s1599_s16, %s2211_s24 }
 0x329   : > { %p2208_p12 = pnand %p2207_p8, %p3275_p3  ;;  %p2214_p0 = scmp.lt.s32.totalorder %s2212_s15, %s2206_s18 }
 0x32b   : > { %p2209_p1 = pneg %p2208_p12  ;;  %p2215_p2 = por %p2214_p0, %p2213_p11 }
 0x32d   : > { %p2216_p6 = pnand %p2215_p2, %p2209_p1 }
 0x32f   : > { %2219 = shalt.err (!%p2216_p6)
}
 0x330   : > { %s2220_s20 = scalar_lea.hbm %s3127_s8, 16  ;;  %s2224_s27 = scalar_lea.hbm %s3242_s6, 32 }
 0x331   : > { %p2221_p10 = scmp.ne.s32.totalorder %s3127_s8, %s2220_s20  ;;  %p2225_p5 = scmp.lt.u32.totalorder %s3127_s8, %s3242_s6 }
 0x332   : > { %p2226_p7 = scmp.lt.u32.totalorder %s2224_s27, %s2220_s20  ;;  %p2228_p8 = scmp.lt.u32.totalorder %s2220_s20, %s3127_s8 }
 0x333   : > { %p2222_p4 = pnand %p2221_p10, %p3275_p3 }
 0x334   : > { %p2227_p13 = por %p2226_p7, %p2225_p5 }
 0x335   : > { %p2223_p9 = pneg %p2222_p4 }
 0x336   : > { %p2229_p12 = por %p2228_p8, %p2227_p13 }
 0x338   : > { %p2230_p1 = pnand %p2229_p12, %p2223_p9 }
 0x33a   : > { %2233 = shalt.err (!%p2230_p1)
}
 0x33b   : > { %1906 = dma.vmem_to_hbm [thread:$0]  (%p3275_p3), %s1599_s16, 16, %s3127_s8, %s3131_s0  }
 0x33c PF: > { %s1610_s28 = sand.u32 1, %s2300_s21   ;;  %p3276_p11 = scmp.ne.s32.totalorder %s3255_s30, 0 }
 0x33d   : > { %p3277_p0 = scmp.ge.s32.totalorder %s2320_s26, 2  ;;  %s1611_s14 = scalar_lea.sflag [#allocation4], %s1610_s28 }
 0x33f   : > { %p1925_p2 = pnand %p3277_p0, %p3276_p11 }
 0x341   : > { %2291 = dma.done.wait (!%p1925_p2), %s1611_s14, 4096  }
 0x342   : > { %2293 = vsyncadd (!%p1925_p2), %s1611_s14, 4294963200  ;;  %s3278_s12 = sadd.s32 4294967294, %s2320_s26  }
 0x343   : > { %s1619_s11 = sand.u32 1, %s3278_s12  }
 0x344   : > { %s1620_s7 = scalar_lea.sflag [#allocation12], %s1619_s11 }
 0x345   : > { %2295 = dma.done.wait (!%p1925_p2), %s1620_s7, 32  }
 0x346   : > { %2297 = vsyncadd (!%p1925_p2), %s1620_s7, 4294967264  ;;  %s30_s26 = sadd.s32 1, %s2320_s26   ;;  %s3279_s10 = sld [smem:[#allocation21_spill]] }
 0x347   : > { %p27_p3 = scmp.ge.s32.totalorder %s30_s26, 4   ;;  %s3280_s8 = sld [smem:[#allocation20_spill]] }
 0x348   : > { %s3281_s21 = smov %s2304_s22  ;;  %s3282_s22 = smov %s2308_s23 }
 0x349   : > { %s3284_s24 = smov %s2316_s25  ;;  %29 = sbr.rel (!%p27_p3) target bundleno = 15 (0xf), region = 181 }
 0x34c   : > { %s3283_s23 = smov %s3279_s10 }
 0x34d   : > { %s3285_s25 = smov %s3280_s8 }
 0x350   :  { %1632 = vsyncpa [#allocation3], 1 }
 0x351   :  { %1634 = vsyncpa [#allocation3 + $0x1], 1 }
 0x352   :  { %1635 = vsyncpa [#allocation6], 1 }
 0x353   :  { %1637 = vsyncpa [#allocation6 + $0x1], 1 }
 0x354   :  { %1638 = vsyncpa [#allocation9], 1 }
 0x355   :  { %1639 = vsyncpa [#allocation4], 1 }
 0x356   :  { %1641 = vsyncpa [#allocation4 + $0x1], 1 }
 0x357   :  { %1642 = vsyncpa [#allocation12], 1 }
 0x358   :  { %1644 = vsyncpa [#allocation12 + $0x1], 1 }

</bundles_post_ra>
